<compile_context>
chip_gen: v5e
topology: v5e:2x2
jax: 0.10.0
libtpu: 0.0.40
codegen_flags: <defaults>
</compile_context>

<pallas_src>
import jax
import jax.numpy as jnp
from jax import lax
from jax.experimental import pallas as pl
from jax.experimental.pallas import tpu as pltpu  # noqa: F401  (TPU backend)

# ---- small synthetic config (WavLM-base-like structure, tiny sizes) ----
HIDDEN = 32
NUM_HEADS = 4
HEAD_DIM = HIDDEN // NUM_HEADS
FFN_DIM = 64
NUM_LAYERS = 2
CONV_DIM = 32
# (c_in, c_out, kernel, stride) -- two-layer stand-in for WavLM's 7-layer extractor
CONV_LAYERS = [(1, CONV_DIM, 10, 5), (CONV_DIM, CONV_DIM, 3, 2)]
ATTN_SCALE = 1.0 / (HEAD_DIM ** 0.5)


# ============================== Pallas kernels ==============================

def _conv_mm_gelu_kernel(x_ref, w_ref, o_ref):
    """im2col'ed conv layer: (B*T, Cin*K) @ (Cin*K, Cout) + GELU. bf16 MXU, f32 accum."""
    y = jnp.dot(x_ref[...].astype(jnp.bfloat16), w_ref[...],
                preferred_element_type=jnp.float32)
    # TODO(synk): HF WavLM uses exact (erf) GELU; tanh approximation used here.
    o_ref[...] = jax.nn.gelu(y)


def _make_encoder_pool_kernel(B, T):
    """Fused: feature projection + encoder LN + all encoder layers + AttentionLayer pooling."""
    H, HD, NH = HIDDEN, HEAD_DIM, NUM_HEADS

    def kernel(feats_ref,
               fp_ln_g_ref, fp_ln_b_ref, fp_w_ref, fp_b_ref,
               enc_ln_g_ref, enc_ln_b_ref,
               wqkv_ref, bqkv_ref, wo_ref, bo_ref,
               ln1_g_ref, ln1_b_ref,
               wff1_ref, bff1_ref, wff2_ref, bff2_ref,
               ln2_g_ref, ln2_b_ref,
               att_w1_ref, att_b1_ref, att_w2_ref, att_b2_ref,
               out_ref):

        def ln(x, g, b):
            mu = jnp.mean(x, axis=-1, keepdims=True)
            var = jnp.mean((x - mu) ** 2, axis=-1, keepdims=True)
            return (x - mu) * lax.rsqrt(var + 1e-5) * g + b

        def mm(x, w_bf16):
            # f32 activations cast to bf16 at the MXU input; f32 accumulation.
            return jnp.dot(x.astype(jnp.bfloat16), w_bf16,
                           preferred_element_type=jnp.float32)

        def softmax_rows(s):
            m = jnp.max(s, axis=-1, keepdims=True)
            e = jnp.exp(s - m)
            return e * pl.reciprocal(jnp.sum(e, axis=-1, keepdims=True), approx=True)

        # --- feature projection: LayerNorm + Linear; then encoder input LayerNorm ---
        feats = feats_ref[...]                                        # (B*T, CONV_DIM) f32
        h = ln(feats, fp_ln_g_ref[...], fp_ln_b_ref[...])
        h = mm(h, fp_w_ref[...]) + fp_b_ref[...]                      # (B*T, H)
        # TODO(synk): positional conv embedding and WavLM gated relative position bias omitted.
        h = ln(h, enc_ln_g_ref[...], enc_ln_b_ref[...])

        # --- encoder layers (post-norm, wav2vec2/WavLM-base style) ---
        num_layers = wqkv_ref.shape[0]
        for l in range(num_layers):
            qkv = mm(h, wqkv_ref[l]) + bqkv_ref[l]                    # (B*T, 3H)
            wo_l = wo_ref[l]                                          # (H, H) bf16
            attn_rows = []
            for b in range(B):
                r0 = b * T
                q_b = qkv[r0:r0 + T, 0:H] * ATTN_SCALE                # scale q, not scores
                k_b = qkv[r0:r0 + T, H:2 * H]
                v_b = qkv[r0:r0 + T, 2 * H:3 * H]
                attn_b = None
                for hd in range(NH):
                    c0 = hd * HD
                    qh = q_b[:, c0:c0 + HD].astype(jnp.bfloat16)
                    kh = k_b[:, c0:c0 + HD].astype(jnp.bfloat16)
                    vh = v_b[:, c0:c0 + HD].astype(jnp.bfloat16)
                    # q @ k^T without an explicit transpose (contract last dims).
                    scores = lax.dot_general(
                        qh, kh, (((1,), (1,)), ((), ())),
                        preferred_element_type=jnp.float32)           # (T, T)
                    p = softmax_rows(scores)
                    ctx_h = jnp.dot(p.astype(jnp.bfloat16), vh,
                                    preferred_element_type=jnp.float32)  # (T, HD)
                    # Fold the output projection per head: keeps matmul outputs H=32 lanes
                    # wide and avoids any lane-axis concatenation of HEAD_DIM=8 pieces.
                    part = jnp.dot(ctx_h.astype(jnp.bfloat16),
                                   wo_l[c0:c0 + HD, :],
                                   preferred_element_type=jnp.float32)   # (T, H)
                    attn_b = part if attn_b is None else attn_b + part
                attn_rows.append(attn_b)
            attn_out = jnp.concatenate(attn_rows, axis=0) + bo_ref[l]    # (B*T, H)
            h = ln(h + attn_out, ln1_g_ref[l], ln1_b_ref[l])
            # FFN (intermediate stays in VMEM). TODO(synk): exact erf GELU in HF WavLM.
            ff = jax.nn.gelu(mm(h, wff1_ref[l]) + bff1_ref[l])           # (B*T, FFN_DIM)
            ff = mm(ff, wff2_ref[l]) + bff2_ref[l]                       # (B*T, H)
            h = ln(h + ff, ln2_g_ref[l], ln2_b_ref[l])

        # --- AttentionLayer pooling over time, per batch element, all in VMEM ---
        pooled_rows = []
        for b in range(B):
            h_b = h[b * T:(b + 1) * T, :]                                # (T, H)
            t = jnp.tanh(mm(h_b, att_w1_ref[...]) + att_b1_ref[...])     # (T, H)
            s = mm(t, att_w2_ref[...]) + att_b2_ref[...]                 # (T, 1)
            m = jnp.max(s, axis=0, keepdims=True)
            e = jnp.exp(s - m)
            w = e * pl.reciprocal(jnp.sum(e, axis=0, keepdims=True), approx=True)
            pooled_rows.append(jnp.sum(h_b * w, axis=0, keepdims=True))  # (1, H)
        out_ref[...] = jnp.concatenate(pooled_rows, axis=0)              # single store

    return kernel


# ============================== Pallas wrappers ==============================

def pallas_conv_mm_gelu(patches, wmat_bf16):
    """patches: (B*T, Cin*K) f32, wmat: (Cin*K, Cout) bf16 -> (B*T, Cout) f32."""
    M = patches.shape[0]
    N = wmat_bf16.shape[1]
    K = patches.shape[1]
    return pl.pallas_call(
        _conv_mm_gelu_kernel,
        out_shape=jax.ShapeDtypeStruct((M, N), jnp.float32),
        cost_estimate=pl.CostEstimate(
            flops=2 * M * K * N,
            transcendentals=M * N,
            bytes_accessed=patches.size * 4 + wmat_bf16.size * 2 + M * N * 4),
    )(patches, wmat_bf16)


def pallas_encoder_pool(feats2d, B, T, p):
    """feats2d: (B*T, CONV_DIM) -> pooled (B, HIDDEN). One fused kernel, no grid."""
    kern = _make_encoder_pool_kernel(B, T)
    args = (feats2d,
            p["fp_ln_g"], p["fp_ln_b"], p["fp_w"], p["fp_b"],
            p["enc_ln_g"], p["enc_ln_b"],
            p["wqkv"], p["bqkv"], p["wo"], p["bo"],
            p["ln1_g"], p["ln1_b"],
            p["wff1"], p["bff1"], p["wff2"], p["bff2"],
            p["ln2_g"], p["ln2_b"],
            p["att_w1"], p["att_b1"], p["att_w2"], p["att_b2"])

    bt, h, f, nl = B * T, HIDDEN, FFN_DIM, NUM_LAYERS
    flops = (2 * bt * CONV_DIM * h
             + nl * (2 * bt * h * 3 * h                        # QKV
                     + 2 * bt * h * h                          # O proj (per-head folded)
                     + 4 * bt * h * f                          # FFN1 + FFN2
                     + NUM_HEADS * B * 4 * T * T * HEAD_DIM)   # attention matmuls
             + B * (2 * T * h * h + 2 * T * h))                # pooling
    transcendentals = (nl * (NUM_HEADS * B * T * T + bt * f)   # softmax exp + gelu
                       + B * (T * h + T))                      # pooling tanh + exp
    bytes_accessed = sum(int(a.size) * a.dtype.itemsize for a in args) + B * h * 4

    return pl.pallas_call(
        kern,
        out_shape=jax.ShapeDtypeStruct((B, HIDDEN), jnp.float32),
        cost_estimate=pl.CostEstimate(flops=int(flops),
                                      transcendentals=int(transcendentals),
                                      bytes_accessed=int(bytes_accessed)),
    )(*args)


# ============================== model glue ==============================

def im2col_1d(x, kernel, stride):
    """x: (B, C, L) -> patches (B*T, C*kernel), T."""
    # TODO(synk): window extraction done host-side with an XLA gather; an in-kernel strided
    # window read would remove this HBM intermediate.
    B, C, L = x.shape
    T = (L - kernel) // stride + 1
    idx = jnp.arange(T)[:, None] * stride + jnp.arange(kernel)[None, :]   # (T, K)
    patches = x[:, :, idx]                                                # (B, C, T, K)
    patches = jnp.transpose(patches, (0, 2, 1, 3)).reshape(B * T, C * kernel)
    return patches, T


def forward(input_values, params):
    """input_values: (B, L) float32 raw waveform -> (B, HIDDEN) attended features."""
    B = input_values.shape[0]
    x = input_values[:, None, :]                                          # (B, 1, L)

    # --- WavLM feature extractor: conv1d (no bias) + GELU stack ---
    # TODO(synk): WavLM's per-channel GroupNorm on the first conv layer is omitted.
    y2d, T = None, None
    n_conv = len(CONV_LAYERS)
    for i, ((c_in, c_out, k, stride), cp) in enumerate(zip(CONV_LAYERS, params["conv"])):
        patches, T = im2col_1d(x, k, stride)                              # (B*T, c_in*k)
        y2d = pallas_conv_mm_gelu(patches, cp["wmat"])                    # (B*T, c_out)
        if i + 1 < n_conv:
            x = y2d.reshape(B, T, c_out).transpose(0, 2, 1)               # (B, c_out, T)

    # --- feature projection + encoder + AttentionLayer pooling: one fused kernel ---
    pooled = pallas_encoder_pool(y2d, B, T, params)                       # (B, HIDDEN)
    return pooled


# ============================== deterministic params ==============================

def init_params(key):
    ks = iter(jax.random.split(key, 128))

    def nrm(shape, scale=0.05):
        return jax.random.normal(next(ks), shape, jnp.float32) * scale

    p = {}
    # conv weights pre-reshaped to (c_in*k, c_out) and cast to bf16 (MXU operand).
    p["conv"] = []
    for (c_in, c_out, k, s) in CONV_LAYERS:
        w = nrm((c_out, c_in, k))
        p["conv"].append({"wmat": w.reshape(c_out, c_in * k).T.astype(jnp.bfloat16)})

    p["fp_ln_g"] = jnp.ones((1, CONV_DIM), jnp.float32)
    p["fp_ln_b"] = jnp.zeros((1, CONV_DIM), jnp.float32)
    p["fp_w"] = nrm((CONV_DIM, HIDDEN)).astype(jnp.bfloat16)
    p["fp_b"] = jnp.zeros((1, HIDDEN), jnp.float32)
    p["enc_ln_g"] = jnp.ones((1, HIDDEN), jnp.float32)
    p["enc_ln_b"] = jnp.zeros((1, HIDDEN), jnp.float32)

    wqkv, bqkv, wo, bo = [], [], [], []
    ln1_g, ln1_b, wff1, bff1, wff2, bff2, ln2_g, ln2_b = ([] for _ in range(8))
    for _ in range(NUM_LAYERS):
        wq, wk, wv = nrm((HIDDEN, HIDDEN)), nrm((HIDDEN, HIDDEN)), nrm((HIDDEN, HIDDEN))
        wqkv.append(jnp.concatenate([wq, wk, wv], axis=1))                # (H, 3H)
        bqkv.append(jnp.zeros((1, 3 * HIDDEN), jnp.float32))
        wo.append(nrm((HIDDEN, HIDDEN)))
        bo.append(jnp.zeros((1, HIDDEN), jnp.float32))
        ln1_g.append(jnp.ones((1, HIDDEN), jnp.float32))
        ln1_b.append(jnp.zeros((1, HIDDEN), jnp.float32))
        wff1.append(nrm((HIDDEN, FFN_DIM)))
        bff1.append(jnp.zeros((1, FFN_DIM), jnp.float32))
        wff2.append(nrm((FFN_DIM, HIDDEN)))
        bff2.append(jnp.zeros((1, HIDDEN), jnp.float32))
        ln2_g.append(jnp.ones((1, HIDDEN), jnp.float32))
        ln2_b.append(jnp.zeros((1, HIDDEN), jnp.float32))

    p["wqkv"] = jnp.stack(wqkv).astype(jnp.bfloat16)      # (L, H, 3H)
    p["bqkv"] = jnp.stack(bqkv)                           # (L, 1, 3H)
    p["wo"] = jnp.stack(wo).astype(jnp.bfloat16)          # (L, H, H)
    p["bo"] = jnp.stack(bo)
    p["ln1_g"] = jnp.stack(ln1_g)
    p["ln1_b"] = jnp.stack(ln1_b)
    p["wff1"] = jnp.stack(wff1).astype(jnp.bfloat16)      # (L, H, F)
    p["bff1"] = jnp.stack(bff1)
    p["wff2"] = jnp.stack(wff2).astype(jnp.bfloat16)      # (L, F, H)
    p["bff2"] = jnp.stack(bff2)
    p["ln2_g"] = jnp.stack(ln2_g)
    p["ln2_b"] = jnp.stack(ln2_b)

    # AttentionLayer: Linear(H,H) -> Tanh -> Linear(H,1) -> softmax(T) -> weighted sum
    p["att_w1"] = nrm((HIDDEN, HIDDEN)).astype(jnp.bfloat16)
    p["att_b1"] = jnp.zeros((1, HIDDEN), jnp.float32)
    p["att_w2"] = nrm((HIDDEN, 1)).astype(jnp.bfloat16)
    p["att_b2"] = jnp.zeros((1, 1), jnp.float32)
    return p


if __name__ == "__main__":
    key = jax.random.PRNGKey(0)
    k_in, k_par = jax.random.split(key)
    # B=2 waveforms of 170 samples -> conv stack gives T=16 frames of CONV_DIM=32 channels.
    input_values = jax.random.normal(k_in, (2, 170), jnp.float32)
    params = init_params(k_par)

    fwd = jax.jit(forward)
    out = fwd(input_values, params)
    out = jax.block_until_ready(out)
    assert out.shape == (2, HIDDEN), out.shape
    assert bool(jnp.all(jnp.isfinite(out)))
    print("KERNEL_OK")
</pallas_src>

<mosaic_0001>
module attributes {stable_mosaic.version = 11 : i64} {
  func.func @_conv_mm_gelu_kernel(%arg0: memref<66x10xf32, #tpu.memory_space<vmem>>, %arg1: memref<10x32xbf16, #tpu.memory_space<vmem>>, %arg2: memref<66x32xf32, #tpu.memory_space<vmem>>) attributes {dimension_semantics = [], scalar_prefetch = 0 : i64, scratch_operands = 0 : i64, tpu.core_type = #tpu.core_type<tc>} {
    %c0 = arith.constant 0 : index
    %c0_0 = arith.constant 0 : index
    %0 = vector.load %arg0[%c0, %c0_0] : memref<66x10xf32, #tpu.memory_space<vmem>>, vector<66x10xf32>
    %1 = arith.truncf %0 : vector<66x10xf32> to vector<66x10xbf16>
    %c0_1 = arith.constant 0 : index
    %c0_2 = arith.constant 0 : index
    %2 = vector.load %arg1[%c0_1, %c0_2] : memref<10x32xbf16, #tpu.memory_space<vmem>>, vector<10x32xbf16>
    %cst = arith.constant dense<0.000000e+00> : vector<66x32xf32>
    %3 = tpu.matmul %1, %2, %cst {dimension_numbers = #tpu.dot_dimension_numbers<[1], [0], [0], [1], [0, 0, 1, 1], [], []>} : vector<66x10xbf16>, vector<10x32xbf16>, vector<66x32xf32> -> vector<66x32xf32>
    %4 = arith.mulf %3, %3 : vector<66x32xf32>
    %5 = arith.mulf %3, %4 : vector<66x32xf32>
    %cst_3 = arith.constant 4.471500e-02 : f32
    %6 = vector.broadcast %cst_3 : f32 to vector<66x32xf32>
    %7 = arith.mulf %6, %5 : vector<66x32xf32>
    %8 = arith.addf %3, %7 : vector<66x32xf32>
    %cst_4 = arith.constant 0.797884583 : f32
    %9 = vector.broadcast %cst_4 : f32 to vector<66x32xf32>
    %10 = arith.mulf %9, %8 : vector<66x32xf32>
    %11 = math.tanh %10 : vector<66x32xf32>
    %cst_5 = arith.constant 1.000000e+00 : f32
    %12 = vector.broadcast %cst_5 : f32 to vector<66x32xf32>
    %13 = arith.addf %12, %11 : vector<66x32xf32>
    %cst_6 = arith.constant 5.000000e-01 : f32
    %14 = vector.broadcast %cst_6 : f32 to vector<66x32xf32>
    %15 = arith.mulf %14, %13 : vector<66x32xf32>
    %16 = arith.mulf %3, %15 : vector<66x32xf32>
    %c0_7 = arith.constant 0 : index
    %c0_8 = arith.constant 0 : index
    %17 = vector.load %arg2[%c0_7, %c0_8] : memref<66x32xf32, #tpu.memory_space<vmem>>, vector<66x32xf32>
    tpu.vector_store %arg2[%c0_7, %c0_8], %16 {strides = array<i32>} : memref<66x32xf32, #tpu.memory_space<vmem>>, vector<66x32xf32>,
    return
  }
}

module attributes {stable_mosaic.version = 11 : i64} {
  func.func @_conv_mm_gelu_kernel(%arg0: memref<32x96xf32, #tpu.memory_space<vmem>>, %arg1: memref<96x32xbf16, #tpu.memory_space<vmem>>, %arg2: memref<32x32xf32, #tpu.memory_space<vmem>>) attributes {dimension_semantics = [], scalar_prefetch = 0 : i64, scratch_operands = 0 : i64, tpu.core_type = #tpu.core_type<tc>} {
    %c0 = arith.constant 0 : index
    %c0_0 = arith.constant 0 : index
    %0 = vector.load %arg0[%c0, %c0_0] : memref<32x96xf32, #tpu.memory_space<vmem>>, vector<32x96xf32>
    %1 = arith.truncf %0 : vector<32x96xf32> to vector<32x96xbf16>
    %c0_1 = arith.constant 0 : index
    %c0_2 = arith.constant 0 : index
    %2 = vector.load %arg1[%c0_1, %c0_2] : memref<96x32xbf16, #tpu.memory_space<vmem>>, vector<96x32xbf16>
    %cst = arith.constant dense<0.000000e+00> : vector<32x32xf32>
    %3 = tpu.matmul %1, %2, %cst {dimension_numbers = #tpu.dot_dimension_numbers<[1], [0], [0], [1], [0, 0, 1, 1], [], []>} : vector<32x96xbf16>, vector<96x32xbf16>, vector<32x32xf32> -> vector<32x32xf32>
    %4 = arith.mulf %3, %3 : vector<32x32xf32>
    %5 = arith.mulf %3, %4 : vector<32x32xf32>
    %cst_3 = arith.constant 4.471500e-02 : f32
    %6 = vector.broadcast %cst_3 : f32 to vector<32x32xf32>
    %7 = arith.mulf %6, %5 : vector<32x32xf32>
    %8 = arith.addf %3, %7 : vector<32x32xf32>
    %cst_4 = arith.constant 0.797884583 : f32
    %9 = vector.broadcast %cst_4 : f32 to vector<32x32xf32>
    %10 = arith.mulf %9, %8 : vector<32x32xf32>
    %11 = math.tanh %10 : vector<32x32xf32>
    %cst_5 = arith.constant 1.000000e+00 : f32
    %12 = vector.broadcast %cst_5 : f32 to vector<32x32xf32>
    %13 = arith.addf %12, %11 : vector<32x32xf32>
    %cst_6 = arith.constant 5.000000e-01 : f32
    %14 = vector.broadcast %cst_6 : f32 to vector<32x32xf32>
    %15 = arith.mulf %14, %13 : vector<32x32xf32>
    %16 = arith.mulf %3, %15 : vector<32x32xf32>
    %c0_7 = arith.constant 0 : index
    %c0_8 = arith.constant 0 : index
    %17 = vector.load %arg2[%c0_7, %c0_8] : memref<32x32xf32, #tpu.memory_space<vmem>>, vector<32x32xf32>
    tpu.vector_store %arg2[%c0_7, %c0_8], %16 {strides = array<i32>} : memref<32x32xf32, #tpu.memory_space<vmem>>, vector<32x32xf32>,
    return
  }
}

module attributes {stable_mosaic.version = 11 : i64} {
  func.func @kernel(%arg0: memref<32x32xf32, #tpu.memory_space<vmem>>, %arg1: memref<1x32xf32, #tpu.memory_space<vmem>>, %arg2: memref<1x32xf32, #tpu.memory_space<vmem>>, %arg3: memref<32x32xbf16, #tpu.memory_space<vmem>>, %arg4: memref<1x32xf32, #tpu.memory_space<vmem>>, %arg5: memref<1x32xf32, #tpu.memory_space<vmem>>, %arg6: memref<1x32xf32, #tpu.memory_space<vmem>>, %arg7: memref<2x32x96xbf16, #tpu.memory_space<vmem>>, %arg8: memref<2x1x96xf32, #tpu.memory_space<vmem>>, %arg9: memref<2x32x32xbf16, #tpu.memory_space<vmem>>, %arg10: memref<2x1x32xf32, #tpu.memory_space<vmem>>, %arg11: memref<2x1x32xf32, #tpu.memory_space<vmem>>, %arg12: memref<2x1x32xf32, #tpu.memory_space<vmem>>, %arg13: memref<2x32x64xbf16, #tpu.memory_space<vmem>>, %arg14: memref<2x1x64xf32, #tpu.memory_space<vmem>>, %arg15: memref<2x64x32xbf16, #tpu.memory_space<vmem>>, %arg16: memref<2x1x32xf32, #tpu.memory_space<vmem>>, %arg17: memref<2x1x32xf32, #tpu.memory_space<vmem>>, %arg18: memref<2x1x32xf32, #tpu.memory_space<vmem>>, %arg19: memref<32x32xbf16, #tpu.memory_space<vmem>>, %arg20: memref<1x32xf32, #tpu.memory_space<vmem>>, %arg21: memref<32x1xbf16, #tpu.memory_space<vmem>>, %arg22: memref<1x1xf32, #tpu.memory_space<vmem>>, %arg23: memref<2x32xf32, #tpu.memory_space<vmem>>) attributes {dimension_semantics = [], scalar_prefetch = 0 : i64, scratch_operands = 0 : i64, tpu.core_type = #tpu.core_type<tc>} {
    %c0 = arith.constant 0 : index
    %c0_0 = arith.constant 0 : index
    %0 = vector.load %arg0[%c0, %c0_0] : memref<32x32xf32, #tpu.memory_space<vmem>>, vector<32x32xf32>
    %c0_1 = arith.constant 0 : index
    %c0_2 = arith.constant 0 : index
    %1 = vector.load %arg1[%c0_1, %c0_2] : memref<1x32xf32, #tpu.memory_space<vmem>>, vector<1x32xf32>
    %c0_3 = arith.constant 0 : index
    %c0_4 = arith.constant 0 : index
    %2 = vector.load %arg2[%c0_3, %c0_4] : memref<1x32xf32, #tpu.memory_space<vmem>>, vector<1x32xf32>
    %cst = arith.constant dense<0.000000e+00> : vector<32xf32>
    %3 = vector.multi_reduction <add>, %0, %cst [1] : vector<32x32xf32> to vector<32xf32>
    %4 = vector.shape_cast %3 : vector<32xf32> to vector<32x1xf32>
    %cst_5 = arith.constant 3.200000e+01 : f32
    %5 = vector.broadcast %cst_5 : f32 to vector<32x1xf32>
    %6 = arith.divf %4, %5 : vector<32x1xf32>
    %7 = vector.broadcast %6 : vector<32x1xf32> to vector<32x32xf32>
    %8 = arith.subf %0, %7 : vector<32x32xf32>
    %9 = arith.mulf %8, %8 : vector<32x32xf32>
    %cst_6 = arith.constant dense<0.000000e+00> : vector<32xf32>
    %10 = vector.multi_reduction <add>, %9, %cst_6 [1] : vector<32x32xf32> to vector<32xf32>
    %11 = vector.shape_cast %10 : vector<32xf32> to vector<32x1xf32>
    %cst_7 = arith.constant 3.200000e+01 : f32
    %12 = vector.broadcast %cst_7 : f32 to vector<32x1xf32>
    %13 = arith.divf %11, %12 : vector<32x1xf32>
    %14 = vector.broadcast %6 : vector<32x1xf32> to vector<32x32xf32>
    %15 = arith.subf %0, %14 : vector<32x32xf32>
    %cst_8 = arith.constant 9.99999974E-6 : f32
    %16 = vector.broadcast %cst_8 : f32 to vector<32x1xf32>
    %17 = arith.addf %13, %16 : vector<32x1xf32>
    %18 = math.rsqrt %17 : vector<32x1xf32>
    %19 = vector.broadcast %18 : vector<32x1xf32> to vector<32x32xf32>
    %20 = arith.mulf %15, %19 : vector<32x32xf32>
    %21 = vector.broadcast %1 : vector<1x32xf32> to vector<32x32xf32>
    %22 = arith.mulf %20, %21 : vector<32x32xf32>
    %23 = vector.broadcast %2 : vector<1x32xf32> to vector<32x32xf32>
    %24 = arith.addf %22, %23 : vector<32x32xf32>
    %c0_9 = arith.constant 0 : index
    %c0_10 = arith.constant 0 : index
    %25 = vector.load %arg3[%c0_9, %c0_10] : memref<32x32xbf16, #tpu.memory_space<vmem>>, vector<32x32xbf16>
    %26 = arith.truncf %24 : vector<32x32xf32> to vector<32x32xbf16>
    %cst_11 = arith.constant dense<0.000000e+00> : vector<32x32xf32>
    %27 = tpu.matmul %26, %25, %cst_11 {dimension_numbers = #tpu.dot_dimension_numbers<[1], [0], [0], [1], [0, 0, 1, 1], [], []>} : vector<32x32xbf16>, vector<32x32xbf16>, vector<32x32xf32> -> vector<32x32xf32>
    %c0_12 = arith.constant 0 : index
    %c0_13 = arith.constant 0 : index
    %28 = vector.load %arg4[%c0_12, %c0_13] : memref<1x32xf32, #tpu.memory_space<vmem>>, vector<1x32xf32>
    %29 = vector.broadcast %28 : vector<1x32xf32> to vector<32x32xf32>
    %30 = arith.addf %27, %29 : vector<32x32xf32>
    %c0_14 = arith.constant 0 : index
    %c0_15 = arith.constant 0 : index
    %31 = vector.load %arg5[%c0_14, %c0_15] : memref<1x32xf32, #tpu.memory_space<vmem>>, vector<1x32xf32>
    %c0_16 = arith.constant 0 : index
    %c0_17 = arith.constant 0 : index
    %32 = vector.load %arg6[%c0_16, %c0_17] : memref<1x32xf32, #tpu.memory_space<vmem>>, vector<1x32xf32>
    %cst_18 = arith.constant dense<0.000000e+00> : vector<32xf32>
    %33 = vector.multi_reduction <add>, %30, %cst_18 [1] : vector<32x32xf32> to vector<32xf32>
    %34 = vector.shape_cast %33 : vector<32xf32> to vector<32x1xf32>
    %cst_19 = arith.constant 3.200000e+01 : f32
    %35 = vector.broadcast %cst_19 : f32 to vector<32x1xf32>
    %36 = arith.divf %34, %35 : vector<32x1xf32>
    %37 = vector.broadcast %36 : vector<32x1xf32> to vector<32x32xf32>
    %38 = arith.subf %30, %37 : vector<32x32xf32>
    %39 = arith.mulf %38, %38 : vector<32x32xf32>
    %cst_20 = arith.constant dense<0.000000e+00> : vector<32xf32>
    %40 = vector.multi_reduction <add>, %39, %cst_20 [1] : vector<32x32xf32> to vector<32xf32>
    %41 = vector.shape_cast %40 : vector<32xf32> to vector<32x1xf32>
    %cst_21 = arith.constant 3.200000e+01 : f32
    %42 = vector.broadcast %cst_21 : f32 to vector<32x1xf32>
    %43 = arith.divf %41, %42 : vector<32x1xf32>
    %44 = vector.broadcast %36 : vector<32x1xf32> to vector<32x32xf32>
    %45 = arith.subf %30, %44 : vector<32x32xf32>
    %cst_22 = arith.constant 9.99999974E-6 : f32
    %46 = vector.broadcast %cst_22 : f32 to vector<32x1xf32>
    %47 = arith.addf %43, %46 : vector<32x1xf32>
    %48 = math.rsqrt %47 : vector<32x1xf32>
    %49 = vector.broadcast %48 : vector<32x1xf32> to vector<32x32xf32>
    %50 = arith.mulf %45, %49 : vector<32x32xf32>
    %51 = vector.broadcast %31 : vector<1x32xf32> to vector<32x32xf32>
    %52 = arith.mulf %50, %51 : vector<32x32xf32>
    %53 = vector.broadcast %32 : vector<1x32xf32> to vector<32x32xf32>
    %54 = arith.addf %52, %53 : vector<32x32xf32>
    %c0_23 = arith.constant 0 : index
    %c0_24 = arith.constant 0 : index
    %c0_25 = arith.constant 0 : index
    %55 = vector.load %arg7[%c0_23, %c0_24, %c0_25] : memref<2x32x96xbf16, #tpu.memory_space<vmem>>, vector<1x32x96xbf16>
    %56 = vector.shape_cast %55 : vector<1x32x96xbf16> to vector<32x96xbf16>
    %57 = arith.truncf %54 : vector<32x32xf32> to vector<32x32xbf16>
    %cst_26 = arith.constant dense<0.000000e+00> : vector<32x96xf32>
    %58 = tpu.matmul %57, %56, %cst_26 {dimension_numbers = #tpu.dot_dimension_numbers<[1], [0], [0], [1], [0, 0, 1, 1], [], []>} : vector<32x32xbf16>, vector<32x96xbf16>, vector<32x96xf32> -> vector<32x96xf32>
    %c0_27 = arith.constant 0 : index
    %c0_28 = arith.constant 0 : index
    %c0_29 = arith.constant 0 : index
    %59 = vector.load %arg8[%c0_27, %c0_28, %c0_29] : memref<2x1x96xf32, #tpu.memory_space<vmem>>, vector<1x1x96xf32>
    %60 = vector.shape_cast %59 : vector<1x1x96xf32> to vector<1x96xf32>
    %61 = vector.broadcast %60 : vector<1x96xf32> to vector<32x96xf32>
    %62 = arith.addf %58, %61 : vector<32x96xf32>
    %c0_30 = arith.constant 0 : index
    %c0_31 = arith.constant 0 : index
    %c0_32 = arith.constant 0 : index
    %63 = vector.load %arg9[%c0_30, %c0_31, %c0_32] : memref<2x32x32xbf16, #tpu.memory_space<vmem>>, vector<1x32x32xbf16>
    %64 = vector.shape_cast %63 : vector<1x32x32xbf16> to vector<32x32xbf16>
    %65 = vector.extract_strided_slice %62 {offsets = [0, 0], sizes = [16, 32], strides = [1, 1]} : vector<32x96xf32> to vector<16x32xf32>
    %cst_33 = arith.constant 0.353553385 : f32
    %66 = vector.broadcast %cst_33 : f32 to vector<16x32xf32>
    %67 = arith.mulf %65, %66 : vector<16x32xf32>
    %68 = vector.extract_strided_slice %62 {offsets = [0, 32], sizes = [16, 32], strides = [1, 1]} : vector<32x96xf32> to vector<16x32xf32>
    %69 = vector.extract_strided_slice %62 {offsets = [0, 64], sizes = [16, 32], strides = [1, 1]} : vector<32x96xf32> to vector<16x32xf32>
    %70 = vector.extract_strided_slice %67 {offsets = [0, 0], sizes = [16, 8], strides = [1, 1]} : vector<16x32xf32> to vector<16x8xf32>
    %71 = arith.truncf %70 : vector<16x8xf32> to vector<16x8xbf16>
    %72 = vector.extract_strided_slice %68 {offsets = [0, 0], sizes = [16, 8], strides = [1, 1]} : vector<16x32xf32> to vector<16x8xf32>
    %73 = arith.truncf %72 : vector<16x8xf32> to vector<16x8xbf16>
    %74 = vector.extract_strided_slice %69 {offsets = [0, 0], sizes = [16, 8], strides = [1, 1]} : vector<16x32xf32> to vector<16x8xf32>
    %75 = arith.truncf %74 : vector<16x8xf32> to vector<16x8xbf16>
    %cst_34 = arith.constant dense<0.000000e+00> : vector<16x16xf32>
    %76 = tpu.matmul %71, %73, %cst_34 {dimension_numbers = #tpu.dot_dimension_numbers<[1], [1], [0], [0], [0, 0, 1, 0], [], []>} : vector<16x8xbf16>, vector<16x8xbf16>, vector<16x16xf32> -> vector<16x16xf32>
    %cst_35 = arith.constant dense<0xFF800000> : vector<16xf32>
    %77 = vector.multi_reduction <maximumf>, %76, %cst_35 [1] : vector<16x16xf32> to vector<16xf32>
    %78 = vector.shape_cast %77 : vector<16xf32> to vector<16x1xf32>
    %79 = vector.broadcast %78 : vector<16x1xf32> to vector<16x16xf32>
    %80 = arith.subf %76, %79 : vector<16x16xf32>
    %81 = math.exp %80 : vector<16x16xf32>
    %cst_36 = arith.constant dense<0.000000e+00> : vector<16xf32>
    %82 = vector.multi_reduction <add>, %81, %cst_36 [1] : vector<16x16xf32> to vector<16xf32>
    %83 = vector.shape_cast %82 : vector<16xf32> to vector<16x1xf32>
    %84 = tpu.reciprocal %83 {approx = true} : vector<16x1xf32> -> vector<16x1xf32>
    %85 = vector.broadcast %84 : vector<16x1xf32> to vector<16x16xf32>
    %86 = arith.mulf %81, %85 : vector<16x16xf32>
    %87 = arith.truncf %86 : vector<16x16xf32> to vector<16x16xbf16>
    %cst_37 = arith.constant dense<0.000000e+00> : vector<16x8xf32>
    %88 = tpu.matmul %87, %75, %cst_37 {dimension_numbers = #tpu.dot_dimension_numbers<[1], [0], [0], [1], [0, 0, 1, 1], [], []>} : vector<16x16xbf16>, vector<16x8xbf16>, vector<16x8xf32> -> vector<16x8xf32>
    %89 = arith.truncf %88 : vector<16x8xf32> to vector<16x8xbf16>
    %90 = vector.extract_strided_slice %64 {offsets = [0, 0], sizes = [8, 32], strides = [1, 1]} : vector<32x32xbf16> to vector<8x32xbf16>
    %cst_38 = arith.constant dense<0.000000e+00> : vector<16x32xf32>
    %91 = tpu.matmul %89, %90, %cst_38 {dimension_numbers = #tpu.dot_dimension_numbers<[1], [0], [0], [1], [0, 0, 1, 1], [], []>} : vector<16x8xbf16>, vector<8x32xbf16>, vector<16x32xf32> -> vector<16x32xf32>
    %92 = vector.extract_strided_slice %67 {offsets = [0, 8], sizes = [16, 8], strides = [1, 1]} : vector<16x32xf32> to vector<16x8xf32>
    %93 = arith.truncf %92 : vector<16x8xf32> to vector<16x8xbf16>
    %94 = vector.extract_strided_slice %68 {offsets = [0, 8], sizes = [16, 8], strides = [1, 1]} : vector<16x32xf32> to vector<16x8xf32>
    %95 = arith.truncf %94 : vector<16x8xf32> to vector<16x8xbf16>
    %96 = vector.extract_strided_slice %69 {offsets = [0, 8], sizes = [16, 8], strides = [1, 1]} : vector<16x32xf32> to vector<16x8xf32>
    %97 = arith.truncf %96 : vector<16x8xf32> to vector<16x8xbf16>
    %cst_39 = arith.constant dense<0.000000e+00> : vector<16x16xf32>
    %98 = tpu.matmul %93, %95, %cst_39 {dimension_numbers = #tpu.dot_dimension_numbers<[1], [1], [0], [0], [0, 0, 1, 0], [], []>} : vector<16x8xbf16>, vector<16x8xbf16>, vector<16x16xf32> -> vector<16x16xf32>
    %cst_40 = arith.constant dense<0xFF800000> : vector<16xf32>
    %99 = vector.multi_reduction <maximumf>, %98, %cst_40 [1] : vector<16x16xf32> to vector<16xf32>
    %100 = vector.shape_cast %99 : vector<16xf32> to vector<16x1xf32>
    %101 = vector.broadcast %100 : vector<16x1xf32> to vector<16x16xf32>
    %102 = arith.subf %98, %101 : vector<16x16xf32>
    %103 = math.exp %102 : vector<16x16xf32>
    %cst_41 = arith.constant dense<0.000000e+00> : vector<16xf32>
    %104 = vector.multi_reduction <add>, %103, %cst_41 [1] : vector<16x16xf32> to vector<16xf32>
    %105 = vector.shape_cast %104 : vector<16xf32> to vector<16x1xf32>
    %106 = tpu.reciprocal %105 {approx = true} : vector<16x1xf32> -> vector<16x1xf32>
    %107 = vector.broadcast %106 : vector<16x1xf32> to vector<16x16xf32>
    %108 = arith.mulf %103, %107 : vector<16x16xf32>
    %109 = arith.truncf %108 : vector<16x16xf32> to vector<16x16xbf16>
    %cst_42 = arith.constant dense<0.000000e+00> : vector<16x8xf32>
    %110 = tpu.matmul %109, %97, %cst_42 {dimension_numbers = #tpu.dot_dimension_numbers<[1], [0], [0], [1], [0, 0, 1, 1], [], []>} : vector<16x16xbf16>, vector<16x8xbf16>, vector<16x8xf32> -> vector<16x8xf32>
    %111 = arith.truncf %110 : vector<16x8xf32> to vector<16x8xbf16>
    %112 = vector.extract_strided_slice %64 {offsets = [8, 0], sizes = [8, 32], strides = [1, 1]} : vector<32x32xbf16> to vector<8x32xbf16>
    %cst_43 = arith.constant dense<0.000000e+00> : vector<16x32xf32>
    %113 = tpu.matmul %111, %112, %cst_43 {dimension_numbers = #tpu.dot_dimension_numbers<[1], [0], [0], [1], [0, 0, 1, 1], [], []>} : vector<16x8xbf16>, vector<8x32xbf16>, vector<16x32xf32> -> vector<16x32xf32>
    %114 = arith.addf %91, %113 : vector<16x32xf32>
    %115 = vector.extract_strided_slice %67 {offsets = [0, 16], sizes = [16, 8], strides = [1, 1]} : vector<16x32xf32> to vector<16x8xf32>
    %116 = arith.truncf %115 : vector<16x8xf32> to vector<16x8xbf16>
    %117 = vector.extract_strided_slice %68 {offsets = [0, 16], sizes = [16, 8], strides = [1, 1]} : vector<16x32xf32> to vector<16x8xf32>
    %118 = arith.truncf %117 : vector<16x8xf32> to vector<16x8xbf16>
    %119 = vector.extract_strided_slice %69 {offsets = [0, 16], sizes = [16, 8], strides = [1, 1]} : vector<16x32xf32> to vector<16x8xf32>
    %120 = arith.truncf %119 : vector<16x8xf32> to vector<16x8xbf16>
    %cst_44 = arith.constant dense<0.000000e+00> : vector<16x16xf32>
    %121 = tpu.matmul %116, %118, %cst_44 {dimension_numbers = #tpu.dot_dimension_numbers<[1], [1], [0], [0], [0, 0, 1, 0], [], []>} : vector<16x8xbf16>, vector<16x8xbf16>, vector<16x16xf32> -> vector<16x16xf32>
    %cst_45 = arith.constant dense<0xFF800000> : vector<16xf32>
    %122 = vector.multi_reduction <maximumf>, %121, %cst_45 [1] : vector<16x16xf32> to vector<16xf32>
    %123 = vector.shape_cast %122 : vector<16xf32> to vector<16x1xf32>
    %124 = vector.broadcast %123 : vector<16x1xf32> to vector<16x16xf32>
    %125 = arith.subf %121, %124 : vector<16x16xf32>
    %126 = math.exp %125 : vector<16x16xf32>
    %cst_46 = arith.constant dense<0.000000e+00> : vector<16xf32>
    %127 = vector.multi_reduction <add>, %126, %cst_46 [1] : vector<16x16xf32> to vector<16xf32>
    %128 = vector.shape_cast %127 : vector<16xf32> to vector<16x1xf32>
    %129 = tpu.reciprocal %128 {approx = true} : vector<16x1xf32> -> vector<16x1xf32>
    %130 = vector.broadcast %129 : vector<16x1xf32> to vector<16x16xf32>
    %131 = arith.mulf %126, %130 : vector<16x16xf32>
    %132 = arith.truncf %131 : vector<16x16xf32> to vector<16x16xbf16>
    %cst_47 = arith.constant dense<0.000000e+00> : vector<16x8xf32>
    %133 = tpu.matmul %132, %120, %cst_47 {dimension_numbers = #tpu.dot_dimension_numbers<[1], [0], [0], [1], [0, 0, 1, 1], [], []>} : vector<16x16xbf16>, vector<16x8xbf16>, vector<16x8xf32> -> vector<16x8xf32>
    %134 = arith.truncf %133 : vector<16x8xf32> to vector<16x8xbf16>
    %135 = vector.extract_strided_slice %64 {offsets = [16, 0], sizes = [8, 32], strides = [1, 1]} : vector<32x32xbf16> to vector<8x32xbf16>
    %cst_48 = arith.constant dense<0.000000e+00> : vector<16x32xf32>
    %136 = tpu.matmul %134, %135, %cst_48 {dimension_numbers = #tpu.dot_dimension_numbers<[1], [0], [0], [1], [0, 0, 1, 1], [], []>} : vector<16x8xbf16>, vector<8x32xbf16>, vector<16x32xf32> -> vector<16x32xf32>
    %137 = arith.addf %114, %136 : vector<16x32xf32>
    %138 = vector.extract_strided_slice %67 {offsets = [0, 24], sizes = [16, 8], strides = [1, 1]} : vector<16x32xf32> to vector<16x8xf32>
    %139 = arith.truncf %138 : vector<16x8xf32> to vector<16x8xbf16>
    %140 = vector.extract_strided_slice %68 {offsets = [0, 24], sizes = [16, 8], strides = [1, 1]} : vector<16x32xf32> to vector<16x8xf32>
    %141 = arith.truncf %140 : vector<16x8xf32> to vector<16x8xbf16>
    %142 = vector.extract_strided_slice %69 {offsets = [0, 24], sizes = [16, 8], strides = [1, 1]} : vector<16x32xf32> to vector<16x8xf32>
    %143 = arith.truncf %142 : vector<16x8xf32> to vector<16x8xbf16>
    %cst_49 = arith.constant dense<0.000000e+00> : vector<16x16xf32>
    %144 = tpu.matmul %139, %141, %cst_49 {dimension_numbers = #tpu.dot_dimension_numbers<[1], [1], [0], [0], [0, 0, 1, 0], [], []>} : vector<16x8xbf16>, vector<16x8xbf16>, vector<16x16xf32> -> vector<16x16xf32>
    %cst_50 = arith.constant dense<0xFF800000> : vector<16xf32>
    %145 = vector.multi_reduction <maximumf>, %144, %cst_50 [1] : vector<16x16xf32> to vector<16xf32>
    %146 = vector.shape_cast %145 : vector<16xf32> to vector<16x1xf32>
    %147 = vector.broadcast %146 : vector<16x1xf32> to vector<16x16xf32>
    %148 = arith.subf %144, %147 : vector<16x16xf32>
    %149 = math.exp %148 : vector<16x16xf32>
    %cst_51 = arith.constant dense<0.000000e+00> : vector<16xf32>
    %150 = vector.multi_reduction <add>, %149, %cst_51 [1] : vector<16x16xf32> to vector<16xf32>
    %151 = vector.shape_cast %150 : vector<16xf32> to vector<16x1xf32>
    %152 = tpu.reciprocal %151 {approx = true} : vector<16x1xf32> -> vector<16x1xf32>
    %153 = vector.broadcast %152 : vector<16x1xf32> to vector<16x16xf32>
    %154 = arith.mulf %149, %153 : vector<16x16xf32>
    %155 = arith.truncf %154 : vector<16x16xf32> to vector<16x16xbf16>
    %cst_52 = arith.constant dense<0.000000e+00> : vector<16x8xf32>
    %156 = tpu.matmul %155, %143, %cst_52 {dimension_numbers = #tpu.dot_dimension_numbers<[1], [0], [0], [1], [0, 0, 1, 1], [], []>} : vector<16x16xbf16>, vector<16x8xbf16>, vector<16x8xf32> -> vector<16x8xf32>
    %157 = arith.truncf %156 : vector<16x8xf32> to vector<16x8xbf16>
    %158 = vector.extract_strided_slice %64 {offsets = [24, 0], sizes = [8, 32], strides = [1, 1]} : vector<32x32xbf16> to vector<8x32xbf16>
    %cst_53 = arith.constant dense<0.000000e+00> : vector<16x32xf32>
    %159 = tpu.matmul %157, %158, %cst_53 {dimension_numbers = #tpu.dot_dimension_numbers<[1], [0], [0], [1], [0, 0, 1, 1], [], []>} : vector<16x8xbf16>, vector<8x32xbf16>, vector<16x32xf32> -> vector<16x32xf32>
    %160 = arith.addf %137, %159 : vector<16x32xf32>
    %161 = vector.extract_strided_slice %62 {offsets = [16, 0], sizes = [16, 32], strides = [1, 1]} : vector<32x96xf32> to vector<16x32xf32>
    %cst_54 = arith.constant 0.353553385 : f32
    %162 = vector.broadcast %cst_54 : f32 to vector<16x32xf32>
    %163 = arith.mulf %161, %162 : vector<16x32xf32>
    %164 = vector.extract_strided_slice %62 {offsets = [16, 32], sizes = [16, 32], strides = [1, 1]} : vector<32x96xf32> to vector<16x32xf32>
    %165 = vector.extract_strided_slice %62 {offsets = [16, 64], sizes = [16, 32], strides = [1, 1]} : vector<32x96xf32> to vector<16x32xf32>
    %166 = vector.extract_strided_slice %163 {offsets = [0, 0], sizes = [16, 8], strides = [1, 1]} : vector<16x32xf32> to vector<16x8xf32>
    %167 = arith.truncf %166 : vector<16x8xf32> to vector<16x8xbf16>
    %168 = vector.extract_strided_slice %164 {offsets = [0, 0], sizes = [16, 8], strides = [1, 1]} : vector<16x32xf32> to vector<16x8xf32>
    %169 = arith.truncf %168 : vector<16x8xf32> to vector<16x8xbf16>
    %170 = vector.extract_strided_slice %165 {offsets = [0, 0], sizes = [16, 8], strides = [1, 1]} : vector<16x32xf32> to vector<16x8xf32>
    %171 = arith.truncf %170 : vector<16x8xf32> to vector<16x8xbf16>
    %cst_55 = arith.constant dense<0.000000e+00> : vector<16x16xf32>
    %172 = tpu.matmul %167, %169, %cst_55 {dimension_numbers = #tpu.dot_dimension_numbers<[1], [1], [0], [0], [0, 0, 1, 0], [], []>} : vector<16x8xbf16>, vector<16x8xbf16>, vector<16x16xf32> -> vector<16x16xf32>
    %cst_56 = arith.constant dense<0xFF800000> : vector<16xf32>
    %173 = vector.multi_reduction <maximumf>, %172, %cst_56 [1] : vector<16x16xf32> to vector<16xf32>
    %174 = vector.shape_cast %173 : vector<16xf32> to vector<16x1xf32>
    %175 = vector.broadcast %174 : vector<16x1xf32> to vector<16x16xf32>
    %176 = arith.subf %172, %175 : vector<16x16xf32>
    %177 = math.exp %176 : vector<16x16xf32>
    %cst_57 = arith.constant dense<0.000000e+00> : vector<16xf32>
    %178 = vector.multi_reduction <add>, %177, %cst_57 [1] : vector<16x16xf32> to vector<16xf32>
    %179 = vector.shape_cast %178 : vector<16xf32> to vector<16x1xf32>
    %180 = tpu.reciprocal %179 {approx = true} : vector<16x1xf32> -> vector<16x1xf32>
    %181 = vector.broadcast %180 : vector<16x1xf32> to vector<16x16xf32>
    %182 = arith.mulf %177, %181 : vector<16x16xf32>
    %183 = arith.truncf %182 : vector<16x16xf32> to vector<16x16xbf16>
    %cst_58 = arith.constant dense<0.000000e+00> : vector<16x8xf32>
    %184 = tpu.matmul %183, %171, %cst_58 {dimension_numbers = #tpu.dot_dimension_numbers<[1], [0], [0], [1], [0, 0, 1, 1], [], []>} : vector<16x16xbf16>, vector<16x8xbf16>, vector<16x8xf32> -> vector<16x8xf32>
    %185 = arith.truncf %184 : vector<16x8xf32> to vector<16x8xbf16>
    %186 = vector.extract_strided_slice %64 {offsets = [0, 0], sizes = [8, 32], strides = [1, 1]} : vector<32x32xbf16> to vector<8x32xbf16>
    %cst_59 = arith.constant dense<0.000000e+00> : vector<16x32xf32>
    %187 = tpu.matmul %185, %186, %cst_59 {dimension_numbers = #tpu.dot_dimension_numbers<[1], [0], [0], [1], [0, 0, 1, 1], [], []>} : vector<16x8xbf16>, vector<8x32xbf16>, vector<16x32xf32> -> vector<16x32xf32>
    %188 = vector.extract_strided_slice %163 {offsets = [0, 8], sizes = [16, 8], strides = [1, 1]} : vector<16x32xf32> to vector<16x8xf32>
    %189 = arith.truncf %188 : vector<16x8xf32> to vector<16x8xbf16>
    %190 = vector.extract_strided_slice %164 {offsets = [0, 8], sizes = [16, 8], strides = [1, 1]} : vector<16x32xf32> to vector<16x8xf32>
    %191 = arith.truncf %190 : vector<16x8xf32> to vector<16x8xbf16>
    %192 = vector.extract_strided_slice %165 {offsets = [0, 8], sizes = [16, 8], strides = [1, 1]} : vector<16x32xf32> to vector<16x8xf32>
    %193 = arith.truncf %192 : vector<16x8xf32> to vector<16x8xbf16>
    %cst_60 = arith.constant dense<0.000000e+00> : vector<16x16xf32>
    %194 = tpu.matmul %189, %191, %cst_60 {dimension_numbers = #tpu.dot_dimension_numbers<[1], [1], [0], [0], [0, 0, 1, 0], [], []>} : vector<16x8xbf16>, vector<16x8xbf16>, vector<16x16xf32> -> vector<16x16xf32>
    %cst_61 = arith.constant dense<0xFF800000> : vector<16xf32>
    %195 = vector.multi_reduction <maximumf>, %194, %cst_61 [1] : vector<16x16xf32> to vector<16xf32>
    %196 = vector.shape_cast %195 : vector<16xf32> to vector<16x1xf32>
    %197 = vector.broadcast %196 : vector<16x1xf32> to vector<16x16xf32>
    %198 = arith.subf %194, %197 : vector<16x16xf32>
    %199 = math.exp %198 : vector<16x16xf32>
    %cst_62 = arith.constant dense<0.000000e+00> : vector<16xf32>
    %200 = vector.multi_reduction <add>, %199, %cst_62 [1] : vector<16x16xf32> to vector<16xf32>
    %201 = vector.shape_cast %200 : vector<16xf32> to vector<16x1xf32>
    %202 = tpu.reciprocal %201 {approx = true} : vector<16x1xf32> -> vector<16x1xf32>
    %203 = vector.broadcast %202 : vector<16x1xf32> to vector<16x16xf32>
    %204 = arith.mulf %199, %203 : vector<16x16xf32>
    %205 = arith.truncf %204 : vector<16x16xf32> to vector<16x16xbf16>
    %cst_63 = arith.constant dense<0.000000e+00> : vector<16x8xf32>
    %206 = tpu.matmul %205, %193, %cst_63 {dimension_numbers = #tpu.dot_dimension_numbers<[1], [0], [0], [1], [0, 0, 1, 1], [], []>} : vector<16x16xbf16>, vector<16x8xbf16>, vector<16x8xf32> -> vector<16x8xf32>
    %207 = arith.truncf %206 : vector<16x8xf32> to vector<16x8xbf16>
    %208 = vector.extract_strided_slice %64 {offsets = [8, 0], sizes = [8, 32], strides = [1, 1]} : vector<32x32xbf16> to vector<8x32xbf16>
    %cst_64 = arith.constant dense<0.000000e+00> : vector<16x32xf32>
    %209 = tpu.matmul %207, %208, %cst_64 {dimension_numbers = #tpu.dot_dimension_numbers<[1], [0], [0], [1], [0, 0, 1, 1], [], []>} : vector<16x8xbf16>, vector<8x32xbf16>, vector<16x32xf32> -> vector<16x32xf32>
    %210 = arith.addf %187, %209 : vector<16x32xf32>
    %211 = vector.extract_strided_slice %163 {offsets = [0, 16], sizes = [16, 8], strides = [1, 1]} : vector<16x32xf32> to vector<16x8xf32>
    %212 = arith.truncf %211 : vector<16x8xf32> to vector<16x8xbf16>
    %213 = vector.extract_strided_slice %164 {offsets = [0, 16], sizes = [16, 8], strides = [1, 1]} : vector<16x32xf32> to vector<16x8xf32>
    %214 = arith.truncf %213 : vector<16x8xf32> to vector<16x8xbf16>
    %215 = vector.extract_strided_slice %165 {offsets = [0, 16], sizes = [16, 8], strides = [1, 1]} : vector<16x32xf32> to vector<16x8xf32>
    %216 = arith.truncf %215 : vector<16x8xf32> to vector<16x8xbf16>
    %cst_65 = arith.constant dense<0.000000e+00> : vector<16x16xf32>
    %217 = tpu.matmul %212, %214, %cst_65 {dimension_numbers = #tpu.dot_dimension_numbers<[1], [1], [0], [0], [0, 0, 1, 0], [], []>} : vector<16x8xbf16>, vector<16x8xbf16>, vector<16x16xf32> -> vector<16x16xf32>
    %cst_66 = arith.constant dense<0xFF800000> : vector<16xf32>
    %218 = vector.multi_reduction <maximumf>, %217, %cst_66 [1] : vector<16x16xf32> to vector<16xf32>
    %219 = vector.shape_cast %218 : vector<16xf32> to vector<16x1xf32>
    %220 = vector.broadcast %219 : vector<16x1xf32> to vector<16x16xf32>
    %221 = arith.subf %217, %220 : vector<16x16xf32>
    %222 = math.exp %221 : vector<16x16xf32>
    %cst_67 = arith.constant dense<0.000000e+00> : vector<16xf32>
    %223 = vector.multi_reduction <add>, %222, %cst_67 [1] : vector<16x16xf32> to vector<16xf32>
    %224 = vector.shape_cast %223 : vector<16xf32> to vector<16x1xf32>
    %225 = tpu.reciprocal %224 {approx = true} : vector<16x1xf32> -> vector<16x1xf32>
    %226 = vector.broadcast %225 : vector<16x1xf32> to vector<16x16xf32>
    %227 = arith.mulf %222, %226 : vector<16x16xf32>
    %228 = arith.truncf %227 : vector<16x16xf32> to vector<16x16xbf16>
    %cst_68 = arith.constant dense<0.000000e+00> : vector<16x8xf32>
    %229 = tpu.matmul %228, %216, %cst_68 {dimension_numbers = #tpu.dot_dimension_numbers<[1], [0], [0], [1], [0, 0, 1, 1], [], []>} : vector<16x16xbf16>, vector<16x8xbf16>, vector<16x8xf32> -> vector<16x8xf32>
    %230 = arith.truncf %229 : vector<16x8xf32> to vector<16x8xbf16>
    %231 = vector.extract_strided_slice %64 {offsets = [16, 0], sizes = [8, 32], strides = [1, 1]} : vector<32x32xbf16> to vector<8x32xbf16>
    %cst_69 = arith.constant dense<0.000000e+00> : vector<16x32xf32>
    %232 = tpu.matmul %230, %231, %cst_69 {dimension_numbers = #tpu.dot_dimension_numbers<[1], [0], [0], [1], [0, 0, 1, 1], [], []>} : vector<16x8xbf16>, vector<8x32xbf16>, vector<16x32xf32> -> vector<16x32xf32>
    %233 = arith.addf %210, %232 : vector<16x32xf32>
    %234 = vector.extract_strided_slice %163 {offsets = [0, 24], sizes = [16, 8], strides = [1, 1]} : vector<16x32xf32> to vector<16x8xf32>
    %235 = arith.truncf %234 : vector<16x8xf32> to vector<16x8xbf16>
    %236 = vector.extract_strided_slice %164 {offsets = [0, 24], sizes = [16, 8], strides = [1, 1]} : vector<16x32xf32> to vector<16x8xf32>
    %237 = arith.truncf %236 : vector<16x8xf32> to vector<16x8xbf16>
    %238 = vector.extract_strided_slice %165 {offsets = [0, 24], sizes = [16, 8], strides = [1, 1]} : vector<16x32xf32> to vector<16x8xf32>
    %239 = arith.truncf %238 : vector<16x8xf32> to vector<16x8xbf16>
    %cst_70 = arith.constant dense<0.000000e+00> : vector<16x16xf32>
    %240 = tpu.matmul %235, %237, %cst_70 {dimension_numbers = #tpu.dot_dimension_numbers<[1], [1], [0], [0], [0, 0, 1, 0], [], []>} : vector<16x8xbf16>, vector<16x8xbf16>, vector<16x16xf32> -> vector<16x16xf32>
    %cst_71 = arith.constant dense<0xFF800000> : vector<16xf32>
    %241 = vector.multi_reduction <maximumf>, %240, %cst_71 [1] : vector<16x16xf32> to vector<16xf32>
    %242 = vector.shape_cast %241 : vector<16xf32> to vector<16x1xf32>
    %243 = vector.broadcast %242 : vector<16x1xf32> to vector<16x16xf32>
    %244 = arith.subf %240, %243 : vector<16x16xf32>
    %245 = math.exp %244 : vector<16x16xf32>
    %cst_72 = arith.constant dense<0.000000e+00> : vector<16xf32>
    %246 = vector.multi_reduction <add>, %245, %cst_72 [1] : vector<16x16xf32> to vector<16xf32>
    %247 = vector.shape_cast %246 : vector<16xf32> to vector<16x1xf32>
    %248 = tpu.reciprocal %247 {approx = true} : vector<16x1xf32> -> vector<16x1xf32>
    %249 = vector.broadcast %248 : vector<16x1xf32> to vector<16x16xf32>
    %250 = arith.mulf %245, %249 : vector<16x16xf32>
    %251 = arith.truncf %250 : vector<16x16xf32> to vector<16x16xbf16>
    %cst_73 = arith.constant dense<0.000000e+00> : vector<16x8xf32>
    %252 = tpu.matmul %251, %239, %cst_73 {dimension_numbers = #tpu.dot_dimension_numbers<[1], [0], [0], [1], [0, 0, 1, 1], [], []>} : vector<16x16xbf16>, vector<16x8xbf16>, vector<16x8xf32> -> vector<16x8xf32>
    %253 = arith.truncf %252 : vector<16x8xf32> to vector<16x8xbf16>
    %254 = vector.extract_strided_slice %64 {offsets = [24, 0], sizes = [8, 32], strides = [1, 1]} : vector<32x32xbf16> to vector<8x32xbf16>
    %cst_74 = arith.constant dense<0.000000e+00> : vector<16x32xf32>
    %255 = tpu.matmul %253, %254, %cst_74 {dimension_numbers = #tpu.dot_dimension_numbers<[1], [0], [0], [1], [0, 0, 1, 1], [], []>} : vector<16x8xbf16>, vector<8x32xbf16>, vector<16x32xf32> -> vector<16x32xf32>
    %256 = arith.addf %233, %255 : vector<16x32xf32>
    %257 = tpu.concatenate %160, %256 in 0 : vector<16x32xf32>, vector<16x32xf32> -> vector<32x32xf32>
    %c0_75 = arith.constant 0 : index
    %c0_76 = arith.constant 0 : index
    %c0_77 = arith.constant 0 : index
    %258 = vector.load %arg10[%c0_75, %c0_76, %c0_77] : memref<2x1x32xf32, #tpu.memory_space<vmem>>, vector<1x1x32xf32>
    %259 = vector.shape_cast %258 : vector<1x1x32xf32> to vector<1x32xf32>
    %260 = vector.broadcast %259 : vector<1x32xf32> to vector<32x32xf32>
    %261 = arith.addf %257, %260 : vector<32x32xf32>
    %262 = arith.addf %54, %261 : vector<32x32xf32>
    %c0_78 = arith.constant 0 : index
    %c0_79 = arith.constant 0 : index
    %c0_80 = arith.constant 0 : index
    %263 = vector.load %arg11[%c0_78, %c0_79, %c0_80] : memref<2x1x32xf32, #tpu.memory_space<vmem>>, vector<1x1x32xf32>
    %264 = vector.shape_cast %263 : vector<1x1x32xf32> to vector<1x32xf32>
    %c0_81 = arith.constant 0 : index
    %c0_82 = arith.constant 0 : index
    %c0_83 = arith.constant 0 : index
    %265 = vector.load %arg12[%c0_81, %c0_82, %c0_83] : memref<2x1x32xf32, #tpu.memory_space<vmem>>, vector<1x1x32xf32>
    %266 = vector.shape_cast %265 : vector<1x1x32xf32> to vector<1x32xf32>
    %cst_84 = arith.constant dense<0.000000e+00> : vector<32xf32>
    %267 = vector.multi_reduction <add>, %262, %cst_84 [1] : vector<32x32xf32> to vector<32xf32>
    %268 = vector.shape_cast %267 : vector<32xf32> to vector<32x1xf32>
    %cst_85 = arith.constant 3.200000e+01 : f32
    %269 = vector.broadcast %cst_85 : f32 to vector<32x1xf32>
    %270 = arith.divf %268, %269 : vector<32x1xf32>
    %271 = vector.broadcast %270 : vector<32x1xf32> to vector<32x32xf32>
    %272 = arith.subf %262, %271 : vector<32x32xf32>
    %273 = arith.mulf %272, %272 : vector<32x32xf32>
    %cst_86 = arith.constant dense<0.000000e+00> : vector<32xf32>
    %274 = vector.multi_reduction <add>, %273, %cst_86 [1] : vector<32x32xf32> to vector<32xf32>
    %275 = vector.shape_cast %274 : vector<32xf32> to vector<32x1xf32>
    %cst_87 = arith.constant 3.200000e+01 : f32
    %276 = vector.broadcast %cst_87 : f32 to vector<32x1xf32>
    %277 = arith.divf %275, %276 : vector<32x1xf32>
    %278 = vector.broadcast %270 : vector<32x1xf32> to vector<32x32xf32>
    %279 = arith.subf %262, %278 : vector<32x32xf32>
    %cst_88 = arith.constant 9.99999974E-6 : f32
    %280 = vector.broadcast %cst_88 : f32 to vector<32x1xf32>
    %281 = arith.addf %277, %280 : vector<32x1xf32>
    %282 = math.rsqrt %281 : vector<32x1xf32>
    %283 = vector.broadcast %282 : vector<32x1xf32> to vector<32x32xf32>
    %284 = arith.mulf %279, %283 : vector<32x32xf32>
    %285 = vector.broadcast %264 : vector<1x32xf32> to vector<32x32xf32>
    %286 = arith.mulf %284, %285 : vector<32x32xf32>
    %287 = vector.broadcast %266 : vector<1x32xf32> to vector<32x32xf32>
    %288 = arith.addf %286, %287 : vector<32x32xf32>
    %c0_89 = arith.constant 0 : index
    %c0_90 = arith.constant 0 : index
    %c0_91 = arith.constant 0 : index
    %289 = vector.load %arg13[%c0_89, %c0_90, %c0_91] : memref<2x32x64xbf16, #tpu.memory_space<vmem>>, vector<1x32x64xbf16>
    %290 = vector.shape_cast %289 : vector<1x32x64xbf16> to vector<32x64xbf16>
    %291 = arith.truncf %288 : vector<32x32xf32> to vector<32x32xbf16>
    %cst_92 = arith.constant dense<0.000000e+00> : vector<32x64xf32>
    %292 = tpu.matmul %291, %290, %cst_92 {dimension_numbers = #tpu.dot_dimension_numbers<[1], [0], [0], [1], [0, 0, 1, 1], [], []>} : vector<32x32xbf16>, vector<32x64xbf16>, vector<32x64xf32> -> vector<32x64xf32>
    %c0_93 = arith.constant 0 : index
    %c0_94 = arith.constant 0 : index
    %c0_95 = arith.constant 0 : index
    %293 = vector.load %arg14[%c0_93, %c0_94, %c0_95] : memref<2x1x64xf32, #tpu.memory_space<vmem>>, vector<1x1x64xf32>
    %294 = vector.shape_cast %293 : vector<1x1x64xf32> to vector<1x64xf32>
    %295 = vector.broadcast %294 : vector<1x64xf32> to vector<32x64xf32>
    %296 = arith.addf %292, %295 : vector<32x64xf32>
    %297 = arith.mulf %296, %296 : vector<32x64xf32>
    %298 = arith.mulf %296, %297 : vector<32x64xf32>
    %cst_96 = arith.constant 4.471500e-02 : f32
    %299 = vector.broadcast %cst_96 : f32 to vector<32x64xf32>
    %300 = arith.mulf %299, %298 : vector<32x64xf32>
    %301 = arith.addf %296, %300 : vector<32x64xf32>
    %cst_97 = arith.constant 0.797884583 : f32
    %302 = vector.broadcast %cst_97 : f32 to vector<32x64xf32>
    %303 = arith.mulf %302, %301 : vector<32x64xf32>
    %304 = math.tanh %303 : vector<32x64xf32>
    %cst_98 = arith.constant 1.000000e+00 : f32
    %305 = vector.broadcast %cst_98 : f32 to vector<32x64xf32>
    %306 = arith.addf %305, %304 : vector<32x64xf32>
    %cst_99 = arith.constant 5.000000e-01 : f32
    %307 = vector.broadcast %cst_99 : f32 to vector<32x64xf32>
    %308 = arith.mulf %307, %306 : vector<32x64xf32>
    %309 = arith.mulf %296, %308 : vector<32x64xf32>
    %c0_100 = arith.constant 0 : index
    %c0_101 = arith.constant 0 : index
    %c0_102 = arith.constant 0 : index
    %310 = vector.load %arg15[%c0_100, %c0_101, %c0_102] : memref<2x64x32xbf16, #tpu.memory_space<vmem>>, vector<1x64x32xbf16>
    %311 = vector.shape_cast %310 : vector<1x64x32xbf16> to vector<64x32xbf16>
    %312 = arith.truncf %309 : vector<32x64xf32> to vector<32x64xbf16>
    %cst_103 = arith.constant dense<0.000000e+00> : vector<32x32xf32>
    %313 = tpu.matmul %312, %311, %cst_103 {dimension_numbers = #tpu.dot_dimension_numbers<[1], [0], [0], [1], [0, 0, 1, 1], [], []>} : vector<32x64xbf16>, vector<64x32xbf16>, vector<32x32xf32> -> vector<32x32xf32>
    %c0_104 = arith.constant 0 : index
    %c0_105 = arith.constant 0 : index
    %c0_106 = arith.constant 0 : index
    %314 = vector.load %arg16[%c0_104, %c0_105, %c0_106] : memref<2x1x32xf32, #tpu.memory_space<vmem>>, vector<1x1x32xf32>
    %315 = vector.shape_cast %314 : vector<1x1x32xf32> to vector<1x32xf32>
    %316 = vector.broadcast %315 : vector<1x32xf32> to vector<32x32xf32>
    %317 = arith.addf %313, %316 : vector<32x32xf32>
    %318 = arith.addf %288, %317 : vector<32x32xf32>
    %c0_107 = arith.constant 0 : index
    %c0_108 = arith.constant 0 : index
    %c0_109 = arith.constant 0 : index
    %319 = vector.load %arg17[%c0_107, %c0_108, %c0_109] : memref<2x1x32xf32, #tpu.memory_space<vmem>>, vector<1x1x32xf32>
    %320 = vector.shape_cast %319 : vector<1x1x32xf32> to vector<1x32xf32>
    %c0_110 = arith.constant 0 : index
    %c0_111 = arith.constant 0 : index
    %c0_112 = arith.constant 0 : index
    %321 = vector.load %arg18[%c0_110, %c0_111, %c0_112] : memref<2x1x32xf32, #tpu.memory_space<vmem>>, vector<1x1x32xf32>
    %322 = vector.shape_cast %321 : vector<1x1x32xf32> to vector<1x32xf32>
    %cst_113 = arith.constant dense<0.000000e+00> : vector<32xf32>
    %323 = vector.multi_reduction <add>, %318, %cst_113 [1] : vector<32x32xf32> to vector<32xf32>
    %324 = vector.shape_cast %323 : vector<32xf32> to vector<32x1xf32>
    %cst_114 = arith.constant 3.200000e+01 : f32
    %325 = vector.broadcast %cst_114 : f32 to vector<32x1xf32>
    %326 = arith.divf %324, %325 : vector<32x1xf32>
    %327 = vector.broadcast %326 : vector<32x1xf32> to vector<32x32xf32>
    %328 = arith.subf %318, %327 : vector<32x32xf32>
    %329 = arith.mulf %328, %328 : vector<32x32xf32>
    %cst_115 = arith.constant dense<0.000000e+00> : vector<32xf32>
    %330 = vector.multi_reduction <add>, %329, %cst_115 [1] : vector<32x32xf32> to vector<32xf32>
    %331 = vector.shape_cast %330 : vector<32xf32> to vector<32x1xf32>
    %cst_116 = arith.constant 3.200000e+01 : f32
    %332 = vector.broadcast %cst_116 : f32 to vector<32x1xf32>
    %333 = arith.divf %331, %332 : vector<32x1xf32>
    %334 = vector.broadcast %326 : vector<32x1xf32> to vector<32x32xf32>
    %335 = arith.subf %318, %334 : vector<32x32xf32>
    %cst_117 = arith.constant 9.99999974E-6 : f32
    %336 = vector.broadcast %cst_117 : f32 to vector<32x1xf32>
    %337 = arith.addf %333, %336 : vector<32x1xf32>
    %338 = math.rsqrt %337 : vector<32x1xf32>
    %339 = vector.broadcast %338 : vector<32x1xf32> to vector<32x32xf32>
    %340 = arith.mulf %335, %339 : vector<32x32xf32>
    %341 = vector.broadcast %320 : vector<1x32xf32> to vector<32x32xf32>
    %342 = arith.mulf %340, %341 : vector<32x32xf32>
    %343 = vector.broadcast %322 : vector<1x32xf32> to vector<32x32xf32>
    %344 = arith.addf %342, %343 : vector<32x32xf32>
    %c1 = arith.constant 1 : index
    %c0_118 = arith.constant 0 : index
    %c0_119 = arith.constant 0 : index
    %345 = vector.load %arg7[%c1, %c0_118, %c0_119] : memref<2x32x96xbf16, #tpu.memory_space<vmem>>, vector<1x32x96xbf16>
    %346 = vector.shape_cast %345 : vector<1x32x96xbf16> to vector<32x96xbf16>
    %347 = arith.truncf %344 : vector<32x32xf32> to vector<32x32xbf16>
    %cst_120 = arith.constant dense<0.000000e+00> : vector<32x96xf32>
    %348 = tpu.matmul %347, %346, %cst_120 {dimension_numbers = #tpu.dot_dimension_numbers<[1], [0], [0], [1], [0, 0, 1, 1], [], []>} : vector<32x32xbf16>, vector<32x96xbf16>, vector<32x96xf32> -> vector<32x96xf32>
    %c1_121 = arith.constant 1 : index
    %c0_122 = arith.constant 0 : index
    %c0_123 = arith.constant 0 : index
    %349 = vector.load %arg8[%c1_121, %c0_122, %c0_123] : memref<2x1x96xf32, #tpu.memory_space<vmem>>, vector<1x1x96xf32>
    %350 = vector.shape_cast %349 : vector<1x1x96xf32> to vector<1x96xf32>
    %351 = vector.broadcast %350 : vector<1x96xf32> to vector<32x96xf32>
    %352 = arith.addf %348, %351 : vector<32x96xf32>
    %c1_124 = arith.constant 1 : index
    %c0_125 = arith.constant 0 : index
    %c0_126 = arith.constant 0 : index
    %353 = vector.load %arg9[%c1_124, %c0_125, %c0_126] : memref<2x32x32xbf16, #tpu.memory_space<vmem>>, vector<1x32x32xbf16>
    %354 = vector.shape_cast %353 : vector<1x32x32xbf16> to vector<32x32xbf16>
    %355 = vector.extract_strided_slice %352 {offsets = [0, 0], sizes = [16, 32], strides = [1, 1]} : vector<32x96xf32> to vector<16x32xf32>
    %cst_127 = arith.constant 0.353553385 : f32
    %356 = vector.broadcast %cst_127 : f32 to vector<16x32xf32>
    %357 = arith.mulf %355, %356 : vector<16x32xf32>
    %358 = vector.extract_strided_slice %352 {offsets = [0, 32], sizes = [16, 32], strides = [1, 1]} : vector<32x96xf32> to vector<16x32xf32>
    %359 = vector.extract_strided_slice %352 {offsets = [0, 64], sizes = [16, 32], strides = [1, 1]} : vector<32x96xf32> to vector<16x32xf32>
    %360 = vector.extract_strided_slice %357 {offsets = [0, 0], sizes = [16, 8], strides = [1, 1]} : vector<16x32xf32> to vector<16x8xf32>
    %361 = arith.truncf %360 : vector<16x8xf32> to vector<16x8xbf16>
    %362 = vector.extract_strided_slice %358 {offsets = [0, 0], sizes = [16, 8], strides = [1, 1]} : vector<16x32xf32> to vector<16x8xf32>
    %363 = arith.truncf %362 : vector<16x8xf32> to vector<16x8xbf16>
    %364 = vector.extract_strided_slice %359 {offsets = [0, 0], sizes = [16, 8], strides = [1, 1]} : vector<16x32xf32> to vector<16x8xf32>
    %365 = arith.truncf %364 : vector<16x8xf32> to vector<16x8xbf16>
    %cst_128 = arith.constant dense<0.000000e+00> : vector<16x16xf32>
    %366 = tpu.matmul %361, %363, %cst_128 {dimension_numbers = #tpu.dot_dimension_numbers<[1], [1], [0], [0], [0, 0, 1, 0], [], []>} : vector<16x8xbf16>, vector<16x8xbf16>, vector<16x16xf32> -> vector<16x16xf32>
    %cst_129 = arith.constant dense<0xFF800000> : vector<16xf32>
    %367 = vector.multi_reduction <maximumf>, %366, %cst_129 [1] : vector<16x16xf32> to vector<16xf32>
    %368 = vector.shape_cast %367 : vector<16xf32> to vector<16x1xf32>
    %369 = vector.broadcast %368 : vector<16x1xf32> to vector<16x16xf32>
    %370 = arith.subf %366, %369 : vector<16x16xf32>
    %371 = math.exp %370 : vector<16x16xf32>
    %cst_130 = arith.constant dense<0.000000e+00> : vector<16xf32>
    %372 = vector.multi_reduction <add>, %371, %cst_130 [1] : vector<16x16xf32> to vector<16xf32>
    %373 = vector.shape_cast %372 : vector<16xf32> to vector<16x1xf32>
    %374 = tpu.reciprocal %373 {approx = true} : vector<16x1xf32> -> vector<16x1xf32>
    %375 = vector.broadcast %374 : vector<16x1xf32> to vector<16x16xf32>
    %376 = arith.mulf %371, %375 : vector<16x16xf32>
    %377 = arith.truncf %376 : vector<16x16xf32> to vector<16x16xbf16>
    %cst_131 = arith.constant dense<0.000000e+00> : vector<16x8xf32>
    %378 = tpu.matmul %377, %365, %cst_131 {dimension_numbers = #tpu.dot_dimension_numbers<[1], [0], [0], [1], [0, 0, 1, 1], [], []>} : vector<16x16xbf16>, vector<16x8xbf16>, vector<16x8xf32> -> vector<16x8xf32>
    %379 = arith.truncf %378 : vector<16x8xf32> to vector<16x8xbf16>
    %380 = vector.extract_strided_slice %354 {offsets = [0, 0], sizes = [8, 32], strides = [1, 1]} : vector<32x32xbf16> to vector<8x32xbf16>
    %cst_132 = arith.constant dense<0.000000e+00> : vector<16x32xf32>
    %381 = tpu.matmul %379, %380, %cst_132 {dimension_numbers = #tpu.dot_dimension_numbers<[1], [0], [0], [1], [0, 0, 1, 1], [], []>} : vector<16x8xbf16>, vector<8x32xbf16>, vector<16x32xf32> -> vector<16x32xf32>
    %382 = vector.extract_strided_slice %357 {offsets = [0, 8], sizes = [16, 8], strides = [1, 1]} : vector<16x32xf32> to vector<16x8xf32>
    %383 = arith.truncf %382 : vector<16x8xf32> to vector<16x8xbf16>
    %384 = vector.extract_strided_slice %358 {offsets = [0, 8], sizes = [16, 8], strides = [1, 1]} : vector<16x32xf32> to vector<16x8xf32>
    %385 = arith.truncf %384 : vector<16x8xf32> to vector<16x8xbf16>
    %386 = vector.extract_strided_slice %359 {offsets = [0, 8], sizes = [16, 8], strides = [1, 1]} : vector<16x32xf32> to vector<16x8xf32>
    %387 = arith.truncf %386 : vector<16x8xf32> to vector<16x8xbf16>
    %cst_133 = arith.constant dense<0.000000e+00> : vector<16x16xf32>
    %388 = tpu.matmul %383, %385, %cst_133 {dimension_numbers = #tpu.dot_dimension_numbers<[1], [1], [0], [0], [0, 0, 1, 0], [], []>} : vector<16x8xbf16>, vector<16x8xbf16>, vector<16x16xf32> -> vector<16x16xf32>
    %cst_134 = arith.constant dense<0xFF800000> : vector<16xf32>
    %389 = vector.multi_reduction <maximumf>, %388, %cst_134 [1] : vector<16x16xf32> to vector<16xf32>
    %390 = vector.shape_cast %389 : vector<16xf32> to vector<16x1xf32>
    %391 = vector.broadcast %390 : vector<16x1xf32> to vector<16x16xf32>
    %392 = arith.subf %388, %391 : vector<16x16xf32>
    %393 = math.exp %392 : vector<16x16xf32>
    %cst_135 = arith.constant dense<0.000000e+00> : vector<16xf32>
    %394 = vector.multi_reduction <add>, %393, %cst_135 [1] : vector<16x16xf32> to vector<16xf32>
    %395 = vector.shape_cast %394 : vector<16xf32> to vector<16x1xf32>
    %396 = tpu.reciprocal %395 {approx = true} : vector<16x1xf32> -> vector<16x1xf32>
    %397 = vector.broadcast %396 : vector<16x1xf32> to vector<16x16xf32>
    %398 = arith.mulf %393, %397 : vector<16x16xf32>
    %399 = arith.truncf %398 : vector<16x16xf32> to vector<16x16xbf16>
    %cst_136 = arith.constant dense<0.000000e+00> : vector<16x8xf32>
    %400 = tpu.matmul %399, %387, %cst_136 {dimension_numbers = #tpu.dot_dimension_numbers<[1], [0], [0], [1], [0, 0, 1, 1], [], []>} : vector<16x16xbf16>, vector<16x8xbf16>, vector<16x8xf32> -> vector<16x8xf32>
    %401 = arith.truncf %400 : vector<16x8xf32> to vector<16x8xbf16>
    %402 = vector.extract_strided_slice %354 {offsets = [8, 0], sizes = [8, 32], strides = [1, 1]} : vector<32x32xbf16> to vector<8x32xbf16>
    %cst_137 = arith.constant dense<0.000000e+00> : vector<16x32xf32>
    %403 = tpu.matmul %401, %402, %cst_137 {dimension_numbers = #tpu.dot_dimension_numbers<[1], [0], [0], [1], [0, 0, 1, 1], [], []>} : vector<16x8xbf16>, vector<8x32xbf16>, vector<16x32xf32> -> vector<16x32xf32>
    %404 = arith.addf %381, %403 : vector<16x32xf32>
    %405 = vector.extract_strided_slice %357 {offsets = [0, 16], sizes = [16, 8], strides = [1, 1]} : vector<16x32xf32> to vector<16x8xf32>
    %406 = arith.truncf %405 : vector<16x8xf32> to vector<16x8xbf16>
    %407 = vector.extract_strided_slice %358 {offsets = [0, 16], sizes = [16, 8], strides = [1, 1]} : vector<16x32xf32> to vector<16x8xf32>
    %408 = arith.truncf %407 : vector<16x8xf32> to vector<16x8xbf16>
    %409 = vector.extract_strided_slice %359 {offsets = [0, 16], sizes = [16, 8], strides = [1, 1]} : vector<16x32xf32> to vector<16x8xf32>
    %410 = arith.truncf %409 : vector<16x8xf32> to vector<16x8xbf16>
    %cst_138 = arith.constant dense<0.000000e+00> : vector<16x16xf32>
    %411 = tpu.matmul %406, %408, %cst_138 {dimension_numbers = #tpu.dot_dimension_numbers<[1], [1], [0], [0], [0, 0, 1, 0], [], []>} : vector<16x8xbf16>, vector<16x8xbf16>, vector<16x16xf32> -> vector<16x16xf32>
    %cst_139 = arith.constant dense<0xFF800000> : vector<16xf32>
    %412 = vector.multi_reduction <maximumf>, %411, %cst_139 [1] : vector<16x16xf32> to vector<16xf32>
    %413 = vector.shape_cast %412 : vector<16xf32> to vector<16x1xf32>
    %414 = vector.broadcast %413 : vector<16x1xf32> to vector<16x16xf32>
    %415 = arith.subf %411, %414 : vector<16x16xf32>
    %416 = math.exp %415 : vector<16x16xf32>
    %cst_140 = arith.constant dense<0.000000e+00> : vector<16xf32>
    %417 = vector.multi_reduction <add>, %416, %cst_140 [1] : vector<16x16xf32> to vector<16xf32>
    %418 = vector.shape_cast %417 : vector<16xf32> to vector<16x1xf32>
    %419 = tpu.reciprocal %418 {approx = true} : vector<16x1xf32> -> vector<16x1xf32>
    %420 = vector.broadcast %419 : vector<16x1xf32> to vector<16x16xf32>
    %421 = arith.mulf %416, %420 : vector<16x16xf32>
    %422 = arith.truncf %421 : vector<16x16xf32> to vector<16x16xbf16>
    %cst_141 = arith.constant dense<0.000000e+00> : vector<16x8xf32>
    %423 = tpu.matmul %422, %410, %cst_141 {dimension_numbers = #tpu.dot_dimension_numbers<[1], [0], [0], [1], [0, 0, 1, 1], [], []>} : vector<16x16xbf16>, vector<16x8xbf16>, vector<16x8xf32> -> vector<16x8xf32>
    %424 = arith.truncf %423 : vector<16x8xf32> to vector<16x8xbf16>
    %425 = vector.extract_strided_slice %354 {offsets = [16, 0], sizes = [8, 32], strides = [1, 1]} : vector<32x32xbf16> to vector<8x32xbf16>
    %cst_142 = arith.constant dense<0.000000e+00> : vector<16x32xf32>
    %426 = tpu.matmul %424, %425, %cst_142 {dimension_numbers = #tpu.dot_dimension_numbers<[1], [0], [0], [1], [0, 0, 1, 1], [], []>} : vector<16x8xbf16>, vector<8x32xbf16>, vector<16x32xf32> -> vector<16x32xf32>
    %427 = arith.addf %404, %426 : vector<16x32xf32>
    %428 = vector.extract_strided_slice %357 {offsets = [0, 24], sizes = [16, 8], strides = [1, 1]} : vector<16x32xf32> to vector<16x8xf32>
    %429 = arith.truncf %428 : vector<16x8xf32> to vector<16x8xbf16>
    %430 = vector.extract_strided_slice %358 {offsets = [0, 24], sizes = [16, 8], strides = [1, 1]} : vector<16x32xf32> to vector<16x8xf32>
    %431 = arith.truncf %430 : vector<16x8xf32> to vector<16x8xbf16>
    %432 = vector.extract_strided_slice %359 {offsets = [0, 24], sizes = [16, 8], strides = [1, 1]} : vector<16x32xf32> to vector<16x8xf32>
    %433 = arith.truncf %432 : vector<16x8xf32> to vector<16x8xbf16>
    %cst_143 = arith.constant dense<0.000000e+00> : vector<16x16xf32>
    %434 = tpu.matmul %429, %431, %cst_143 {dimension_numbers = #tpu.dot_dimension_numbers<[1], [1], [0], [0], [0, 0, 1, 0], [], []>} : vector<16x8xbf16>, vector<16x8xbf16>, vector<16x16xf32> -> vector<16x16xf32>
    %cst_144 = arith.constant dense<0xFF800000> : vector<16xf32>
    %435 = vector.multi_reduction <maximumf>, %434, %cst_144 [1] : vector<16x16xf32> to vector<16xf32>
    %436 = vector.shape_cast %435 : vector<16xf32> to vector<16x1xf32>
    %437 = vector.broadcast %436 : vector<16x1xf32> to vector<16x16xf32>
    %438 = arith.subf %434, %437 : vector<16x16xf32>
    %439 = math.exp %438 : vector<16x16xf32>
    %cst_145 = arith.constant dense<0.000000e+00> : vector<16xf32>
    %440 = vector.multi_reduction <add>, %439, %cst_145 [1] : vector<16x16xf32> to vector<16xf32>
    %441 = vector.shape_cast %440 : vector<16xf32> to vector<16x1xf32>
    %442 = tpu.reciprocal %441 {approx = true} : vector<16x1xf32> -> vector<16x1xf32>
    %443 = vector.broadcast %442 : vector<16x1xf32> to vector<16x16xf32>
    %444 = arith.mulf %439, %443 : vector<16x16xf32>
    %445 = arith.truncf %444 : vector<16x16xf32> to vector<16x16xbf16>
    %cst_146 = arith.constant dense<0.000000e+00> : vector<16x8xf32>
    %446 = tpu.matmul %445, %433, %cst_146 {dimension_numbers = #tpu.dot_dimension_numbers<[1], [0], [0], [1], [0, 0, 1, 1], [], []>} : vector<16x16xbf16>, vector<16x8xbf16>, vector<16x8xf32> -> vector<16x8xf32>
    %447 = arith.truncf %446 : vector<16x8xf32> to vector<16x8xbf16>
    %448 = vector.extract_strided_slice %354 {offsets = [24, 0], sizes = [8, 32], strides = [1, 1]} : vector<32x32xbf16> to vector<8x32xbf16>
    %cst_147 = arith.constant dense<0.000000e+00> : vector<16x32xf32>
    %449 = tpu.matmul %447, %448, %cst_147 {dimension_numbers = #tpu.dot_dimension_numbers<[1], [0], [0], [1], [0, 0, 1, 1], [], []>} : vector<16x8xbf16>, vector<8x32xbf16>, vector<16x32xf32> -> vector<16x32xf32>
    %450 = arith.addf %427, %449 : vector<16x32xf32>
    %451 = vector.extract_strided_slice %352 {offsets = [16, 0], sizes = [16, 32], strides = [1, 1]} : vector<32x96xf32> to vector<16x32xf32>
    %cst_148 = arith.constant 0.353553385 : f32
    %452 = vector.broadcast %cst_148 : f32 to vector<16x32xf32>
    %453 = arith.mulf %451, %452 : vector<16x32xf32>
    %454 = vector.extract_strided_slice %352 {offsets = [16, 32], sizes = [16, 32], strides = [1, 1]} : vector<32x96xf32> to vector<16x32xf32>
    %455 = vector.extract_strided_slice %352 {offsets = [16, 64], sizes = [16, 32], strides = [1, 1]} : vector<32x96xf32> to vector<16x32xf32>
    %456 = vector.extract_strided_slice %453 {offsets = [0, 0], sizes = [16, 8], strides = [1, 1]} : vector<16x32xf32> to vector<16x8xf32>
    %457 = arith.truncf %456 : vector<16x8xf32> to vector<16x8xbf16>
    %458 = vector.extract_strided_slice %454 {offsets = [0, 0], sizes = [16, 8], strides = [1, 1]} : vector<16x32xf32> to vector<16x8xf32>
    %459 = arith.truncf %458 : vector<16x8xf32> to vector<16x8xbf16>
    %460 = vector.extract_strided_slice %455 {offsets = [0, 0], sizes = [16, 8], strides = [1, 1]} : vector<16x32xf32> to vector<16x8xf32>
    %461 = arith.truncf %460 : vector<16x8xf32> to vector<16x8xbf16>
    %cst_149 = arith.constant dense<0.000000e+00> : vector<16x16xf32>
    %462 = tpu.matmul %457, %459, %cst_149 {dimension_numbers = #tpu.dot_dimension_numbers<[1], [1], [0], [0], [0, 0, 1, 0], [], []>} : vector<16x8xbf16>, vector<16x8xbf16>, vector<16x16xf32> -> vector<16x16xf32>
    %cst_150 = arith.constant dense<0xFF800000> : vector<16xf32>
    %463 = vector.multi_reduction <maximumf>, %462, %cst_150 [1] : vector<16x16xf32> to vector<16xf32>
    %464 = vector.shape_cast %463 : vector<16xf32> to vector<16x1xf32>
    %465 = vector.broadcast %464 : vector<16x1xf32> to vector<16x16xf32>
    %466 = arith.subf %462, %465 : vector<16x16xf32>
    %467 = math.exp %466 : vector<16x16xf32>
    %cst_151 = arith.constant dense<0.000000e+00> : vector<16xf32>
    %468 = vector.multi_reduction <add>, %467, %cst_151 [1] : vector<16x16xf32> to vector<16xf32>
    %469 = vector.shape_cast %468 : vector<16xf32> to vector<16x1xf32>
    %470 = tpu.reciprocal %469 {approx = true} : vector<16x1xf32> -> vector<16x1xf32>
    %471 = vector.broadcast %470 : vector<16x1xf32> to vector<16x16xf32>
    %472 = arith.mulf %467, %471 : vector<16x16xf32>
    %473 = arith.truncf %472 : vector<16x16xf32> to vector<16x16xbf16>
    %cst_152 = arith.constant dense<0.000000e+00> : vector<16x8xf32>
    %474 = tpu.matmul %473, %461, %cst_152 {dimension_numbers = #tpu.dot_dimension_numbers<[1], [0], [0], [1], [0, 0, 1, 1], [], []>} : vector<16x16xbf16>, vector<16x8xbf16>, vector<16x8xf32> -> vector<16x8xf32>
    %475 = arith.truncf %474 : vector<16x8xf32> to vector<16x8xbf16>
    %476 = vector.extract_strided_slice %354 {offsets = [0, 0], sizes = [8, 32], strides = [1, 1]} : vector<32x32xbf16> to vector<8x32xbf16>
    %cst_153 = arith.constant dense<0.000000e+00> : vector<16x32xf32>
    %477 = tpu.matmul %475, %476, %cst_153 {dimension_numbers = #tpu.dot_dimension_numbers<[1], [0], [0], [1], [0, 0, 1, 1], [], []>} : vector<16x8xbf16>, vector<8x32xbf16>, vector<16x32xf32> -> vector<16x32xf32>
    %478 = vector.extract_strided_slice %453 {offsets = [0, 8], sizes = [16, 8], strides = [1, 1]} : vector<16x32xf32> to vector<16x8xf32>
    %479 = arith.truncf %478 : vector<16x8xf32> to vector<16x8xbf16>
    %480 = vector.extract_strided_slice %454 {offsets = [0, 8], sizes = [16, 8], strides = [1, 1]} : vector<16x32xf32> to vector<16x8xf32>
    %481 = arith.truncf %480 : vector<16x8xf32> to vector<16x8xbf16>
    %482 = vector.extract_strided_slice %455 {offsets = [0, 8], sizes = [16, 8], strides = [1, 1]} : vector<16x32xf32> to vector<16x8xf32>
    %483 = arith.truncf %482 : vector<16x8xf32> to vector<16x8xbf16>
    %cst_154 = arith.constant dense<0.000000e+00> : vector<16x16xf32>
    %484 = tpu.matmul %479, %481, %cst_154 {dimension_numbers = #tpu.dot_dimension_numbers<[1], [1], [0], [0], [0, 0, 1, 0], [], []>} : vector<16x8xbf16>, vector<16x8xbf16>, vector<16x16xf32> -> vector<16x16xf32>
    %cst_155 = arith.constant dense<0xFF800000> : vector<16xf32>
    %485 = vector.multi_reduction <maximumf>, %484, %cst_155 [1] : vector<16x16xf32> to vector<16xf32>
    %486 = vector.shape_cast %485 : vector<16xf32> to vector<16x1xf32>
    %487 = vector.broadcast %486 : vector<16x1xf32> to vector<16x16xf32>
    %488 = arith.subf %484, %487 : vector<16x16xf32>
    %489 = math.exp %488 : vector<16x16xf32>
    %cst_156 = arith.constant dense<0.000000e+00> : vector<16xf32>
    %490 = vector.multi_reduction <add>, %489, %cst_156 [1] : vector<16x16xf32> to vector<16xf32>
    %491 = vector.shape_cast %490 : vector<16xf32> to vector<16x1xf32>
    %492 = tpu.reciprocal %491 {approx = true} : vector<16x1xf32> -> vector<16x1xf32>
    %493 = vector.broadcast %492 : vector<16x1xf32> to vector<16x16xf32>
    %494 = arith.mulf %489, %493 : vector<16x16xf32>
    %495 = arith.truncf %494 : vector<16x16xf32> to vector<16x16xbf16>
    %cst_157 = arith.constant dense<0.000000e+00> : vector<16x8xf32>
    %496 = tpu.matmul %495, %483, %cst_157 {dimension_numbers = #tpu.dot_dimension_numbers<[1], [0], [0], [1], [0, 0, 1, 1], [], []>} : vector<16x16xbf16>, vector<16x8xbf16>, vector<16x8xf32> -> vector<16x8xf32>
    %497 = arith.truncf %496 : vector<16x8xf32> to vector<16x8xbf16>
    %498 = vector.extract_strided_slice %354 {offsets = [8, 0], sizes = [8, 32], strides = [1, 1]} : vector<32x32xbf16> to vector<8x32xbf16>
    %cst_158 = arith.constant dense<0.000000e+00> : vector<16x32xf32>
    %499 = tpu.matmul %497, %498, %cst_158 {dimension_numbers = #tpu.dot_dimension_numbers<[1], [0], [0], [1], [0, 0, 1, 1], [], []>} : vector<16x8xbf16>, vector<8x32xbf16>, vector<16x32xf32> -> vector<16x32xf32>
    %500 = arith.addf %477, %499 : vector<16x32xf32>
    %501 = vector.extract_strided_slice %453 {offsets = [0, 16], sizes = [16, 8], strides = [1, 1]} : vector<16x32xf32> to vector<16x8xf32>
    %502 = arith.truncf %501 : vector<16x8xf32> to vector<16x8xbf16>
    %503 = vector.extract_strided_slice %454 {offsets = [0, 16], sizes = [16, 8], strides = [1, 1]} : vector<16x32xf32> to vector<16x8xf32>
    %504 = arith.truncf %503 : vector<16x8xf32> to vector<16x8xbf16>
    %505 = vector.extract_strided_slice %455 {offsets = [0, 16], sizes = [16, 8], strides = [1, 1]} : vector<16x32xf32> to vector<16x8xf32>
    %506 = arith.truncf %505 : vector<16x8xf32> to vector<16x8xbf16>
    %cst_159 = arith.constant dense<0.000000e+00> : vector<16x16xf32>
    %507 = tpu.matmul %502, %504, %cst_159 {dimension_numbers = #tpu.dot_dimension_numbers<[1], [1], [0], [0], [0, 0, 1, 0], [], []>} : vector<16x8xbf16>, vector<16x8xbf16>, vector<16x16xf32> -> vector<16x16xf32>
    %cst_160 = arith.constant dense<0xFF800000> : vector<16xf32>
    %508 = vector.multi_reduction <maximumf>, %507, %cst_160 [1] : vector<16x16xf32> to vector<16xf32>
    %509 = vector.shape_cast %508 : vector<16xf32> to vector<16x1xf32>
    %510 = vector.broadcast %509 : vector<16x1xf32> to vector<16x16xf32>
    %511 = arith.subf %507, %510 : vector<16x16xf32>
    %512 = math.exp %511 : vector<16x16xf32>
    %cst_161 = arith.constant dense<0.000000e+00> : vector<16xf32>
    %513 = vector.multi_reduction <add>, %512, %cst_161 [1] : vector<16x16xf32> to vector<16xf32>
    %514 = vector.shape_cast %513 : vector<16xf32> to vector<16x1xf32>
    %515 = tpu.reciprocal %514 {approx = true} : vector<16x1xf32> -> vector<16x1xf32>
    %516 = vector.broadcast %515 : vector<16x1xf32> to vector<16x16xf32>
    %517 = arith.mulf %512, %516 : vector<16x16xf32>
    %518 = arith.truncf %517 : vector<16x16xf32> to vector<16x16xbf16>
    %cst_162 = arith.constant dense<0.000000e+00> : vector<16x8xf32>
    %519 = tpu.matmul %518, %506, %cst_162 {dimension_numbers = #tpu.dot_dimension_numbers<[1], [0], [0], [1], [0, 0, 1, 1], [], []>} : vector<16x16xbf16>, vector<16x8xbf16>, vector<16x8xf32> -> vector<16x8xf32>
    %520 = arith.truncf %519 : vector<16x8xf32> to vector<16x8xbf16>
    %521 = vector.extract_strided_slice %354 {offsets = [16, 0], sizes = [8, 32], strides = [1, 1]} : vector<32x32xbf16> to vector<8x32xbf16>
    %cst_163 = arith.constant dense<0.000000e+00> : vector<16x32xf32>
    %522 = tpu.matmul %520, %521, %cst_163 {dimension_numbers = #tpu.dot_dimension_numbers<[1], [0], [0], [1], [0, 0, 1, 1], [], []>} : vector<16x8xbf16>, vector<8x32xbf16>, vector<16x32xf32> -> vector<16x32xf32>
    %523 = arith.addf %500, %522 : vector<16x32xf32>
    %524 = vector.extract_strided_slice %453 {offsets = [0, 24], sizes = [16, 8], strides = [1, 1]} : vector<16x32xf32> to vector<16x8xf32>
    %525 = arith.truncf %524 : vector<16x8xf32> to vector<16x8xbf16>
    %526 = vector.extract_strided_slice %454 {offsets = [0, 24], sizes = [16, 8], strides = [1, 1]} : vector<16x32xf32> to vector<16x8xf32>
    %527 = arith.truncf %526 : vector<16x8xf32> to vector<16x8xbf16>
    %528 = vector.extract_strided_slice %455 {offsets = [0, 24], sizes = [16, 8], strides = [1, 1]} : vector<16x32xf32> to vector<16x8xf32>
    %529 = arith.truncf %528 : vector<16x8xf32> to vector<16x8xbf16>
    %cst_164 = arith.constant dense<0.000000e+00> : vector<16x16xf32>
    %530 = tpu.matmul %525, %527, %cst_164 {dimension_numbers = #tpu.dot_dimension_numbers<[1], [1], [0], [0], [0, 0, 1, 0], [], []>} : vector<16x8xbf16>, vector<16x8xbf16>, vector<16x16xf32> -> vector<16x16xf32>
    %cst_165 = arith.constant dense<0xFF800000> : vector<16xf32>
    %531 = vector.multi_reduction <maximumf>, %530, %cst_165 [1] : vector<16x16xf32> to vector<16xf32>
    %532 = vector.shape_cast %531 : vector<16xf32> to vector<16x1xf32>
    %533 = vector.broadcast %532 : vector<16x1xf32> to vector<16x16xf32>
    %534 = arith.subf %530, %533 : vector<16x16xf32>
    %535 = math.exp %534 : vector<16x16xf32>
    %cst_166 = arith.constant dense<0.000000e+00> : vector<16xf32>
    %536 = vector.multi_reduction <add>, %535, %cst_166 [1] : vector<16x16xf32> to vector<16xf32>
    %537 = vector.shape_cast %536 : vector<16xf32> to vector<16x1xf32>
    %538 = tpu.reciprocal %537 {approx = true} : vector<16x1xf32> -> vector<16x1xf32>
    %539 = vector.broadcast %538 : vector<16x1xf32> to vector<16x16xf32>
    %540 = arith.mulf %535, %539 : vector<16x16xf32>
    %541 = arith.truncf %540 : vector<16x16xf32> to vector<16x16xbf16>
    %cst_167 = arith.constant dense<0.000000e+00> : vector<16x8xf32>
    %542 = tpu.matmul %541, %529, %cst_167 {dimension_numbers = #tpu.dot_dimension_numbers<[1], [0], [0], [1], [0, 0, 1, 1], [], []>} : vector<16x16xbf16>, vector<16x8xbf16>, vector<16x8xf32> -> vector<16x8xf32>
    %543 = arith.truncf %542 : vector<16x8xf32> to vector<16x8xbf16>
    %544 = vector.extract_strided_slice %354 {offsets = [24, 0], sizes = [8, 32], strides = [1, 1]} : vector<32x32xbf16> to vector<8x32xbf16>
    %cst_168 = arith.constant dense<0.000000e+00> : vector<16x32xf32>
    %545 = tpu.matmul %543, %544, %cst_168 {dimension_numbers = #tpu.dot_dimension_numbers<[1], [0], [0], [1], [0, 0, 1, 1], [], []>} : vector<16x8xbf16>, vector<8x32xbf16>, vector<16x32xf32> -> vector<16x32xf32>
    %546 = arith.addf %523, %545 : vector<16x32xf32>
    %547 = tpu.concatenate %450, %546 in 0 : vector<16x32xf32>, vector<16x32xf32> -> vector<32x32xf32>
    %c1_169 = arith.constant 1 : index
    %c0_170 = arith.constant 0 : index
    %c0_171 = arith.constant 0 : index
    %548 = vector.load %arg10[%c1_169, %c0_170, %c0_171] : memref<2x1x32xf32, #tpu.memory_space<vmem>>, vector<1x1x32xf32>
    %549 = vector.shape_cast %548 : vector<1x1x32xf32> to vector<1x32xf32>
    %550 = vector.broadcast %549 : vector<1x32xf32> to vector<32x32xf32>
    %551 = arith.addf %547, %550 : vector<32x32xf32>
    %552 = arith.addf %344, %551 : vector<32x32xf32>
    %c1_172 = arith.constant 1 : index
    %c0_173 = arith.constant 0 : index
    %c0_174 = arith.constant 0 : index
    %553 = vector.load %arg11[%c1_172, %c0_173, %c0_174] : memref<2x1x32xf32, #tpu.memory_space<vmem>>, vector<1x1x32xf32>
    %554 = vector.shape_cast %553 : vector<1x1x32xf32> to vector<1x32xf32>
    %c1_175 = arith.constant 1 : index
    %c0_176 = arith.constant 0 : index
    %c0_177 = arith.constant 0 : index
    %555 = vector.load %arg12[%c1_175, %c0_176, %c0_177] : memref<2x1x32xf32, #tpu.memory_space<vmem>>, vector<1x1x32xf32>
    %556 = vector.shape_cast %555 : vector<1x1x32xf32> to vector<1x32xf32>
    %cst_178 = arith.constant dense<0.000000e+00> : vector<32xf32>
    %557 = vector.multi_reduction <add>, %552, %cst_178 [1] : vector<32x32xf32> to vector<32xf32>
    %558 = vector.shape_cast %557 : vector<32xf32> to vector<32x1xf32>
    %cst_179 = arith.constant 3.200000e+01 : f32
    %559 = vector.broadcast %cst_179 : f32 to vector<32x1xf32>
    %560 = arith.divf %558, %559 : vector<32x1xf32>
    %561 = vector.broadcast %560 : vector<32x1xf32> to vector<32x32xf32>
    %562 = arith.subf %552, %561 : vector<32x32xf32>
    %563 = arith.mulf %562, %562 : vector<32x32xf32>
    %cst_180 = arith.constant dense<0.000000e+00> : vector<32xf32>
    %564 = vector.multi_reduction <add>, %563, %cst_180 [1] : vector<32x32xf32> to vector<32xf32>
    %565 = vector.shape_cast %564 : vector<32xf32> to vector<32x1xf32>
    %cst_181 = arith.constant 3.200000e+01 : f32
    %566 = vector.broadcast %cst_181 : f32 to vector<32x1xf32>
    %567 = arith.divf %565, %566 : vector<32x1xf32>
    %568 = vector.broadcast %560 : vector<32x1xf32> to vector<32x32xf32>
    %569 = arith.subf %552, %568 : vector<32x32xf32>
    %cst_182 = arith.constant 9.99999974E-6 : f32
    %570 = vector.broadcast %cst_182 : f32 to vector<32x1xf32>
    %571 = arith.addf %567, %570 : vector<32x1xf32>
    %572 = math.rsqrt %571 : vector<32x1xf32>
    %573 = vector.broadcast %572 : vector<32x1xf32> to vector<32x32xf32>
    %574 = arith.mulf %569, %573 : vector<32x32xf32>
    %575 = vector.broadcast %554 : vector<1x32xf32> to vector<32x32xf32>
    %576 = arith.mulf %574, %575 : vector<32x32xf32>
    %577 = vector.broadcast %556 : vector<1x32xf32> to vector<32x32xf32>
    %578 = arith.addf %576, %577 : vector<32x32xf32>
    %c1_183 = arith.constant 1 : index
    %c0_184 = arith.constant 0 : index
    %c0_185 = arith.constant 0 : index
    %579 = vector.load %arg13[%c1_183, %c0_184, %c0_185] : memref<2x32x64xbf16, #tpu.memory_space<vmem>>, vector<1x32x64xbf16>
    %580 = vector.shape_cast %579 : vector<1x32x64xbf16> to vector<32x64xbf16>
    %581 = arith.truncf %578 : vector<32x32xf32> to vector<32x32xbf16>
    %cst_186 = arith.constant dense<0.000000e+00> : vector<32x64xf32>
    %582 = tpu.matmul %581, %580, %cst_186 {dimension_numbers = #tpu.dot_dimension_numbers<[1], [0], [0], [1], [0, 0, 1, 1], [], []>} : vector<32x32xbf16>, vector<32x64xbf16>, vector<32x64xf32> -> vector<32x64xf32>
    %c1_187 = arith.constant 1 : index
    %c0_188 = arith.constant 0 : index
    %c0_189 = arith.constant 0 : index
    %583 = vector.load %arg14[%c1_187, %c0_188, %c0_189] : memref<2x1x64xf32, #tpu.memory_space<vmem>>, vector<1x1x64xf32>
    %584 = vector.shape_cast %583 : vector<1x1x64xf32> to vector<1x64xf32>
    %585 = vector.broadcast %584 : vector<1x64xf32> to vector<32x64xf32>
    %586 = arith.addf %582, %585 : vector<32x64xf32>
    %587 = arith.mulf %586, %586 : vector<32x64xf32>
    %588 = arith.mulf %586, %587 : vector<32x64xf32>
    %cst_190 = arith.constant 4.471500e-02 : f32
    %589 = vector.broadcast %cst_190 : f32 to vector<32x64xf32>
    %590 = arith.mulf %589, %588 : vector<32x64xf32>
    %591 = arith.addf %586, %590 : vector<32x64xf32>
    %cst_191 = arith.constant 0.797884583 : f32
    %592 = vector.broadcast %cst_191 : f32 to vector<32x64xf32>
    %593 = arith.mulf %592, %591 : vector<32x64xf32>
    %594 = math.tanh %593 : vector<32x64xf32>
    %cst_192 = arith.constant 1.000000e+00 : f32
    %595 = vector.broadcast %cst_192 : f32 to vector<32x64xf32>
    %596 = arith.addf %595, %594 : vector<32x64xf32>
    %cst_193 = arith.constant 5.000000e-01 : f32
    %597 = vector.broadcast %cst_193 : f32 to vector<32x64xf32>
    %598 = arith.mulf %597, %596 : vector<32x64xf32>
    %599 = arith.mulf %586, %598 : vector<32x64xf32>
    %c1_194 = arith.constant 1 : index
    %c0_195 = arith.constant 0 : index
    %c0_196 = arith.constant 0 : index
    %600 = vector.load %arg15[%c1_194, %c0_195, %c0_196] : memref<2x64x32xbf16, #tpu.memory_space<vmem>>, vector<1x64x32xbf16>
    %601 = vector.shape_cast %600 : vector<1x64x32xbf16> to vector<64x32xbf16>
    %602 = arith.truncf %599 : vector<32x64xf32> to vector<32x64xbf16>
    %cst_197 = arith.constant dense<0.000000e+00> : vector<32x32xf32>
    %603 = tpu.matmul %602, %601, %cst_197 {dimension_numbers = #tpu.dot_dimension_numbers<[1], [0], [0], [1], [0, 0, 1, 1], [], []>} : vector<32x64xbf16>, vector<64x32xbf16>, vector<32x32xf32> -> vector<32x32xf32>
    %c1_198 = arith.constant 1 : index
    %c0_199 = arith.constant 0 : index
    %c0_200 = arith.constant 0 : index
    %604 = vector.load %arg16[%c1_198, %c0_199, %c0_200] : memref<2x1x32xf32, #tpu.memory_space<vmem>>, vector<1x1x32xf32>
    %605 = vector.shape_cast %604 : vector<1x1x32xf32> to vector<1x32xf32>
    %606 = vector.broadcast %605 : vector<1x32xf32> to vector<32x32xf32>
    %607 = arith.addf %603, %606 : vector<32x32xf32>
    %608 = arith.addf %578, %607 : vector<32x32xf32>
    %c1_201 = arith.constant 1 : index
    %c0_202 = arith.constant 0 : index
    %c0_203 = arith.constant 0 : index
    %609 = vector.load %arg17[%c1_201, %c0_202, %c0_203] : memref<2x1x32xf32, #tpu.memory_space<vmem>>, vector<1x1x32xf32>
    %610 = vector.shape_cast %609 : vector<1x1x32xf32> to vector<1x32xf32>
    %c1_204 = arith.constant 1 : index
    %c0_205 = arith.constant 0 : index
    %c0_206 = arith.constant 0 : index
    %611 = vector.load %arg18[%c1_204, %c0_205, %c0_206] : memref<2x1x32xf32, #tpu.memory_space<vmem>>, vector<1x1x32xf32>
    %612 = vector.shape_cast %611 : vector<1x1x32xf32> to vector<1x32xf32>
    %cst_207 = arith.constant dense<0.000000e+00> : vector<32xf32>
    %613 = vector.multi_reduction <add>, %608, %cst_207 [1] : vector<32x32xf32> to vector<32xf32>
    %614 = vector.shape_cast %613 : vector<32xf32> to vector<32x1xf32>
    %cst_208 = arith.constant 3.200000e+01 : f32
    %615 = vector.broadcast %cst_208 : f32 to vector<32x1xf32>
    %616 = arith.divf %614, %615 : vector<32x1xf32>
    %617 = vector.broadcast %616 : vector<32x1xf32> to vector<32x32xf32>
    %618 = arith.subf %608, %617 : vector<32x32xf32>
    %619 = arith.mulf %618, %618 : vector<32x32xf32>
    %cst_209 = arith.constant dense<0.000000e+00> : vector<32xf32>
    %620 = vector.multi_reduction <add>, %619, %cst_209 [1] : vector<32x32xf32> to vector<32xf32>
    %621 = vector.shape_cast %620 : vector<32xf32> to vector<32x1xf32>
    %cst_210 = arith.constant 3.200000e+01 : f32
    %622 = vector.broadcast %cst_210 : f32 to vector<32x1xf32>
    %623 = arith.divf %621, %622 : vector<32x1xf32>
    %624 = vector.broadcast %616 : vector<32x1xf32> to vector<32x32xf32>
    %625 = arith.subf %608, %624 : vector<32x32xf32>
    %cst_211 = arith.constant 9.99999974E-6 : f32
    %626 = vector.broadcast %cst_211 : f32 to vector<32x1xf32>
    %627 = arith.addf %623, %626 : vector<32x1xf32>
    %628 = math.rsqrt %627 : vector<32x1xf32>
    %629 = vector.broadcast %628 : vector<32x1xf32> to vector<32x32xf32>
    %630 = arith.mulf %625, %629 : vector<32x32xf32>
    %631 = vector.broadcast %610 : vector<1x32xf32> to vector<32x32xf32>
    %632 = arith.mulf %630, %631 : vector<32x32xf32>
    %633 = vector.broadcast %612 : vector<1x32xf32> to vector<32x32xf32>
    %634 = arith.addf %632, %633 : vector<32x32xf32>
    %635 = vector.extract_strided_slice %634 {offsets = [0, 0], sizes = [16, 32], strides = [1, 1]} : vector<32x32xf32> to vector<16x32xf32>
    %c0_212 = arith.constant 0 : index
    %c0_213 = arith.constant 0 : index
    %636 = vector.load %arg19[%c0_212, %c0_213] : memref<32x32xbf16, #tpu.memory_space<vmem>>, vector<32x32xbf16>
    %637 = arith.truncf %635 : vector<16x32xf32> to vector<16x32xbf16>
    %cst_214 = arith.constant dense<0.000000e+00> : vector<16x32xf32>
    %638 = tpu.matmul %637, %636, %cst_214 {dimension_numbers = #tpu.dot_dimension_numbers<[1], [0], [0], [1], [0, 0, 1, 1], [], []>} : vector<16x32xbf16>, vector<32x32xbf16>, vector<16x32xf32> -> vector<16x32xf32>
    %c0_215 = arith.constant 0 : index
    %c0_216 = arith.constant 0 : index
    %639 = vector.load %arg20[%c0_215, %c0_216] : memref<1x32xf32, #tpu.memory_space<vmem>>, vector<1x32xf32>
    %640 = vector.broadcast %639 : vector<1x32xf32> to vector<16x32xf32>
    %641 = arith.addf %638, %640 : vector<16x32xf32>
    %642 = math.tanh %641 : vector<16x32xf32>
    %c0_217 = arith.constant 0 : index
    %c0_218 = arith.constant 0 : index
    %643 = vector.load %arg21[%c0_217, %c0_218] : memref<32x1xbf16, #tpu.memory_space<vmem>>, vector<32x1xbf16>
    %644 = arith.truncf %642 : vector<16x32xf32> to vector<16x32xbf16>
    %cst_219 = arith.constant dense<0.000000e+00> : vector<16x1xf32>
    %645 = tpu.matmul %644, %643, %cst_219 {dimension_numbers = #tpu.dot_dimension_numbers<[1], [0], [0], [1], [0, 0, 1, 1], [], []>} : vector<16x32xbf16>, vector<32x1xbf16>, vector<16x1xf32> -> vector<16x1xf32>
    %c0_220 = arith.constant 0 : index
    %c0_221 = arith.constant 0 : index
    %646 = vector.load %arg22[%c0_220, %c0_221] : memref<1x1xf32, #tpu.memory_space<vmem>>, vector<1x1xf32>
    %647 = vector.broadcast %646 : vector<1x1xf32> to vector<16x1xf32>
    %648 = arith.addf %645, %647 : vector<16x1xf32>
    %cst_222 = arith.constant dense<0xFF800000> : vector<1xf32>
    %649 = vector.multi_reduction <maximumf>, %648, %cst_222 [0] : vector<16x1xf32> to vector<1xf32>
    %650 = vector.shape_cast %649 : vector<1xf32> to vector<1x1xf32>
    %651 = vector.broadcast %650 : vector<1x1xf32> to vector<16x1xf32>
    %652 = arith.subf %648, %651 : vector<16x1xf32>
    %653 = math.exp %652 : vector<16x1xf32>
    %cst_223 = arith.constant dense<0.000000e+00> : vector<1xf32>
    %654 = vector.multi_reduction <add>, %653, %cst_223 [0] : vector<16x1xf32> to vector<1xf32>
    %655 = vector.shape_cast %654 : vector<1xf32> to vector<1x1xf32>
    %656 = tpu.reciprocal %655 {approx = true} : vector<1x1xf32> -> vector<1x1xf32>
    %657 = vector.broadcast %656 : vector<1x1xf32> to vector<16x1xf32>
    %658 = arith.mulf %653, %657 : vector<16x1xf32>
    %659 = vector.broadcast %658 : vector<16x1xf32> to vector<16x32xf32>
    %660 = arith.mulf %635, %659 : vector<16x32xf32>
    %cst_224 = arith.constant dense<0.000000e+00> : vector<32xf32>
    %661 = vector.multi_reduction <add>, %660, %cst_224 [0] : vector<16x32xf32> to vector<32xf32>
    %662 = vector.shape_cast %661 : vector<32xf32> to vector<1x32xf32>
    %663 = vector.extract_strided_slice %634 {offsets = [16, 0], sizes = [16, 32], strides = [1, 1]} : vector<32x32xf32> to vector<16x32xf32>
    %c0_225 = arith.constant 0 : index
    %c0_226 = arith.constant 0 : index
    %664 = vector.load %arg19[%c0_225, %c0_226] : memref<32x32xbf16, #tpu.memory_space<vmem>>, vector<32x32xbf16>
    %665 = arith.truncf %663 : vector<16x32xf32> to vector<16x32xbf16>
    %cst_227 = arith.constant dense<0.000000e+00> : vector<16x32xf32>
    %666 = tpu.matmul %665, %664, %cst_227 {dimension_numbers = #tpu.dot_dimension_numbers<[1], [0], [0], [1], [0, 0, 1, 1], [], []>} : vector<16x32xbf16>, vector<32x32xbf16>, vector<16x32xf32> -> vector<16x32xf32>
    %c0_228 = arith.constant 0 : index
    %c0_229 = arith.constant 0 : index
    %667 = vector.load %arg20[%c0_228, %c0_229] : memref<1x32xf32, #tpu.memory_space<vmem>>, vector<1x32xf32>
    %668 = vector.broadcast %667 : vector<1x32xf32> to vector<16x32xf32>
    %669 = arith.addf %666, %668 : vector<16x32xf32>
    %670 = math.tanh %669 : vector<16x32xf32>
    %c0_230 = arith.constant 0 : index
    %c0_231 = arith.constant 0 : index
    %671 = vector.load %arg21[%c0_230, %c0_231] : memref<32x1xbf16, #tpu.memory_space<vmem>>, vector<32x1xbf16>
    %672 = arith.truncf %670 : vector<16x32xf32> to vector<16x32xbf16>
    %cst_232 = arith.constant dense<0.000000e+00> : vector<16x1xf32>
    %673 = tpu.matmul %672, %671, %cst_232 {dimension_numbers = #tpu.dot_dimension_numbers<[1], [0], [0], [1], [0, 0, 1, 1], [], []>} : vector<16x32xbf16>, vector<32x1xbf16>, vector<16x1xf32> -> vector<16x1xf32>
    %c0_233 = arith.constant 0 : index
    %c0_234 = arith.constant 0 : index
    %674 = vector.load %arg22[%c0_233, %c0_234] : memref<1x1xf32, #tpu.memory_space<vmem>>, vector<1x1xf32>
    %675 = vector.broadcast %674 : vector<1x1xf32> to vector<16x1xf32>
    %676 = arith.addf %673, %675 : vector<16x1xf32>
    %cst_235 = arith.constant dense<0xFF800000> : vector<1xf32>
    %677 = vector.multi_reduction <maximumf>, %676, %cst_235 [0] : vector<16x1xf32> to vector<1xf32>
    %678 = vector.shape_cast %677 : vector<1xf32> to vector<1x1xf32>
    %679 = vector.broadcast %678 : vector<1x1xf32> to vector<16x1xf32>
    %680 = arith.subf %676, %679 : vector<16x1xf32>
    %681 = math.exp %680 : vector<16x1xf32>
    %cst_236 = arith.constant dense<0.000000e+00> : vector<1xf32>
    %682 = vector.multi_reduction <add>, %681, %cst_236 [0] : vector<16x1xf32> to vector<1xf32>
    %683 = vector.shape_cast %682 : vector<1xf32> to vector<1x1xf32>
    %684 = tpu.reciprocal %683 {approx = true} : vector<1x1xf32> -> vector<1x1xf32>
    %685 = vector.broadcast %684 : vector<1x1xf32> to vector<16x1xf32>
    %686 = arith.mulf %681, %685 : vector<16x1xf32>
    %687 = vector.broadcast %686 : vector<16x1xf32> to vector<16x32xf32>
    %688 = arith.mulf %663, %687 : vector<16x32xf32>
    %cst_237 = arith.constant dense<0.000000e+00> : vector<32xf32>
    %689 = vector.multi_reduction <add>, %688, %cst_237 [0] : vector<16x32xf32> to vector<32xf32>
    %690 = vector.shape_cast %689 : vector<32xf32> to vector<1x32xf32>
    %691 = tpu.concatenate %662, %690 in 0 : vector<1x32xf32>, vector<1x32xf32> -> vector<2x32xf32>
    %c0_238 = arith.constant 0 : index
    %c0_239 = arith.constant 0 : index
    %692 = vector.load %arg23[%c0_238, %c0_239] : memref<2x32xf32, #tpu.memory_space<vmem>>, vector<2x32xf32>
    tpu.vector_store %arg23[%c0_238, %c0_239], %691 {strides = array<i32>} : memref<2x32xf32, #tpu.memory_space<vmem>>, vector<2x32xf32>,
    return
  }
}

</mosaic_0001>

<bundles_post_ra>
// kernel: forward.3
= control target key start
LH: loop header
LB: loop body
LE: loop exit
PB: predicated region body
PF: predicated region fallthrough
CT: control target
= control target key end

     0   :  { %vm49_vm0 = vcmask 1044480   ;;  %vm33_vm1 = vcmask 80896   ;;  %vm167_vm2 = vcmask 261120   ;;  %vm176_vm3 = vcmask 254976   ;;  %s331_s1 = inlined_call_operand.vmem [shape: bf16[10,32], index: 1, kind: input, shape index: {}]   ;;  %s332_s0 = inlined_call_operand.vmem [shape: f32[66,10], index: 0, kind: input, shape index: {}]   ;;  %s333_s2 = inlined_call_operand.vmem [shape: f32[66,32], index: 2, kind: output, shape index: {}]  }
   0x1   :  { %v184_v0 = vld [vmem:[%s331_s1] sm:$0xf]  ;;  %v191_v1 = vld [vmem:[%s331_s1] sm:$0x10]  ;;  %v13_v4 = vld [vmem:[%s332_s0 + $0x8] sm:$0xff] }
   0x2   :  { %v12_v2 = vld [vmem:[%s332_s0] sm:$0xff]  ;;  %v185_v3 = vor.u32 %v191_v1, %v184_v0  ;;  %v14_v5 = vld [vmem:[%s332_s0 + $0x10] sm:$0xff]  ;;  %v15_v6 = vld [vmem:[%s332_s0 + $0x18] sm:$0xff] }
   0x3   :  { %v16_v7 = vld [vmem:[%s332_s0 + $0x20] sm:$0xff]  ;;  %v17_v8 = vld [vmem:[%s332_s0 + $0x28] sm:$0xff]  ;;  %v21_v11 = vpack.c.bf16 %v13_v4, %v12_v2  ;;  %v22_v12 = vpack.c.bf16 %v15_v6, %v14_v5  ;;  %v18_v15 = vld [vmem:[%s332_s0 + $0x30] sm:$0xff] }
   0x4   :  { %v20_v9 = vld [vmem:[%s332_s0 + $0x40] sm:$0x3]  ;;  %v51_v10 = vsel %vm49_vm0, %v185_v3, 0  ;;  %v23_v13 = vpack.c.bf16 %v17_v8, %v16_v7  ;;  %v19_v16 = vld [vmem:[%s332_s0 + $0x38] sm:$0xff] }
   0x5   :  { %60 = vmatpush.bf16.msra.mxu0 %v51_v10  ;;  %192 = vmatpush.bf16.msra.mxu1 %v51_v10  ;;  %v25_v14 = vpack.c.bf16 %v20_v9, %v20_v9  ;;  %v24_v17 = vpack.c.bf16 %v19_v16, %v18_v15 }
   0x6   :  { %193 = vmatpush.bf16.msra.mxu2 %v51_v10  ;;  %194 = vmatpush.bf16.msra.mxu3 %v51_v10 }
   0x8   :  { %186 = vmatmul.msk.bf16.vlgmr.msra.gmra.mxu0 %vm33_vm1, %v21_v11  ;;  %187 = vmatmul.msk.bf16.vlgmr.msra.gmra.mxu1 %vm33_vm1, %v22_v12 }
   0x9   :  { %188 = vmatmul.msk.bf16.vlgmr.msra.gmra.mxu2 %vm33_vm1, %v23_v13  ;;  %190 = vmatmul.msk.bf16.vlgmr.msra.gmra.mxu3 %vm33_vm1, %v25_v14 }
  0x19   :  { %189 = vmatmul.msk.bf16.gmra.mxu2 %vm33_vm1, %v24_v17 }
  0x85   :  { %v62_v18 = vpop.f32.mrf.mxu0  ;;  %v67_v19 = vpop.f32.mrf.mxu1 }
  0x86   :  { %v86_v20 = vmul.f32 %v62_v18, %v62_v18  ;;  %v88_v21 = vmul.f32 %v67_v19, %v67_v19 }
  0x88   :  { %v95_v22 = vmul.f32 %v86_v20, %v62_v18  ;;  %v97_v23 = vmul.f32 %v88_v21, %v67_v19 }
  0x8a   :  { %v104_v24 = vmul.f32 0.044715, %v95_v22  ;;  %v106_v25 = vmul.f32 0.044715, %v97_v23 }
  0x8c   :  { %v113_v26 = vadd.f32 %v104_v24, %v62_v18  ;;  %v115_v27 = vadd.f32 %v106_v25, %v67_v19  ;;  %v261_v28 = vpop.f32.mrf.mxu2  ;;  %v263_v29 = vpop.f32.mrf.mxu3 }
  0x8d   :  { %v90_v30 = vmul.f32 %v261_v28, %v261_v28  ;;  %v267_v31 = vpop.f32.mrf.mxu0  ;;  %v269_v32 = vpop.f32.mrf.mxu1  ;;  %v94_v33 = vmul.f32 %v263_v29, %v263_v29 }
  0x8e   :  { %v122_v34 = vmul.f32 0.7978846, %v113_v26  ;;  %v124_v35 = vmul.f32 0.7978846, %v115_v27  ;;  %v87_v36 = vmul.f32 %v267_v31, %v267_v31  ;;  %v89_v37 = vmul.f32 %v269_v32, %v269_v32 }
  0x8f   :  { %v99_v38 = vmul.f32 %v90_v30, %v261_v28  ;;  %v103_v39 = vmul.f32 %v94_v33, %v263_v29 }
  0x90   :  { %195 = vtanh.f32 %v122_v34  ;;  %v96_v40 = vmul.f32 %v87_v36, %v267_v31  ;;  %v98_v41 = vmul.f32 %v89_v37, %v269_v32 }
  0x91   :  { %197 = vtanh.f32 %v124_v35  ;;  %v108_v42 = vmul.f32 0.044715, %v99_v38  ;;  %v112_v43 = vmul.f32 0.044715, %v103_v39 }
  0x92   :  { %v105_v44 = vmul.f32 0.044715, %v96_v40  ;;  %v107_v45 = vmul.f32 0.044715, %v98_v41 }
  0x93   :  { %v117_v46 = vadd.f32 %v108_v42, %v261_v28  ;;  %v121_v47 = vadd.f32 %v112_v43, %v263_v29 }
  0x94   :  { %v114_v48 = vadd.f32 %v105_v44, %v267_v31  ;;  %v116_v49 = vadd.f32 %v107_v45, %v269_v32  ;;  %v285_v50 = vpop.f32.mrf.mxu2  ;;  %v84_v51 = vpop.f32.mrf.mxu3 }
  0x95   :  { %v126_v52 = vmul.f32 0.7978846, %v117_v46  ;;  %v91_v53 = vmul.f32 %v285_v50, %v285_v50  ;;  %v130_v57 = vmul.f32 0.7978846, %v121_v47 }
  0x96   :  { %v196_v54 = vpop.eup %195  ;;  %v123_v55 = vmul.f32 0.7978846, %v114_v48  ;;  %v125_v56 = vmul.f32 0.7978846, %v116_v49 }
  0x97   :  { %v198_v58 = vpop.eup %197  ;;  %v140_v59 = vadd.f32 1.0, %v196_v54  ;;  %199 = vtanh.f32 %v126_v52  ;;  %v100_v60 = vmul.f32 %v91_v53, %v285_v50 }
  0x98   :  { %v142_v61 = vadd.f32 1.0, %v198_v58  ;;  %201 = vtanh.f32 %v123_v55 }
  0x99   :  { %v149_v62 = vmul.f32 0.5, %v140_v59  ;;  %203 = vtanh.f32 %v125_v56  ;;  %v109_v63 = vmul.f32 0.044715, %v100_v60 }
  0x9a   :  { %v151_v0 = vmul.f32 0.5, %v142_v61  ;;  %205 = vtanh.f32 %v130_v57 }
  0x9b   :  { %v158_v1 = vmul.f32 %v149_v62, %v62_v18  ;;  %v118_v2 = vadd.f32 %v109_v63, %v285_v50 }
  0x9c   :  { %v160_v3 = vmul.f32 %v151_v0, %v67_v19  ;;  %v77_v4 = vpop.f32.mrf.mxu2 }
  0x9d   :  { %v200_v5 = vpop.eup %199  ;;  %168 = vst.msk [vmem:[%s333_s2] sm:$0xff] %vm167_vm2, %v158_v1  ;;  %v127_v6 = vmul.f32 0.7978846, %v118_v2  ;;  %v92_v7 = vmul.f32 %v77_v4, %v77_v4 }
  0x9e   :  { %v202_v8 = vpop.eup %201  ;;  %170 = vst.msk [vmem:[%s333_s2 + $0x10] sm:$0xff] %vm167_vm2, %v160_v3  ;;  %v144_v9 = vadd.f32 1.0, %v200_v5 }
  0x9f   :  { %v204_v10 = vpop.eup %203  ;;  %v141_v11 = vadd.f32 1.0, %v202_v8  ;;  %207 = vtanh.f32 %v127_v6  ;;  %v101_v12 = vmul.f32 %v92_v7, %v77_v4 }
  0xa0   :  { %v206_v13 = vpop.eup %205  ;;  %v153_v14 = vmul.f32 0.5, %v144_v9  ;;  %v143_v15 = vadd.f32 1.0, %v204_v10 }
  0xa1   :  { %v150_v16 = vmul.f32 0.5, %v141_v11  ;;  %v148_v17 = vadd.f32 1.0, %v206_v13  ;;  %v110_v18 = vmul.f32 0.044715, %v101_v12 }
  0xa2   :  { %v162_v19 = vmul.f32 %v153_v14, %v261_v28  ;;  %v152_v20 = vmul.f32 0.5, %v143_v15 }
  0xa3   :  { %v159_v21 = vmul.f32 %v150_v16, %v267_v31  ;;  %v157_v22 = vmul.f32 0.5, %v148_v17  ;;  %v119_v23 = vadd.f32 %v110_v18, %v77_v4 }
  0xa4   :  { %172 = vst.msk [vmem:[%s333_s2 + $0x20] sm:$0xff] %vm167_vm2, %v162_v19  ;;  %v161_v24 = vmul.f32 %v152_v20, %v269_v32  ;;  %v79_v25 = vpop.f32.mrf.mxu2 }
  0xa5   :  { %v208_v26 = vpop.eup %207  ;;  %169 = vst.msk [vmem:[%s333_s2 + $0x8] sm:$0xff] %vm167_vm2, %v159_v21  ;;  %v166_v27 = vmul.f32 %v157_v22, %v263_v29  ;;  %v128_v28 = vmul.f32 0.7978846, %v119_v23  ;;  %v93_v30 = vmul.f32 %v79_v25, %v79_v25 }
  0xa6   :  { %171 = vst.msk [vmem:[%s333_s2 + $0x18] sm:$0xff] %vm167_vm2, %v161_v24  ;;  %v145_v31 = vadd.f32 1.0, %v208_v26 }
  0xa7   :  { %177 = vst.msk [vmem:[%s333_s2 + $0x40] sm:$0x3] %vm176_vm3, %v166_v27  ;;  %209 = vtanh.f32 %v128_v28  ;;  %v102_v32 = vmul.f32 %v93_v30, %v79_v25 }
  0xa8   :  { %v154_v33 = vmul.f32 0.5, %v145_v31 }
  0xa9   :  { %v111_v34 = vmul.f32 0.044715, %v102_v32 }
  0xaa   :  { %v163_v35 = vmul.f32 %v154_v33, %v285_v50 }
  0xab   :  { %v120_v36 = vadd.f32 %v111_v34, %v79_v25 }
  0xac   :  { %173 = vst.msk [vmem:[%s333_s2 + $0x28] sm:$0xff] %vm167_vm2, %v163_v35 }
  0xad   :  { %v210_v29 = vpop.eup %209  ;;  %v129_v37 = vmul.f32 0.7978846, %v120_v36 }
  0xae   :  { %v146_v38 = vadd.f32 1.0, %v210_v29 }
  0xaf   :  { %211 = vtanh.f32 %v129_v37 }
  0xb0   :  { %v155_v39 = vmul.f32 0.5, %v146_v38 }
  0xb2   :  { %v164_v40 = vmul.f32 %v155_v39, %v77_v4 }
  0xb4   :  { %174 = vst.msk [vmem:[%s333_s2 + $0x30] sm:$0xff] %vm167_vm2, %v164_v40 }
  0xb5   :  { %v212_v41 = vpop.eup %211 }
  0xb6   :  { %v147_v42 = vadd.f32 1.0, %v212_v41 }
  0xb8   :  { %v156_v43 = vmul.f32 0.5, %v147_v42 }
  0xba   :  { %v165_v44 = vmul.f32 %v156_v43, %v79_v25 }
  0xbc   :  { %175 = vst.msk [vmem:[%s333_s2 + $0x38] sm:$0xff] %vm167_vm2, %v165_v44 }

// kernel: forward.4
= control target key start
LH: loop header
LB: loop body
LE: loop exit
PB: predicated region body
PF: predicated region fallthrough
CT: control target
= control target key end

     0   :  { %vm66_vm0 = vcmask 785408   ;;  %vm128_vm1 = vcmask 261120   ;;  %s240_s1 = inlined_call_operand.vmem [shape: bf16[96,32], index: 1, kind: input, shape index: {}]   ;;  %s241_s0 = inlined_call_operand.vmem [shape: f32[32,96], index: 0, kind: input, shape index: {}]   ;;  %s242_s2 = inlined_call_operand.vmem [shape: f32[32,32], index: 2, kind: output, shape index: {}]  }
   0x1   :  { %v168_v0 = vld [vmem:[%s240_s1 + $0x28] sm:$0xff]  ;;  %v167_v1 = vld [vmem:[%s240_s1 + $0x20] sm:$0xff]  ;;  %v166_v2 = vld [vmem:[%s240_s1 + $0x18] sm:$0xff] }
   0x2   :  { %75 = vmatpush.bf16.msra.mxu0 %v168_v0  ;;  %169 = vmatpush.bf16.msra.mxu1 %v168_v0  ;;  %v165_v3 = vld [vmem:[%s240_s1 + $0x10] sm:$0xff]  ;;  %v164_v4 = vld [vmem:[%s240_s1 + $0x8] sm:$0xff]  ;;  %v163_v5 = vld [vmem:[%s240_s1] sm:$0xff] }
   0x3   :  { %v12_v6 = vld [vmem:[%s241_s0] sm:$0xff]  ;;  %v13_v7 = vld [vmem:[%s241_s0 + $0x8] sm:$0xff]  ;;  %v14_v8 = vld [vmem:[%s241_s0 + $0x10] sm:$0xff] }
   0x4   :  { %v15_v9 = vld [vmem:[%s241_s0 + $0x18] sm:$0xff]  ;;  %v16_v10 = vpack.c.bf16 %v13_v7, %v12_v6 }
   0x5   :  { %v17_v11 = vpack.c.bf16 %v15_v9, %v14_v8 }
   0x6   :  { %76 = vmatpush.bf16.msra.mxu0 %v167_v1  ;;  %170 = vmatpush.bf16.msra.mxu1 %v167_v1 }
   0xa   :  { %77 = vmatpush.bf16.msra.mxu0 %v166_v2  ;;  %171 = vmatpush.bf16.msra.mxu1 %v166_v2 }
   0xe   :  { %78 = vmatpush.bf16.msra.mxu0 %v165_v3  ;;  %172 = vmatpush.bf16.msra.mxu1 %v165_v3 }
  0x12   :  { %79 = vmatpush.bf16.msra.mxu0 %v164_v4  ;;  %173 = vmatpush.bf16.msra.mxu1 %v164_v4 }
  0x16   :  { %80 = vmatpush.bf16.msra.mxu0 %v163_v5  ;;  %174 = vmatpush.bf16.msra.mxu1 %v163_v5 }
  0x19   :  { %161 = vmatmul.msk.bf16.vlgmr.msra.gmra.mxu0 %vm66_vm0, %v16_v10  ;;  %162 = vmatmul.msk.bf16.vlgmr.msra.gmra.mxu1 %vm66_vm0, %v17_v11 }
  0x96   :  { %v82_v12 = vpop.f32.mrf.mxu0  ;;  %v87_v13 = vpop.f32.mrf.mxu1 }
  0x97   :  { %v92_v14 = vmul.f32 %v82_v12, %v82_v12  ;;  %v94_v15 = vmul.f32 %v87_v13, %v87_v13 }
  0x99   :  { %v96_v16 = vmul.f32 %v92_v14, %v82_v12  ;;  %v98_v17 = vmul.f32 %v94_v15, %v87_v13 }
  0x9b   :  { %v100_v18 = vmul.f32 0.044715, %v96_v16  ;;  %v102_v19 = vmul.f32 0.044715, %v98_v17 }
  0x9d   :  { %v104_v20 = vadd.f32 %v100_v18, %v82_v12  ;;  %v106_v21 = vadd.f32 %v102_v19, %v87_v13 }
  0x9e   :  { %v84_v22 = vpop.f32.mrf.mxu0  ;;  %v89_v23 = vpop.f32.mrf.mxu1 }
  0x9f   :  { %v108_v24 = vmul.f32 0.7978846, %v104_v20  ;;  %v110_v25 = vmul.f32 0.7978846, %v106_v21  ;;  %v93_v26 = vmul.f32 %v84_v22, %v84_v22  ;;  %v95_v27 = vmul.f32 %v89_v23, %v89_v23 }
  0xa1   :  { %175 = vtanh.f32 %v108_v24  ;;  %v97_v28 = vmul.f32 %v93_v26, %v84_v22  ;;  %v99_v29 = vmul.f32 %v95_v27, %v89_v23 }
  0xa2   :  { %177 = vtanh.f32 %v110_v25 }
  0xa3   :  { %v101_v30 = vmul.f32 0.044715, %v97_v28  ;;  %v103_v31 = vmul.f32 0.044715, %v99_v29 }
  0xa5   :  { %v105_v32 = vadd.f32 %v101_v30, %v84_v22  ;;  %v107_v33 = vadd.f32 %v103_v31, %v89_v23 }
  0xa7   :  { %v176_v34 = vpop.eup %175  ;;  %v109_v35 = vmul.f32 0.7978846, %v105_v32  ;;  %v111_v36 = vmul.f32 0.7978846, %v107_v33 }
  0xa8   :  { %v178_v37 = vpop.eup %177  ;;  %v116_v38 = vadd.f32 1.0, %v176_v34 }
  0xa9   :  { %v118_v39 = vadd.f32 1.0, %v178_v37  ;;  %179 = vtanh.f32 %v109_v35 }
  0xaa   :  { %v120_v40 = vmul.f32 0.5, %v116_v38  ;;  %181 = vtanh.f32 %v111_v36 }
  0xab   :  { %v122_v41 = vmul.f32 0.5, %v118_v39 }
  0xac   :  { %v124_v42 = vmul.f32 %v120_v40, %v82_v12 }
  0xad   :  { %v126_v43 = vmul.f32 %v122_v41, %v87_v13 }
  0xae   :  { %129 = vst.msk [vmem:[%s242_s2] sm:$0xff] %vm128_vm1, %v124_v42 }
  0xaf   :  { %v180_v44 = vpop.eup %179  ;;  %131 = vst.msk [vmem:[%s242_s2 + $0x10] sm:$0xff] %vm128_vm1, %v126_v43 }
  0xb0   :  { %v182_v45 = vpop.eup %181  ;;  %v117_v46 = vadd.f32 1.0, %v180_v44 }
  0xb1   :  { %v119_v47 = vadd.f32 1.0, %v182_v45 }
  0xb2   :  { %v121_v48 = vmul.f32 0.5, %v117_v46 }
  0xb3   :  { %v123_v49 = vmul.f32 0.5, %v119_v47 }
  0xb4   :  { %v125_v50 = vmul.f32 %v121_v48, %v84_v22 }
  0xb5   :  { %v127_v51 = vmul.f32 %v123_v49, %v89_v23 }
  0xb6   :  { %130 = vst.msk [vmem:[%s242_s2 + $0x8] sm:$0xff] %vm128_vm1, %v125_v50 }
  0xb7   :  { %132 = vst.msk [vmem:[%s242_s2 + $0x18] sm:$0xff] %vm128_vm1, %v127_v51 }

// kernel: forward.5
= control target key start
LH: loop header
LB: loop body
LE: loop exit
PB: predicated region body
PF: predicated region fallthrough
CT: control target
= control target key end

     0   :  { %s4357_s0 = inlined_call_operand.vmem [shape: f32[32,32], index: 0, kind: input, shape index: {}]   ;;  %s4358_s1 = inlined_call_operand.vmem [shape: f32[1,32], index: 1, kind: input, shape index: {}]   ;;  %s4359_s2 = inlined_call_operand.vmem [shape: f32[1,32], index: 2, kind: input, shape index: {}]   ;;  %s4360_s3 = inlined_call_operand.vmem [shape: bf16[32,32], index: 3, kind: input, shape index: {}]   ;;  %s4361_s4 = inlined_call_operand.vmem [shape: f32[1,32], index: 4, kind: input, shape index: {}]   ;;  %s4362_s5 = inlined_call_operand.vmem [shape: f32[1,32], index: 5, kind: input, shape index: {}]   ;;  %s4363_s6 = inlined_call_operand.vmem [shape: f32[1,32], index: 6, kind: input, shape index: {}]   ;;  %s4364_s7 = inlined_call_operand.vmem [shape: bf16[2,32,96], index: 7, kind: input, shape index: {}]   ;;  %s4365_s8 = inlined_call_operand.vmem [shape: f32[2,1,96], index: 8, kind: input, shape index: {}]   ;;  %s4366_s9 = inlined_call_operand.vmem [shape: bf16[2,32,32], index: 9, kind: input, shape index: {}]   ;;  %s4367_s10 = inlined_call_operand.vmem [shape: f32[2,1,32], index: 10, kind: input, shape index: {}]   ;;  %s4368_s11 = inlined_call_operand.vmem [shape: f32[2,1,32], index: 11, kind: input, shape index: {}]   ;;  %s4369_s12 = inlined_call_operand.vmem [shape: f32[2,1,32], index: 12, kind: input, shape index: {}]   ;;  %s4370_s13 = inlined_call_operand.vmem [shape: bf16[2,32,64], index: 13, kind: input, shape index: {}]   ;;  %s4371_s14 = inlined_call_operand.vmem [shape: f32[2,1,64], index: 14, kind: input, shape index: {}]   ;;  %s4372_s15 = inlined_call_operand.vmem [shape: bf16[2,64,32], index: 15, kind: input, shape index: {}]   ;;  %s4373_s16 = inlined_call_operand.vmem [shape: f32[2,1,32], index: 16, kind: input, shape index: {}]   ;;  %s4374_s17 = inlined_call_operand.vmem [shape: f32[2,1,32], index: 17, kind: input, shape index: {}]   ;;  %s4375_s18 = inlined_call_operand.vmem [shape: f32[2,1,32], index: 18, kind: input, shape index: {}]   ;;  %s4376_s19 = inlined_call_operand.vmem [shape: bf16[32,32], index: 19, kind: input, shape index: {}]   ;;  %s4377_s20 = inlined_call_operand.vmem [shape: f32[1,32], index: 20, kind: input, shape index: {}]   ;;  %s4378_s21 = inlined_call_operand.vmem [shape: bf16[32,1], index: 21, kind: input, shape index: {}]   ;;  %s4379_s22 = inlined_call_operand.<no memory space> [shape: f32[1,1], index: 22, kind: input, shape index: {}]   ;;  %s4380_s23 = inlined_call_operand.hbm [shape: f32[2,32], index: 23, kind: output, shape index: {}]  }
   0x1   :  { %4394 = sst [smem:[#allocation6_spill]] %s4357_s0  ;;  %v28_v0 = vstv %s4379_s22 }
   0x2   :  { %4395 = sst [smem:[#allocation7_spill]] %s4358_s1  ;;  %29 = vst [vmem:[#allocation2] sm:$0x1] %v28_v0 }
   0x3   :  { %4396 = sst [smem:[#allocation8_spill]] %s4359_s2 }
   0x4   :  { %4397 = sst [smem:[#allocation9_spill]] %s4360_s3 }
   0x5   :  { %4398 = sst [smem:[#allocation10_spill]] %s4361_s4 }
   0x6   :  { %4399 = sst [smem:[#allocation11_spill]] %s4362_s5 }
   0x7   :  { %4400 = sst [smem:[#allocation12_spill]] %s4363_s6 }
   0x8   :  { %4401 = sst [smem:[#allocation13_spill]] %s4364_s7 }
   0x9   :  { %s4402_s5 = sld [smem:[#allocation6_spill]]  ;;  %vm84_vm0 = vcmask 261120  }
   0xf   :  { %v78_v1 = vld [vmem:[%s4402_s5] sm:$0xff]  ;;  %v79_v2 = vld [vmem:[%s4402_s5 + $0x8] sm:$0xff] }
  0x10   :  { %v85_v3 = vsel %vm84_vm0, %v78_v1, 0.0  ;;  %v88_v4 = vsel %vm84_vm0, %v79_v2, 0.0 }
  0x11   :  { %86 = vadd.xlane.f32.xlu0 %v85_v3 }
  0x12   :  { %30 = vsyncpa [#allocation4], 0  ;;  %v3336_v5 = vmov 32.0   ;;  %s4403_s6 = sld [smem:[#allocation9_spill]]  ;;  %v80_v60 = vld [vmem:[%s4402_s5 + $0x10] sm:$0xff]  ;;  %s3337_s22 = smov 96  }
  0x13   :  { %3096 = vrcp.f32 %v3336_v5  ;;  %s4404_s3 = sld [smem:[#allocation7_spill]]  ;;  %v91_v61 = vsel %vm84_vm0, %v80_v60, 0.0  ;;  %v81_v5 = vld [vmem:[%s4402_s5 + $0x18] sm:$0xff]  ;;  %s4390_s2 = smov 64  }
  0x14   :  { %s4405_s30 = sld [smem:[#allocation8_spill]]  ;;  %s3340_s5 = smov 120  }
  0x15   :  { %s4406_s1 = sld [smem:[#allocation10_spill]]  ;;  %s3341_s27 = smov 112  }
  0x16   :  { %s4407_s7 = sld [smem:[#allocation13_spill]]  ;;  %s3342_s28 = smov 80  }
  0x17   :  { %s4408_s4 = sld [smem:[#allocation11_spill]]  ;;  %s3343_s0 = smov 56  }
  0x18   :  { %v3035_v22 = vld [vmem:[%s4403_s6 + $0x8] sm:$0xff]  ;;  %v3034_v24 = vld [vmem:[%s4403_s6] sm:$0xff]  ;;  %s4409_s25 = sld [smem:[#allocation12_spill]]  ;;  %s3339_s6 = smov 88  }
  0x19   :  { %89 = vadd.xlane.f32.xlu0 %v88_v4  ;;  %v3097_v6 = vpop.eup %3096  ;;  %228 = vmatpush.bf16.msra.mxu0 %v3035_v22  ;;  %v3498_v43 = vld [vmem:[%s4404_s3] ss:$0 sm:$0xff]  ;;  %s4386_s24 = smov 104  }
  0x1a   :  { %v98_v7 = vmul.f32 32.0, %v3097_v6  ;;  %vm102_vm1 = vweird.f32 %v3097_v6  ;;  %v3504_v48 = vld [vmem:[%s4405_s30] ss:$0 sm:$0xff]  ;;  %s4388_s30 = smov 72  }
  0x1b   :  { %v3513_v53 = vld [vmem:[%s4406_s1] ss:$0 sm:$0xff] }
  0x1c   :  { %v99_v8 = vsub.f32 1.0, %v98_v7  ;;  %v94_v7 = vsel %vm84_vm0, %v81_v5, 0.0 }
  0x1d   :  { %229 = vmatpush.bf16.msra.mxu0 %v3034_v24 }
  0x1e   :  { %v100_v9 = vmul.f32 %v3097_v6, %v99_v8 }
  0x20   :  { %v101_v10 = vadd.f32 %v3097_v6, %v100_v9 }
  0x22   :  { %v3481_v11 = vsel %vm102_vm1, %v3097_v6, %v101_v10 }
  0x84   :  { %v87_v12 = vpop.xlane.xlu0 %86 }
  0x85   :  { %v104_v13 = vmul.f32 %v3481_v11, %v87_v12 }
  0x87   :  { %v108_v14 = vsub.f32 %v78_v1, %v104_v13 }
  0x89   :  { %v112_v15 = vmul.f32 %v108_v14, %v108_v14 }
  0x8b   :  { %v116_v16 = vsel %vm84_vm0, %v112_v15, 0.0 }
  0x8c   :  { %117 = vadd.xlane.f32.xlu1 %v116_v16  ;;  %v90_v17 = vpop.xlane.xlu0 %89  ;;  %v3037_v16 = vld [vmem:[%s4407_s7 + $0x8] sm:$0xff] }
  0x8d   :  { %v105_v18 = vmul.f32 %v3481_v11, %v90_v17  ;;  %379 = vmatpush.bf16.msra.mxu1 %v3037_v16 }
  0x8f   :  { %v109_v19 = vsub.f32 %v79_v2, %v105_v18  ;;  %v3036_v18 = vld [vmem:[%s4407_s7] sm:$0xff] }
  0x91   :  { %v113_v20 = vmul.f32 %v109_v19, %v109_v19  ;;  %380 = vmatpush.bf16.msra.mxu1 %v3036_v18 }
  0x93   :  { %v119_v21 = vsel %vm84_vm0, %v113_v20, 0.0 }
  0x94   :  { %120 = vadd.xlane.f32.xlu1 %v119_v21 }
  0xff   :  { %v118_v23 = vpop.xlane.xlu1 %117 }
 0x100   :  { %v128_v25 = vmul.f32 %v118_v23, %v3481_v11 }
 0x102   :  { %v132_v26 = vadd.f32 1e-05, %v128_v25 }
 0x104   :  { %3098 = vrsqrt.f32 %v132_v26  ;;  %vm142_vm3 = vweird.f32 %v132_v26 }
 0x107   :  { %v121_v27 = vpop.xlane.xlu1 %120 }
 0x108   :  { %v129_v28 = vmul.f32 %v121_v27, %v3481_v11 }
 0x10a   :  { %v3099_v29 = vpop.eup %3098  ;;  %v133_v30 = vadd.f32 1e-05, %v129_v28 }
 0x10b   :  { %v137_v31 = vmul.f32 %v3099_v29, %v132_v26  ;;  %vm143_vm2 = vweird.f32 %v3099_v29 }
 0x10c   :  { %3100 = vrsqrt.f32 %v133_v30  ;;  %vm144_vm4 = vmor %vm142_vm3, %vm143_vm2  ;;  %vm152_vm6 = vweird.f32 %v133_v30 }
 0x10d   :  { %v138_v32 = vmul.f32 %v3099_v29, %v137_v31 }
 0x10f   :  { %v139_v33 = vmul.f32 0.5, %v138_v32 }
 0x111   :  { %v140_v34 = vsub.f32 1.5, %v139_v33 }
 0x112   :  { %v3101_v35 = vpop.eup %3100 }
 0x113   :  { %v141_v36 = vmul.f32 %v3099_v29, %v140_v34  ;;  %v147_v37 = vmul.f32 %v3101_v35, %v133_v30  ;;  %vm153_vm5 = vweird.f32 %v3101_v35 }
 0x114   :  { %vm154_vm7 = vmor %vm152_vm6, %vm153_vm5  ;;  %vm403_vm5 = vcmask 64512   ;;  %vm424_vm6 = vcmask 130048  }
 0x115   :  { %v148_v38 = vmul.f32 %v3101_v35, %v147_v37  ;;  %v145_v39 = vsel %vm144_vm4, %v3099_v29, %v141_v36 }
 0x116   :  { %v176_v42 = vmul.f32 %v145_v39, %v108_v14 }
 0x117   :  { %v149_v40 = vmul.f32 0.5, %v148_v38 }
 0x118   :  { %v183_v47 = vmul.f32 %v3498_v43, %v176_v42  ;;  %v3554_v42 = vld [vmem:[%s4408_s4] ss:$0 sm:$0xff]  ;;  %s4392_s4 = smov 48  }
 0x119   :  { %v150_v41 = vsub.f32 1.5, %v149_v40 }
 0x11a   :  { %v190_v50 = vadd.f32 %v3504_v48, %v183_v47 }
 0x11b   :  { %v151_v44 = vmul.f32 %v3101_v35, %v150_v41 }
 0x11d   :  { %v155_v45 = vsel %vm154_vm7, %v3101_v35, %v151_v44 }
 0x11e   :  { %v177_v46 = vmul.f32 %v155_v45, %v109_v19 }
 0x120   :  { %v184_v49 = vmul.f32 %v3498_v43, %v177_v46 }
 0x122   :  { %v191_v51 = vadd.f32 %v3504_v48, %v184_v49  ;;  %v3560_v49 = vld [vmem:[%s4409_s25] ss:$0 sm:$0xff]  ;;  %s4384_s25 = smov 40  }
 0x124   :  { %v198_v52 = vpack.c.bf16 %v191_v51, %v190_v50 }
 0x126   :  { %2860 = vmatmul.msk.bf16.vlgmr.msra.gmra.mxu0 %vm84_vm0, %v198_v52 }
 0x1a3   :  { %v231_v54 = vpop.f32.mrf.mxu0 }
 0x1a4   :  { %v232_v55 = vadd.f32 %v3513_v53, %v231_v54 }
 0x1a6   :  { %v243_v56 = vsel %vm84_vm0, %v232_v55, 0.0 }
 0x1a7   :  { %244 = vadd.xlane.f32.xlu2 %v243_v56 }
 0x1ab   :  { %v233_v57 = vpop.f32.mrf.mxu0 }
 0x1ac   :  { %v234_v58 = vadd.f32 %v3513_v53, %v233_v57 }
 0x1ae   :  { %v246_v59 = vsel %vm84_vm0, %v234_v58, 0.0 }
 0x1af   :  { %247 = vadd.xlane.f32.xlu2 %v246_v59 }
 0x1b7   :  { %92 = vadd.xlane.f32.xlu2 %v91_v61 }
 0x21a   :  { %v245_v62 = vpop.xlane.xlu2 %244 }
 0x21b   :  { %v255_v63 = vmul.f32 %v245_v62, %v3481_v11 }
 0x21d   :  { %v259_v0 = vsub.f32 %v232_v55, %v255_v63 }
 0x21f   :  { %v263_v1 = vmul.f32 %v259_v0, %v259_v0 }
 0x221   :  { %v267_v2 = vsel %vm84_vm0, %v263_v1, 0.0 }
 0x222   :  { %268 = vadd.xlane.f32.xlu0 %v267_v2  ;;  %v248_v3 = vpop.xlane.xlu2 %247 }
 0x223   :  { %v256_v4 = vmul.f32 %v248_v3, %v3481_v11 }
 0x225   :  { %v260_v6 = vsub.f32 %v234_v58, %v256_v4 }
 0x227   :  { %v264_v8 = vmul.f32 %v260_v6, %v260_v6 }
 0x229   :  { %v270_v9 = vsel %vm84_vm0, %v264_v8, 0.0 }
 0x22a   :  { %95 = vadd.xlane.f32.xlu0 %v94_v7  ;;  %271 = vadd.xlane.f32.xlu1 %v270_v9  ;;  %v93_v10 = vpop.xlane.xlu2 %92 }
 0x22b   :  { %v106_v12 = vmul.f32 %v3481_v11, %v93_v10 }
 0x22d   :  { %v3532_v13 = vsub.f32 %v80_v60, %v106_v12 }
 0x22f   :  { %v114_v14 = vmul.f32 %v3532_v13, %v3532_v13 }
 0x231   :  { %v122_v15 = vsel %vm84_vm0, %v114_v14, 0.0 }
 0x232   :  { %123 = vadd.xlane.f32.xlu1 %v122_v15 }
 0x295   :  { %v269_v17 = vpop.xlane.xlu0 %268 }
 0x296   :  { %v279_v19 = vmul.f32 %v269_v17, %v3481_v11 }
 0x298   :  { %v283_v20 = vadd.f32 1e-05, %v279_v19 }
 0x29a   :  { %3102 = vrsqrt.f32 %v283_v20  ;;  %vm293_vm9 = vweird.f32 %v283_v20 }
 0x29d   :  { %v96_v21 = vpop.xlane.xlu0 %95  ;;  %v272_v22 = vpop.xlane.xlu1 %271 }
 0x29e   :  { %v107_v23 = vmul.f32 %v3481_v11, %v96_v21  ;;  %v280_v24 = vmul.f32 %v272_v22, %v3481_v11 }
 0x2a0   :  { %v3103_v25 = vpop.eup %3102  ;;  %v3546_v26 = vsub.f32 %v81_v5, %v107_v23  ;;  %v284_v27 = vadd.f32 1e-05, %v280_v24 }
 0x2a1   :  { %v288_v28 = vmul.f32 %v3103_v25, %v283_v20  ;;  %vm294_vm8 = vweird.f32 %v3103_v25 }
 0x2a2   :  { %3104 = vrsqrt.f32 %v284_v27  ;;  %v115_v29 = vmul.f32 %v3546_v26, %v3546_v26  ;;  %vm295_vm10 = vmor %vm293_vm9, %vm294_vm8  ;;  %vm303_vm12 = vweird.f32 %v284_v27 }
 0x2a3   :  { %v289_v30 = vmul.f32 %v3103_v25, %v288_v28 }
 0x2a4   :  { %v125_v31 = vsel %vm84_vm0, %v115_v29, 0.0 }
 0x2a5   :  { %v290_v32 = vmul.f32 0.5, %v289_v30  ;;  %126 = vadd.xlane.f32.xlu2 %v125_v31  ;;  %v124_v55 = vpop.xlane.xlu1 %123 }
 0x2a6   :  { %v130_v56 = vmul.f32 %v124_v55, %v3481_v11 }
 0x2a7   :  { %v291_v33 = vsub.f32 1.5, %v290_v32 }
 0x2a8   :  { %v3105_v34 = vpop.eup %3104  ;;  %v134_v57 = vadd.f32 1e-05, %v130_v56 }
 0x2a9   :  { %v292_v35 = vmul.f32 %v3103_v25, %v291_v33  ;;  %v298_v36 = vmul.f32 %v3105_v34, %v284_v27  ;;  %vm304_vm11 = vweird.f32 %v3105_v34 }
 0x2aa   :  { %vm305_vm13 = vmor %vm303_vm12, %vm304_vm11  ;;  %3106 = vrsqrt.f32 %v134_v57  ;;  %vm162_vm14 = vweird.f32 %v134_v57 }
 0x2ab   :  { %v299_v37 = vmul.f32 %v3105_v34, %v298_v36  ;;  %v296_v38 = vsel %vm295_vm10, %v3103_v25, %v292_v35 }
 0x2ac   :  { %v327_v41 = vmul.f32 %v296_v38, %v259_v0 }
 0x2ad   :  { %v300_v39 = vmul.f32 0.5, %v299_v37 }
 0x2ae   :  { %v334_v47 = vmul.f32 %v3554_v42, %v327_v41 }
 0x2af   :  { %v301_v40 = vsub.f32 1.5, %v300_v39 }
 0x2b0   :  { %v3564_v51 = vadd.f32 %v3560_v49, %v334_v47  ;;  %v3107_v58 = vpop.eup %3106 }
 0x2b1   :  { %v302_v44 = vmul.f32 %v3105_v34, %v301_v40  ;;  %v157_v59 = vmul.f32 %v3107_v58, %v134_v57  ;;  %vm163_vm15 = vweird.f32 %v3107_v58 }
 0x2b2   :  { %vm164_vm1 = vmor %vm162_vm14, %vm163_vm15 }
 0x2b3   :  { %v306_v45 = vsel %vm305_vm13, %v3105_v34, %v302_v44  ;;  %v158_v60 = vmul.f32 %v3107_v58, %v157_v59  ;;  %vm541_vm13 = vcmask 1043456  }
 0x2b4   :  { %v328_v46 = vmul.f32 %v306_v45, %v260_v6 }
 0x2b5   :  { %v159_v0 = vmul.f32 0.5, %v158_v60 }
 0x2b6   :  { %v335_v50 = vmul.f32 %v3554_v42, %v328_v46 }
 0x2b7   :  { %v160_v1 = vsub.f32 1.5, %v159_v0 }
 0x2b8   :  { %v3567_v52 = vadd.f32 %v3560_v49, %v335_v50 }
 0x2b9   :  { %v161_v3 = vmul.f32 %v3107_v58, %v160_v1 }
 0x2ba   :  { %v349_v54 = vpack.c.bf16 %v3567_v52, %v3564_v51 }
 0x2bb   :  { %v165_v6 = vsel %vm164_vm1, %v3107_v58, %v161_v3 }
 0x2bc   :  { %2870 = vmatmul.msk.bf16.vlgmr.msra.gmra.mxu1 %vm84_vm0, %v349_v54  ;;  %v178_v9 = vmul.f32 %v165_v6, %v3532_v13  ;;  %v3584_v13 = vld [vmem:[%s4365_s8] ss:$0 sm:$0xff] }
 0x2be   :  { %v185_v15 = vmul.f32 %v3498_v43, %v178_v9 }
 0x2c0   :  { %v192_v17 = vadd.f32 %v3504_v48, %v185_v15 }
 0x318   :  { %v127_v61 = vpop.xlane.xlu2 %126 }
 0x319   :  { %v131_v62 = vmul.f32 %v127_v61, %v3481_v11 }
 0x31b   :  { %v135_v63 = vadd.f32 1e-05, %v131_v62 }
 0x31d   :  { %3108 = vrsqrt.f32 %v135_v63  ;;  %vm172_vm2 = vweird.f32 %v135_v63 }
 0x323   :  { %v3109_v2 = vpop.eup %3108 }
 0x324   :  { %v167_v4 = vmul.f32 %v3109_v2, %v135_v63  ;;  %vm173_vm3 = vweird.f32 %v3109_v2 }
 0x325   :  { %vm174_vm4 = vmor %vm172_vm2, %vm173_vm3 }
 0x326   :  { %v168_v5 = vmul.f32 %v3109_v2, %v167_v4 }
 0x328   :  { %v169_v7 = vmul.f32 0.5, %v168_v5 }
 0x32a   :  { %v170_v8 = vsub.f32 1.5, %v169_v7 }
 0x32c   :  { %v171_v10 = vmul.f32 %v3109_v2, %v170_v8 }
 0x32e   :  { %v175_v12 = vsel %vm174_vm4, %v3109_v2, %v171_v10 }
 0x32f   :  { %v179_v14 = vmul.f32 %v175_v12, %v3546_v26 }
 0x331   :  { %v186_v16 = vmul.f32 %v3498_v43, %v179_v14 }
 0x333   :  { %v193_v18 = vadd.f32 %v3504_v48, %v186_v16 }
 0x335   :  { %v199_v19 = vpack.c.bf16 %v193_v18, %v192_v17 }
 0x337   :  { %2861 = vmatmul.msk.bf16.gmra.mxu0 %vm84_vm0, %v199_v19 }
 0x339   :  { %v382_v20 = vpop.f32.mrf.mxu1 }
 0x33a   :  { %v383_v21 = vadd.f32 %v3584_v13, %v382_v20 }
 0x33c   :  { %v396_v24 = vmul.f32 0.35355338, %v383_v21 }
 0x341   :  { %v384_v22 = vpop.f32.mrf.mxu1 }
 0x342   :  { %v385_v23 = vadd.f32 %v3584_v13, %v384_v22 }
 0x344   :  { %v397_v43 = vmul.f32 0.35355338, %v385_v23  ;;  %v3588_v25 = vpack.c.bf16 %v385_v23, %v383_v21 }
 0x346   :  { %v3590_v26 = vpack.c.bf16 %v397_v43, %v396_v24  ;;  %401 = vrot.lane.b32.xlu0 %v3588_v25, %s3337_s22 }
 0x3b4   :  { %v236_v48 = vpop.f32.mrf.mxu0 }
 0x3b5   :  { %v237_v35 = vadd.f32 %v3513_v53, %v236_v48 }
 0x3b7   :  { %v249_v40 = vsel %vm84_vm0, %v237_v35, 0.0 }
 0x3b8   :  { %v402_v27 = vpop.permute.xlu0 %401 }
 0x3b9   :  { %v408_v28 = vsel %vm403_vm5, %v402_v27, 0 }
 0x3ba   :  { %417 = vmatpush.bf16.xpose.msra.mxu2 %v408_v28 }
 0x3bc   :  { %v238_v29 = vpop.f32.mrf.mxu0 }
 0x3bd   :  { %v239_v30 = vadd.f32 %v3513_v53, %v238_v29 }
 0x3bf   :  { %v252_v31 = vsel %vm84_vm0, %v239_v30, 0.0 }
 0x3c0   :  { %253 = vadd.xlane.f32.xlu2 %v252_v31 }
 0x3c1   :  { %2872 = vmatmul.msk.bf16.vlgmr.msra.gmra.mxu2 %vm403_vm5, %v3590_v26 }
 0x433   :  { %v254_v34 = vpop.xlane.xlu2 %253 }
 0x434   :  { %v258_v36 = vmul.f32 %v254_v34, %v3481_v11 }
 0x436   :  { %v3602_v38 = vsub.f32 %v239_v30, %v258_v36 }
 0x438   :  { %v266_v41 = vmul.f32 %v3602_v38, %v3602_v38 }
 0x43a   :  { %v276_v44 = vsel %vm84_vm0, %v266_v41, 0.0 }
 0x444   :  { %v419_v32 = vpop.f32.mrf.mxu2 }
 0x445   :  { %v425_v33 = vsel %vm424_vm6, %v419_v32, -inf }
 0x446   :  { %426 = vmax.xlane.f32.xlu1 %v425_v33 }
 0x44c   :  { %v421_v37 = vpop.f32.mrf.mxu2 }
 0x44d   :  { %v428_v39 = vsel %vm424_vm6, %v421_v37, -inf }
 0x44e   :  { %429 = vmax.xlane.f32.xlu2 %v428_v39  ;;  %250 = vadd.xlane.f32.xlu1 %v249_v40 }
 0x456   :  { %277 = vadd.xlane.f32.xlu1 %v276_v44 }
 0x466   :  { %448 = vrot.lane.b32.xlu2 %v3588_v25, %s4390_s2 }
 0x4b9   :  { %v427_v53 = vpop.xlane.xlu1 %426 }
 0x4ba   :  { %v431_v45 = vsub.f32 %v419_v32, %v427_v53 }
 0x4bc   :  { %v433_v46 = vmul.f32 1.442695, %v431_v45 }
 0x4be   :  { %3110 = vpow2.f32 %v433_v46 }
 0x4c1   :  { %v430_v47 = vpop.xlane.xlu2 %429  ;;  %v251_v50 = vpop.xlane.xlu1 %250 }
 0x4c2   :  { %v432_v54 = vsub.f32 %v421_v37, %v430_v47  ;;  %v257_v55 = vmul.f32 %v251_v50, %v3481_v11 }
 0x4c4   :  { %v3111_v56 = vpop.eup %3110  ;;  %v435_v57 = vmul.f32 1.442695, %v432_v54  ;;  %v3612_v58 = vsub.f32 %v237_v35, %v257_v55 }
 0x4c5   :  { %v437_v59 = vsel %vm424_vm6, %v3111_v56, 0.0 }
 0x4c6   :  { %3112 = vpow2.f32 %v435_v57  ;;  %438 = vadd.xlane.f32.xlu1 %v437_v59  ;;  %v265_v60 = vmul.f32 %v3612_v58, %v3612_v58 }
 0x4c8   :  { %v273_v61 = vsel %vm84_vm0, %v265_v60, 0.0 }
 0x4c9   :  { %v449_v62 = vpop.permute.xlu2 %448  ;;  %274 = vadd.xlane.f32.xlu0 %v273_v61  ;;  %v278_v1 = vpop.xlane.xlu1 %277 }
 0x4ca   :  { %461 = vmatpush.bf16.msra.mxu3 %v449_v62  ;;  %v282_v2 = vmul.f32 %v278_v1, %v3481_v11 }
 0x4cc   :  { %v3113_v63 = vpop.eup %3112  ;;  %v286_v3 = vadd.f32 1e-05, %v282_v2 }
 0x4cd   :  { %v440_v0 = vsel %vm424_vm6, %v3113_v63, 0.0 }
 0x4ce   :  { %441 = vadd.xlane.f32.xlu2 %v440_v0  ;;  %3114 = vrsqrt.f32 %v286_v3  ;;  %vm323_vm8 = vweird.f32 %v286_v3 }
 0x4d4   :  { %v3115_v4 = vpop.eup %3114 }
 0x4d5   :  { %v318_v5 = vmul.f32 %v3115_v4, %v286_v3  ;;  %vm324_vm7 = vweird.f32 %v3115_v4 }
 0x4d6   :  { %vm325_vm9 = vmor %vm323_vm8, %vm324_vm7  ;;  %vm1344_vm7 = vcmask 523264  }
 0x4d7   :  { %v319_v6 = vmul.f32 %v3115_v4, %v318_v5 }
 0x4d9   :  { %v320_v12 = vmul.f32 0.5, %v319_v6 }
 0x4db   :  { %v321_v15 = vsub.f32 1.5, %v320_v12 }
 0x4dd   :  { %v322_v19 = vmul.f32 %v3115_v4, %v321_v15 }
 0x4df   :  { %472 = vrot.lane.b32.xlu1 %v3588_v25, %s3339_s6  ;;  %v326_v48 = vsel %vm325_vm9, %v3115_v4, %v322_v19 }
 0x4e0   :  { %v330_v29 = vmul.f32 %v326_v48, %v3602_v38 }
 0x4e2   :  { %v337_v37 = vmul.f32 %v3554_v42, %v330_v29 }
 0x4e4   :  { %v3640_v40 = vadd.f32 %v3560_v49, %v337_v37 }
 0x4e6   :  { %470 = vrot.lane.b32.xlu2 %v3590_v26, %s3340_s5 }
 0x4e7   :  { %579 = vrot.lane.b32.xlu1 %v3590_v26, %s3341_s27 }
 0x4ee   :  { %581 = vrot.lane.b32.xlu2 %v3588_v25, %s3342_s28 }
 0x539   :  { %v439_v8 = vpop.xlane.xlu1 %438 }
 0x53a   :  { %3116 = vrcp.f32 %v439_v8 }
 0x53c   :  { %v275_v7 = vpop.xlane.xlu0 %274 }
 0x53d   :  { %v281_v9 = vmul.f32 %v275_v7, %v3481_v11 }
 0x53f   :  { %v285_v10 = vadd.f32 1e-05, %v281_v9 }
 0x540   :  { %v3117_v16 = vpop.eup %3116 }
 0x541   :  { %3118 = vrsqrt.f32 %v285_v10  ;;  %v442_v14 = vpop.xlane.xlu2 %441  ;;  %v445_v22 = vmul.f32 %v3117_v16, %v3111_v56  ;;  %vm313_vm11 = vweird.f32 %v285_v10 }
 0x542   :  { %3120 = vrcp.f32 %v442_v14 }
 0x547   :  { %v3119_v17 = vpop.eup %3118 }
 0x548   :  { %v3121_v18 = vpop.eup %3120  ;;  %v308_v20 = vmul.f32 %v3119_v17, %v285_v10  ;;  %vm314_vm10 = vweird.f32 %v3119_v17 }
 0x549   :  { %v471_v21 = vpop.permute.xlu2 %470  ;;  %v446_v23 = vmul.f32 %v3121_v18, %v3113_v63  ;;  %vm315_vm12 = vmor %vm313_vm11, %vm314_vm10 }
 0x54a   :  { %v309_v24 = vmul.f32 %v3119_v17, %v308_v20 }
 0x54b   :  { %v447_v43 = vpack.c.bf16 %v446_v23, %v445_v22 }
 0x54c   :  { %v310_v27 = vmul.f32 0.5, %v309_v24 }
 0x54d   :  { %2873 = vmatmul.msk.bf16.vlgmr.msra.gmra.mxu3 %vm424_vm6, %v447_v43 }
 0x54e   :  { %v311_v28 = vsub.f32 1.5, %v310_v27 }
 0x550   :  { %v312_v30 = vmul.f32 %v3119_v17, %v311_v28 }
 0x551   :  { %v582_v31 = vpop.permute.xlu2 %581  ;;  %v473_v32 = vpop.permute.xlu1 %472 }
 0x552   :  { %v316_v33 = vsel %vm315_vm12, %v3119_v17, %v312_v30  ;;  %v478_v34 = vsel %vm403_vm5, %v473_v32, 0  ;;  %v587_v35 = vsel %vm403_vm5, %v582_v31, 0 }
 0x553   :  { %487 = vmatpush.bf16.xpose.msrb.mxu3 %v478_v34  ;;  %596 = vmatpush.bf16.xpose.msrb.mxu1 %v587_v35  ;;  %v329_v36 = vmul.f32 %v316_v33, %v3612_v58 }
 0x555   :  { %v336_v39 = vmul.f32 %v3554_v42, %v329_v36  ;;  %v392_v42 = vld [vmem:[%s4366_s9] sm:$0xf] }
 0x556   :  { %v3651_v53 = vsel %vm541_vm13, %v392_v42, 0 }
 0x557   :  { %v3637_v38 = vadd.f32 %v3560_v49, %v336_v39  ;;  %572 = vmatpush.bf16.msrb.mxu0 %v3651_v53 }
 0x559   :  { %v350_v41 = vpack.c.bf16 %v3640_v40, %v3637_v38  ;;  %v580_v44 = vpop.permute.xlu1 %579 }
 0x55b   :  { %2871 = vmatmul.msk.bf16.gmra.mxu1 %vm84_vm0, %v350_v41 }
 0x55d   :  { %2874 = vmatmul.msk.bf16.vlgmr.msrb.gmra.mxu3 %vm403_vm5, %v471_v21 }
 0x56b   :  { %2878 = vmatmul.msk.bf16.vlgmr.msrb.gmra.mxu1 %vm403_vm5, %v580_v44 }
 0x5d0   :  { %v463_v49 = vpop.f32.mrf.mxu3 }
 0x5d8   :  { %v387_v45 = vpop.f32.mrf.mxu1  ;;  %v465_v46 = vpop.f32.mrf.mxu3 }
 0x5d9   :  { %v468_v47 = vpack.c.bf16 %v465_v46, %v463_v49  ;;  %v388_v50 = vadd.f32 %v3584_v13, %v387_v45  ;;  %v393_v45 = vld [vmem:[%s4366_s9 + $0x4] sm:$0xf] }
 0x5da   :  { %v543_v46 = vsel %vm541_vm13, %v393_v45, 0 }
 0x5db   :  { %2877 = vmatmul.msk.bf16.vlgmr.msrb.gmra.mxu0 %vm403_vm5, %v468_v47  ;;  %v759_v58 = vmul.f32 0.35355338, %v388_v50  ;;  %552 = vmatpush.bf16.msra.mxu3 %v543_v46  ;;  %v394_v47 = vld [vmem:[%s4366_s9 + $0x8] sm:$0xf] }
 0x5e0   :  { %v389_v54 = vpop.f32.mrf.mxu1  ;;  %v489_v55 = vpop.f32.mrf.mxu3 }
 0x5e1   :  { %v390_v56 = vadd.f32 %v3584_v13, %v389_v54  ;;  %v494_v57 = vsel %vm424_vm6, %v489_v55, -inf }
 0x5e2   :  { %495 = vmax.xlane.f32.xlu0 %v494_v57 }
 0x5e3   :  { %v760_v59 = vmul.f32 0.35355338, %v390_v56  ;;  %v3675_v24 = vpack.c.bf16 %v390_v56, %v388_v50  ;;  %v651_v50 = vsel %vm541_vm13, %v394_v47, 0 }
 0x5e4   :  { %660 = vmatpush.bf16.msrb.mxu3 %v651_v50 }
 0x5e5   :  { %v3658_v60 = vpack.c.bf16 %v760_v59, %v759_v58 }
 0x5e8   :  { %v491_v61 = vpop.f32.mrf.mxu3  ;;  %v598_v62 = vpop.f32.mrf.mxu1 }
 0x5e9   :  { %v497_v63 = vsel %vm424_vm6, %v491_v61, -inf  ;;  %v603_v0 = vsel %vm424_vm6, %v598_v62, -inf }
 0x5ea   :  { %498 = vmax.xlane.f32.xlu2 %v497_v63  ;;  %604 = vmax.xlane.f32.xlu1 %v603_v0 }
 0x5f0   :  { %v600_v1 = vpop.f32.mrf.mxu1 }
 0x5f1   :  { %v606_v2 = vsel %vm424_vm6, %v600_v1, -inf }
 0x5f2   :  { %607 = vmax.xlane.f32.xlu0 %v606_v2 }
 0x655   :  { %v496_v13 = vpop.xlane.xlu0 %495 }
 0x656   :  { %v500_v3 = vsub.f32 %v489_v55, %v496_v13 }
 0x658   :  { %v502_v4 = vmul.f32 1.442695, %v500_v3  ;;  %v574_v54 = vpop.f32.mrf.mxu0 }
 0x65a   :  { %3122 = vpow2.f32 %v502_v4 }
 0x65d   :  { %v499_v5 = vpop.xlane.xlu2 %498  ;;  %v605_v6 = vpop.xlane.xlu1 %604 }
 0x65e   :  { %v501_v7 = vsub.f32 %v491_v61, %v499_v5  ;;  %v609_v8 = vsub.f32 %v598_v62, %v605_v6 }
 0x660   :  { %v3123_v9 = vpop.eup %3122  ;;  %v504_v10 = vmul.f32 1.442695, %v501_v7  ;;  %v611_v12 = vmul.f32 1.442695, %v609_v8  ;;  %v3693_v55 = vpop.f32.mrf.mxu0 }
 0x661   :  { %v506_v14 = vsel %vm424_vm6, %v3123_v9, 0.0 }
 0x662   :  { %3124 = vpow2.f32 %v504_v10  ;;  %507 = vadd.xlane.f32.xlu0 %v506_v14 }
 0x663   :  { %3126 = vpow2.f32 %v611_v12 }
 0x665   :  { %v608_v15 = vpop.xlane.xlu0 %607 }
 0x666   :  { %v610_v16 = vsub.f32 %v600_v1, %v608_v15 }
 0x668   :  { %v3125_v17 = vpop.eup %3124  ;;  %v613_v18 = vmul.f32 1.442695, %v610_v16 }
 0x669   :  { %v3127_v19 = vpop.eup %3126  ;;  %v509_v20 = vsel %vm424_vm6, %v3125_v17, 0.0 }
 0x66a   :  { %3128 = vpow2.f32 %v613_v18  ;;  %v615_v21 = vsel %vm424_vm6, %v3127_v19, 0.0  ;;  %510 = vadd.xlane.f32.xlu0 %v509_v20 }
 0x66b   :  { %616 = vadd.xlane.f32.xlu2 %v615_v21 }
 0x670   :  { %v3129_v22 = vpop.eup %3128 }
 0x671   :  { %v618_v23 = vsel %vm424_vm6, %v3129_v22, 0.0 }
 0x672   :  { %619 = vadd.xlane.f32.xlu1 %v618_v23 }
 0x67e   :  { %517 = vrot.lane.b32.xlu0 %v3588_v25, %s3343_s0 }
 0x683   :  { %626 = vrot.lane.b32.xlu2 %v3588_v25, %s4392_s4 }
 0x686   :  { %671 = vrot.lane.b32.xlu0 %v3588_v25, %s4388_s30 }
 0x68b   :  { %669 = vrot.lane.b32.xlu1 %v3590_v26, %s4386_s24 }
 0x68e   :  { %764 = vrot.lane.b32.xlu0 %v3675_v24, %s3337_s22 }
 0x693   :  { %716 = vrot.lane.b32.xlu1 %v3588_v25, %s4384_s25 }
 0x6d5   :  { %v508_v43 = vpop.xlane.xlu0 %507 }
 0x6dd   :  { %v511_v48 = vpop.xlane.xlu0 %510 }
 0x6de   :  { %3130 = vrcp.f32 %v511_v48  ;;  %v617_v27 = vpop.xlane.xlu2 %616 }
 0x6df   :  { %3132 = vrcp.f32 %v508_v43 }
 0x6e4   :  { %v3131_v28 = vpop.eup %3130 }
 0x6e5   :  { %v3133_v29 = vpop.eup %3132  ;;  %v515_v30 = vmul.f32 %v3131_v28, %v3125_v17  ;;  %v620_v33 = vpop.xlane.xlu1 %619 }
 0x6e6   :  { %v514_v31 = vmul.f32 %v3133_v29, %v3123_v9  ;;  %v627_v26 = vpop.permute.xlu2 %626  ;;  %3134 = vrcp.f32 %v620_v33 }
 0x6e7   :  { %3136 = vrcp.f32 %v617_v27 }
 0x6e8   :  { %v516_v34 = vpack.c.bf16 %v515_v30, %v514_v31 }
 0x6ec   :  { %v3135_v36 = vpop.eup %3134 }
 0x6ed   :  { %v3137_v37 = vpop.eup %3136  ;;  %v624_v41 = vmul.f32 %v3135_v36, %v3129_v22 }
 0x6ee   :  { %v623_v44 = vmul.f32 %v3137_v37, %v3127_v19 }
 0x6f0   :  { %v518_v32 = vpop.permute.xlu0 %517  ;;  %v625_v42 = vpack.c.bf16 %v624_v41, %v623_v44 }
 0x6f1   :  { %530 = vmatpush.bf16.msrb.mxu2 %v518_v32 }
 0x6f4   :  { %2875 = vmatmul.msk.bf16.vlgmr.msrb.gmra.mxu2 %vm424_vm6, %v516_v34 }
 0x6f5   :  { %639 = vmatpush.bf16.msra.mxu2 %v627_v26 }
 0x6f8   :  { %v672_v25 = vpop.permute.xlu0 %671 }
 0x6f9   :  { %v677_v35 = vsel %vm403_vm5, %v672_v25, 0 }
 0x6fa   :  { %686 = vmatpush.bf16.xpose.msra.mxu0 %v677_v35 }
 0x6fd   :  { %v670_v39 = vpop.permute.xlu1 %669 }
 0x700   :  { %v765_v58 = vpop.permute.xlu0 %764 }
 0x701   :  { %2881 = vmatmul.msk.bf16.vlgmr.msra.gmra.mxu0 %vm403_vm5, %v670_v39  ;;  %v770_v63 = vsel %vm403_vm5, %v765_v58, 0 }
 0x704   :  { %2879 = vmatmul.msk.bf16.vlgmr.msra.gmra.mxu2 %vm424_vm6, %v625_v42 }
 0x705   :  { %v717_v49 = vpop.permute.xlu1 %716 }
 0x706   :  { %729 = vmatpush.bf16.msra.mxu1 %v717_v49 }
 0x777   :  { %v532_v56 = vpop.f32.mrf.mxu2 }
 0x77e   :  { %v688_v57 = vpop.f32.mrf.mxu0 }
 0x77f   :  { %v534_v59 = vpop.f32.mrf.mxu2  ;;  %v693_v61 = vsel %vm424_vm6, %v688_v57, -inf }
 0x780   :  { %v537_v62 = vpack.c.bf16 %v534_v59, %v532_v56  ;;  %694 = vmax.xlane.f32.xlu0 %v693_v61 }
 0x782   :  { %2876 = vmatmul.msk.bf16.vlgmr.msra.gmra.mxu3 %vm403_vm5, %v537_v62 }
 0x783   :  { %779 = vmatpush.bf16.xpose.msra.mxu3 %v770_v63 }
 0x786   :  { %v690_v0 = vpop.f32.mrf.mxu0 }
 0x787   :  { %v641_v1 = vpop.f32.mrf.mxu2  ;;  %v696_v2 = vsel %vm424_vm6, %v690_v0, -inf }
 0x788   :  { %697 = vmax.xlane.f32.xlu2 %v696_v2 }
 0x78f   :  { %v643_v13 = vpop.f32.mrf.mxu2 }
 0x790   :  { %v646_v3 = vpack.c.bf16 %v643_v13, %v641_v1 }
 0x792   :  { %2880 = vmatmul.msk.bf16.vlgmr.msrb.gmra.mxu3 %vm403_vm5, %v646_v3 }
 0x793   :  { %909 = vmatpush.bf16.msrb.mxu3 %v543_v46 }
 0x7a2   :  { %2884 = vmatmul.msk.bf16.vlgmr.msra.gmra.mxu3 %vm403_vm5, %v3658_v60 }
 0x7a3   :  { %1011 = vmatpush.bf16.msra.mxu3 %v651_v50 }
 0x7f3   :  { %v695_v4 = vpop.xlane.xlu0 %694 }
 0x7f4   :  { %v699_v5 = vsub.f32 %v688_v57, %v695_v4  ;;  %v395_v57 = vld [vmem:[%s4366_s9 + $0xc] sm:$0xf] }
 0x7f5   :  { %v3736_v58 = vsel %vm541_vm13, %v395_v57, 0 }
 0x7f6   :  { %v701_v6 = vmul.f32 1.442695, %v699_v5  ;;  %750 = vmatpush.bf16.msrb.mxu2 %v3736_v58 }
 0x7f8   :  { %3138 = vpow2.f32 %v701_v6 }
 0x7fb   :  { %v698_v7 = vpop.xlane.xlu2 %697 }
 0x7fc   :  { %v700_v8 = vsub.f32 %v690_v0, %v698_v7 }
 0x7fe   :  { %v3139_v9 = vpop.eup %3138  ;;  %v703_v10 = vmul.f32 1.442695, %v700_v8 }
 0x7ff   :  { %v705_v12 = vsel %vm424_vm6, %v3139_v9, 0.0 }
 0x800   :  { %3140 = vpow2.f32 %v703_v10  ;;  %706 = vadd.xlane.f32.xlu2 %v705_v12 }
 0x805   :  { %v554_v14 = vpop.f32.mrf.mxu3 }
 0x806   :  { %v3141_v15 = vpop.eup %3140  ;;  %v575_v18 = vadd.f32 %v574_v54, %v554_v14 }
 0x807   :  { %v708_v16 = vsel %vm424_vm6, %v3141_v15, 0.0 }
 0x808   :  { %709 = vadd.xlane.f32.xlu0 %v708_v16 }
 0x80d   :  { %v3704_v17 = vpop.f32.mrf.mxu3 }
 0x815   :  { %v662_v19 = vpop.f32.mrf.mxu3 }
 0x816   :  { %v3706_v20 = vadd.f32 %v662_v19, %v575_v18 }
 0x818   :  { %833 = vrot.lane.b32.xlu2 %v3675_v24, %s3339_s6 }
 0x81d   :  { %v3710_v21 = vpop.f32.mrf.mxu3 }
 0x825   :  { %v781_v22 = vpop.f32.mrf.mxu3 }
 0x826   :  { %v786_v23 = vsel %vm424_vm6, %v781_v22, -inf }
 0x827   :  { %787 = vmax.xlane.f32.xlu1 %v786_v23 }
 0x82d   :  { %v783_v43 = vpop.f32.mrf.mxu3 }
 0x82e   :  { %v789_v48 = vsel %vm424_vm6, %v783_v43, -inf }
 0x82f   :  { %790 = vmax.xlane.f32.xlu0 %v789_v48 }
 0x840   :  { %935 = vrot.lane.b32.xlu1 %v3675_v24, %s3342_s28 }
 0x843   :  { %831 = vrot.lane.b32.xlu0 %v3658_v60, %s3340_s5 }
 0x84b   :  { %933 = vrot.lane.b32.xlu0 %v3658_v60, %s3341_s27 }
 0x853   :  { %809 = vrot.lane.b32.xlu0 %v3675_v24, %s4390_s2  ;;  %s4414_s2 = smov 40  }
 0x873   :  { %v707_v27 = vpop.xlane.xlu2 %706 }
 0x874   :  { %3142 = vrcp.f32 %v707_v27 }
 0x87a   :  { %v3143_v31 = vpop.eup %3142 }
 0x87b   :  { %v834_v28 = vpop.permute.xlu2 %833  ;;  %v710_v29 = vpop.xlane.xlu0 %709  ;;  %v713_v26 = vmul.f32 %v3143_v31, %v3139_v9  ;;  %v577_v31 = vadd.f32 %v3693_v55, %v3704_v17 }
 0x87c   :  { %v839_v30 = vsel %vm403_vm5, %v834_v28, 0  ;;  %3144 = vrcp.f32 %v710_v29 }
 0x87d   :  { %848 = vmatpush.bf16.xpose.msrb.mxu1 %v839_v30 }
 0x882   :  { %v3145_v32 = vpop.eup %3144 }
 0x883   :  { %v714_v33 = vmul.f32 %v3145_v32, %v3141_v15 }
 0x885   :  { %v715_v34 = vpack.c.bf16 %v714_v33, %v713_v26 }
 0x887   :  { %2882 = vmatmul.msk.bf16.vlgmr.msra.gmra.mxu1 %vm424_vm6, %v715_v34 }
 0x89a   :  { %v788_v25 = vpop.xlane.xlu1 %787 }
 0x89b   :  { %v792_v35 = vsub.f32 %v781_v22, %v788_v25 }
 0x89d   :  { %v794_v36 = vmul.f32 1.442695, %v792_v35 }
 0x89f   :  { %3146 = vpow2.f32 %v794_v36  ;;  %v3759_v36 = vld [vmem:[%s4367_s10] ss:$0 sm:$0xff] }
 0x8a2   :  { %v791_v37 = vpop.xlane.xlu0 %790 }
 0x8a3   :  { %v793_v39 = vsub.f32 %v783_v43, %v791_v37 }
 0x8a5   :  { %v3147_v41 = vpop.eup %3146  ;;  %v796_v44 = vmul.f32 1.442695, %v793_v39 }
 0x8a6   :  { %v798_v42 = vsel %vm424_vm6, %v3147_v41, 0.0 }
 0x8a7   :  { %3148 = vpow2.f32 %v796_v44  ;;  %799 = vadd.xlane.f32.xlu2 %v798_v42 }
 0x8ad   :  { %v3149_v49 = vpop.eup %3148 }
 0x8ae   :  { %v801_v45 = vsel %vm424_vm6, %v3149_v49, 0.0 }
 0x8af   :  { %802 = vadd.xlane.f32.xlu1 %v801_v45 }
 0x8b2   :  { %v936_v46 = vpop.permute.xlu1 %935 }
 0x8b3   :  { %v941_v47 = vsel %vm403_vm5, %v936_v46, 0 }
 0x8b4   :  { %950 = vmatpush.bf16.xpose.msra.mxu1 %v941_v47 }
 0x8b5   :  { %v832_v50 = vpop.permute.xlu0 %831 }
 0x8b6   :  { %2886 = vmatmul.msk.bf16.vlgmr.msrb.gmra.mxu1 %vm403_vm5, %v832_v50 }
 0x8bd   :  { %v934_v54 = vpop.permute.xlu0 %933 }
 0x8c5   :  { %v810_v56 = vpop.permute.xlu0 %809 }
 0x8c6   :  { %822 = vmatpush.bf16.msrb.mxu0 %v810_v56  ;;  %2890 = vmatmul.msk.bf16.vlgmr.msra.gmra.mxu1 %vm403_vm5, %v934_v54 }
 0x8c8   :  { %1022 = vrot.lane.b32.xlu1 %v3675_v24, %s4388_s30  ;;  %s4411_s30 = smov 64  }
 0x8ca   :  { %926 = vmatpush.bf16.msra.mxu0 %v3651_v53 }
 0x904   :  { %v731_v59 = vpop.f32.mrf.mxu1 }
 0x90c   :  { %v733_v61 = vpop.f32.mrf.mxu1 }
 0x90d   :  { %v736_v62 = vpack.c.bf16 %v733_v61, %v731_v59 }
 0x90f   :  { %2883 = vmatmul.msk.bf16.vlgmr.msrb.gmra.mxu2 %vm403_vm5, %v736_v62 }
 0x91a   :  { %v800_v63 = vpop.xlane.xlu2 %799 }
 0x91b   :  { %3150 = vrcp.f32 %v800_v63 }
 0x921   :  { %v3151_v0 = vpop.eup %3150 }
 0x922   :  { %v803_v53 = vpop.xlane.xlu1 %802  ;;  %v806_v2 = vmul.f32 %v3151_v0, %v3147_v41 }
 0x923   :  { %3152 = vrcp.f32 %v803_v53 }
 0x929   :  { %v3153_v1 = vpop.eup %3152 }
 0x92a   :  { %v807_v13 = vmul.f32 %v3153_v1, %v3149_v49 }
 0x92c   :  { %v808_v3 = vpack.c.bf16 %v807_v13, %v806_v2 }
 0x92e   :  { %2885 = vmatmul.msk.bf16.vlgmr.msrb.gmra.mxu0 %vm424_vm6, %v808_v3 }
 0x933   :  { %v850_v4 = vpop.f32.mrf.mxu1 }
 0x934   :  { %v855_v5 = vsel %vm424_vm6, %v850_v4, -inf }
 0x935   :  { %856 = vmax.xlane.f32.xlu0 %v855_v5 }
 0x93a   :  { %v1023_v6 = vpop.permute.xlu1 %1022 }
 0x93b   :  { %v1028_v7 = vsel %vm403_vm5, %v1023_v6, 0  ;;  %v852_v8 = vpop.f32.mrf.mxu1 }
 0x93c   :  { %1037 = vmatpush.bf16.xpose.msrb.mxu0 %v1028_v7  ;;  %v858_v9 = vsel %vm424_vm6, %v852_v8, -inf }
 0x93d   :  { %859 = vmax.xlane.f32.xlu2 %v858_v9 }
 0x943   :  { %v952_v10 = vpop.f32.mrf.mxu1 }
 0x944   :  { %v957_v12 = vsel %vm424_vm6, %v952_v10, -inf }
 0x945   :  { %958 = vmax.xlane.f32.xlu0 %v957_v12 }
 0x94b   :  { %v954_v14 = vpop.f32.mrf.mxu1 }
 0x94c   :  { %v960_v15 = vsel %vm424_vm6, %v954_v14, -inf }
 0x94d   :  { %961 = vmax.xlane.f32.xlu0 %v960_v15 }
 0x955   :  { %1020 = vrot.lane.b32.xlu2 %v3658_v60, %s4386_s24  ;;  %s4412_s24 = smov 72  }
 0x95d   :  { %878 = vrot.lane.b32.xlu2 %v3675_v24, %s3343_s0 }
 0x992   :  { %v752_v16 = vpop.f32.mrf.mxu2 }
 0x993   :  { %v757_v18 = vadd.f32 %v752_v16, %v3706_v20  ;;  %v668_v20 = vadd.f32 %v3710_v21, %v577_v31 }
 0x99a   :  { %v754_v26 = vpop.f32.mrf.mxu2 }
 0x99b   :  { %v758_v33 = vadd.f32 %v754_v26, %v668_v20 }
 0x99d   :  { %v1112_v37 = vadd.f32 %v3759_v36, %v758_v33 }
 0x99f   :  { %v1116_v44 = vadd.f32 %v1112_v37, %v3567_v52  ;;  %v1111_v52 = vadd.f32 %v3759_v36, %v757_v18 }
 0x9a1   :  { %v1124_v46 = vsel %vm84_vm0, %v1116_v44, 0.0  ;;  %v1115_v56 = vadd.f32 %v1111_v52, %v3564_v51 }
 0x9a3   :  { %v1121_v57 = vsel %vm84_vm0, %v1115_v56, 0.0 }
 0x9a8   :  { %v857_v19 = vpop.xlane.xlu0 %856 }
 0x9a9   :  { %v861_v22 = vsub.f32 %v850_v4, %v857_v19 }
 0x9ab   :  { %v863_v23 = vmul.f32 1.442695, %v861_v22  ;;  %v824_v43 = vpop.f32.mrf.mxu0 }
 0x9ad   :  { %3154 = vpow2.f32 %v863_v23 }
 0x9b0   :  { %v860_v48 = vpop.xlane.xlu2 %859 }
 0x9b1   :  { %v862_v27 = vsub.f32 %v852_v8, %v860_v48 }
 0x9b3   :  { %v3155_v28 = vpop.eup %3154  ;;  %v865_v29 = vmul.f32 1.442695, %v862_v27  ;;  %v826_v30 = vpop.f32.mrf.mxu0 }
 0x9b4   :  { %v829_v60 = vpack.c.bf16 %v826_v30, %v824_v43  ;;  %v867_v32 = vsel %vm424_vm6, %v3155_v28, 0.0 }
 0x9b5   :  { %3156 = vpow2.f32 %v865_v29  ;;  %868 = vadd.xlane.f32.xlu0 %v867_v32 }
 0x9b6   :  { %2889 = vmatmul.msk.bf16.vlgmr.msra.gmra.mxu0 %vm403_vm5, %v829_v60 }
 0x9b8   :  { %v1021_v34 = vpop.permute.xlu2 %1020  ;;  %v959_v25 = vpop.xlane.xlu0 %958 }
 0x9b9   :  { %v963_v35 = vsub.f32 %v952_v10, %v959_v25 }
 0x9bb   :  { %v3157_v55 = vpop.eup %3156  ;;  %v965_v17 = vmul.f32 1.442695, %v963_v35 }
 0x9bc   :  { %v870_v39 = vsel %vm424_vm6, %v3157_v55, 0.0 }
 0x9bd   :  { %3158 = vpow2.f32 %v965_v17  ;;  %871 = vadd.xlane.f32.xlu1 %v870_v39 }
 0x9c0   :  { %v879_v21 = vpop.permute.xlu2 %878  ;;  %v962_v41 = vpop.xlane.xlu0 %961 }
 0x9c1   :  { %v964_v42 = vsub.f32 %v954_v14, %v962_v41  ;;  %891 = vmatpush.bf16.msra.mxu2 %v879_v21 }
 0x9c3   :  { %v3159_v49 = vpop.eup %3158  ;;  %v967_v45 = vmul.f32 1.442695, %v964_v42 }
 0x9c4   :  { %v969_v47 = vsel %vm424_vm6, %v3159_v49, 0.0 }
 0x9c5   :  { %3160 = vpow2.f32 %v967_v45  ;;  %1125 = vadd.xlane.f32.xlu1 %v1124_v46  ;;  %970 = vadd.xlane.f32.xlu0 %v969_v47  ;;  %v3038_v46 = vld [vmem:[%s4370_s13] sm:$0xff] }
 0x9c6   :  { %2893 = vmatmul.msk.bf16.vlgmr.msrb.gmra.mxu0 %vm403_vm5, %v1021_v34 }
 0x9cb   :  { %v3161_v50 = vpop.eup %3160 }
 0x9cc   :  { %v972_v54 = vsel %vm424_vm6, %v3161_v50, 0.0 }
 0x9cd   :  { %973 = vadd.xlane.f32.xlu2 %v972_v54 }
 0x9d9   :  { %980 = vrot.lane.b32.xlu0 %v3675_v24, %s4392_s4 }
 0xa03   :  { %1122 = vadd.xlane.f32.xlu0 %v1121_v57 }
 0xa28   :  { %v869_v59 = vpop.xlane.xlu0 %868 }
 0xa29   :  { %3162 = vrcp.f32 %v869_v59 }
 0xa2f   :  { %v3163_v63 = vpop.eup %3162 }
 0xa30   :  { %v872_v61 = vpop.xlane.xlu1 %871  ;;  %v875_v0 = vmul.f32 %v3163_v63, %v3155_v28 }
 0xa31   :  { %3164 = vrcp.f32 %v872_v61 }
 0xa33   :  { %v3773_v62 = vpop.f32.mrf.mxu0 }
 0xa37   :  { %v3165_v53 = vpop.eup %3164 }
 0xa38   :  { %v876_v1 = vmul.f32 %v3165_v53, %v3157_v55  ;;  %v971_v3 = vpop.xlane.xlu0 %970  ;;  %v1126_v6 = vpop.xlane.xlu1 %1125 }
 0xa39   :  { %v1134_v9 = vmul.f32 %v1126_v6, %v3481_v11  ;;  %v3820_v6 = vld [vmem:[%s4369_s12] ss:$0 sm:$0xff] }
 0xa3a   :  { %v877_v2 = vpack.c.bf16 %v876_v1, %v875_v0 }
 0xa3b   :  { %v3775_v13 = vpop.f32.mrf.mxu0  ;;  %v3780_v16 = vsub.f32 %v1116_v44, %v1134_v9 }
 0xa3c   :  { %2887 = vmatmul.msk.bf16.vlgmr.msra.gmra.mxu2 %vm424_vm6, %v877_v2 }
 0xa3d   :  { %v1142_v22 = vmul.f32 %v3780_v16, %v3780_v16 }
 0xa3f   :  { %v1148_v23 = vsel %vm84_vm0, %v1142_v22, 0.0 }
 0xa40   :  { %v974_v51 = vpop.xlane.xlu2 %973 }
 0xa41   :  { %3166 = vrcp.f32 %v974_v51 }
 0xa42   :  { %3168 = vrcp.f32 %v971_v3  ;;  %v3814_v3 = vld [vmem:[%s4368_s11] ss:$0 sm:$0xff] }
 0xa43   :  { %v1039_v4 = vpop.f32.mrf.mxu0 }
 0xa44   :  { %v1044_v5 = vsel %vm424_vm6, %v1039_v4, -inf }
 0xa45   :  { %1045 = vmax.xlane.f32.xlu1 %v1044_v5 }
 0xa47   :  { %v3167_v7 = vpop.eup %3166 }
 0xa48   :  { %v3169_v8 = vpop.eup %3168  ;;  %v978_v10 = vmul.f32 %v3167_v7, %v3161_v50 }
 0xa49   :  { %v977_v12 = vmul.f32 %v3169_v8, %v3159_v49  ;;  %v3039_v49 = vld [vmem:[%s4370_s13 + $0x8] sm:$0xff] }
 0xa4b   :  { %v1041_v14 = vpop.f32.mrf.mxu0  ;;  %v981_v15 = vpop.permute.xlu0 %980  ;;  %v979_v19 = vpack.c.bf16 %v978_v10, %v977_v12 }
 0xa4c   :  { %993 = vmatpush.bf16.msrb.mxu2 %v981_v15  ;;  %v1047_v18 = vsel %vm424_vm6, %v1041_v14, -inf }
 0xa4d   :  { %1048 = vmax.xlane.f32.xlu2 %v1047_v18 }
 0xa4f   :  { %2891 = vmatmul.msk.bf16.vlgmr.msrb.gmra.mxu2 %vm424_vm6, %v979_v19 }
 0xa50   :  { %1098 = vmatpush.bf16.msra.mxu2 %v3736_v58 }
 0xa55   :  { %1149 = vadd.xlane.f32.xlu2 %v1148_v23 }
 0xa76   :  { %v1123_v43 = vpop.xlane.xlu0 %1122 }
 0xa77   :  { %v1133_v48 = vmul.f32 %v1123_v43, %v3481_v11 }
 0xa79   :  { %v3789_v27 = vsub.f32 %v1115_v56, %v1133_v48 }
 0xa7b   :  { %v1141_v28 = vmul.f32 %v3789_v27, %v3789_v27 }
 0xa7d   :  { %v1145_v29 = vsel %vm84_vm0, %v1141_v28, 0.0 }
 0xa7e   :  { %1146 = vadd.xlane.f32.xlu1 %v1145_v29 }
 0xab8   :  { %v1046_v58 = vpop.xlane.xlu1 %1045 }
 0xab9   :  { %v1050_v30 = vsub.f32 %v1039_v4, %v1046_v58 }
 0xabb   :  { %v1052_v31 = vmul.f32 1.442695, %v1050_v30 }
 0xabd   :  { %3170 = vpow2.f32 %v1052_v31 }
 0xabf   :  { %v893_v60 = vpop.f32.mrf.mxu2 }
 0xac0   :  { %v1049_v32 = vpop.xlane.xlu2 %1048 }
 0xac1   :  { %v1051_v26 = vsub.f32 %v1041_v14, %v1049_v32 }
 0xac3   :  { %v3794_v20 = vpop.eup %3170  ;;  %v1054_v33 = vmul.f32 1.442695, %v1051_v26  ;;  %v3043_v26 = vld [vmem:[%s4372_s15 + $0x18] sm:$0xff] }
 0xac4   :  { %v1056_v34 = vsel %vm424_vm6, %v3794_v20, 0.0  ;;  %1355 = vmatpush.bf16.msra.mxu0 %v3043_v26 }
 0xac5   :  { %3172 = vpow2.f32 %v1054_v33  ;;  %1057 = vadd.xlane.f32.xlu1 %v1056_v34  ;;  %v3040_v34 = vld [vmem:[%s4372_s15] sm:$0xff] }
 0xac7   :  { %v895_v25 = vpop.f32.mrf.mxu2 }
 0xac8   :  { %v898_v35 = vpack.c.bf16 %v895_v25, %v893_v60  ;;  %v1150_v39 = vpop.xlane.xlu2 %1149 }
 0xac9   :  { %v1158_v44 = vmul.f32 %v1150_v39, %v3481_v11 }
 0xaca   :  { %2888 = vmatmul.msk.bf16.vlgmr.msrb.gmra.mxu3 %vm403_vm5, %v898_v35 }
 0xacb   :  { %v3173_v55 = vpop.eup %3172  ;;  %v1162_v42 = vadd.f32 1e-05, %v1158_v44  ;;  %1257 = vmatpush.bf16.msrb.mxu3 %v3039_v49 }
 0xacc   :  { %v1059_v17 = vsel %vm424_vm6, %v3173_v55, 0.0 }
 0xacd   :  { %1060 = vadd.xlane.f32.xlu2 %v1059_v17  ;;  %3174 = vrsqrt.f32 %v1162_v42  ;;  %vm1181_vm15 = vweird.f32 %v1162_v42 }
 0xacf   :  { %1258 = vmatpush.bf16.msrb.mxu3 %v3038_v46 }
 0xad2   :  { %v995_v37 = vpop.f32.mrf.mxu2 }
 0xad3   :  { %v3175_v45 = vpop.eup %3174 }
 0xad4   :  { %v1176_v47 = vmul.f32 %v3175_v45, %v1162_v42  ;;  %vm1182_vm14 = vweird.f32 %v3175_v45 }
 0xad5   :  { %vm1183_vm1 = vmor %vm1181_vm15, %vm1182_vm14 }
 0xad6   :  { %v1177_v50 = vmul.f32 %v3175_v45, %v1176_v47 }
 0xada   :  { %v997_v21 = vpop.f32.mrf.mxu2 }
 0xadb   :  { %v1000_v41 = vpack.c.bf16 %v997_v21, %v995_v37 }
 0xadd   :  { %2892 = vmatmul.msk.bf16.vlgmr.msra.gmra.mxu3 %vm403_vm5, %v1000_v41 }
 0xade   :  { %1067 = vrot.lane.b32.xlu1 %v3675_v24, %s4384_s25  ;;  %v1178_v24 = vmul.f32 0.5, %v1177_v50  ;;  %s4413_s25 = smov 104  }
 0xae0   :  { %v1179_v57 = vsub.f32 1.5, %v1178_v24 }
 0xae2   :  { %v1180_v61 = vmul.f32 %v3175_v45, %v1179_v57 }
 0xae4   :  { %v1184_v0 = vsel %vm1183_vm1, %v3175_v45, %v1180_v61 }
 0xae5   :  { %v1206_v51 = vmul.f32 %v1184_v0, %v3780_v16 }
 0xae7   :  { %v1213_v7 = vmul.f32 %v3814_v3, %v1206_v51 }
 0xae9   :  { %v3826_v10 = vadd.f32 %v3820_v6, %v1213_v7 }
 0xaf1   :  { %v1147_v54 = vpop.xlane.xlu1 %1146 }
 0xaf2   :  { %v1157_v52 = vmul.f32 %v1147_v54, %v3481_v11 }
 0xaf4   :  { %v1161_v56 = vadd.f32 1e-05, %v1157_v52 }
 0xaf6   :  { %3176 = vrsqrt.f32 %v1161_v56  ;;  %vm1171_vm3 = vweird.f32 %v1161_v56 }
 0xafc   :  { %v3177_v59 = vpop.eup %3176 }
 0xafd   :  { %v1166_v63 = vmul.f32 %v3177_v59, %v1161_v56  ;;  %vm1172_vm2 = vweird.f32 %v3177_v59 }
 0xafe   :  { %vm1173_vm4 = vmor %vm1171_vm3, %vm1172_vm2 }
 0xaff   :  { %v1167_v53 = vmul.f32 %v3177_v59, %v1166_v63 }
 0xb01   :  { %v1168_v1 = vmul.f32 0.5, %v1167_v53 }
 0xb03   :  { %v1169_v2 = vsub.f32 1.5, %v1168_v1 }
 0xb05   :  { %v1170_v4 = vmul.f32 %v3177_v59, %v1169_v2 }
 0xb07   :  { %v1174_v5 = vsel %vm1173_vm4, %v3177_v59, %v1170_v4  ;;  %v3862_v4 = vld [vmem:[%s4373_s16] ss:$0 sm:$0xff] }
 0xb08   :  { %v1205_v8 = vmul.f32 %v1174_v5, %v3789_v27 }
 0xb0a   :  { %v1212_v9 = vmul.f32 %v3814_v3, %v1205_v8 }
 0xb0c   :  { %v3829_v12 = vadd.f32 %v3820_v6, %v1212_v9 }
 0xb0e   :  { %v1227_v14 = vpack.c.bf16 %v3826_v10, %v3829_v12 }
 0xb10   :  { %2904 = vmatmul.msk.bf16.vlgmr.msrb.gmra.mxu3 %vm84_vm0, %v1227_v14 }
 0xb38   :  { %v1058_v16 = vpop.xlane.xlu1 %1057 }
 0xb40   :  { %v1061_v15 = vpop.xlane.xlu2 %1060 }
 0xb41   :  { %3178 = vrcp.f32 %v1061_v15 }
 0xb42   :  { %3180 = vrcp.f32 %v1058_v16 }
 0xb47   :  { %v3179_v18 = vpop.eup %3178 }
 0xb48   :  { %v3181_v19 = vpop.eup %3180  ;;  %v1065_v22 = vmul.f32 %v3179_v18, %v3173_v55 }
 0xb49   :  { %v1064_v43 = vmul.f32 %v3181_v19, %v3794_v20  ;;  %v3042_v20 = vld [vmem:[%s4372_s15 + $0x10] sm:$0xff] }
 0xb4a   :  { %1356 = vmatpush.bf16.msra.mxu0 %v3042_v20 }
 0xb4b   :  { %v1066_v27 = vpack.c.bf16 %v1065_v22, %v1064_v43 }
 0xb4d   :  { %v911_v23 = vpop.f32.mrf.mxu3 }
 0xb4e   :  { %v929_v29 = vadd.f32 %v3773_v62, %v911_v23  ;;  %v3041_v62 = vld [vmem:[%s4372_s15 + $0x8] sm:$0xff] }
 0xb4f   :  { %1357 = vmatpush.bf16.msra.mxu0 %v3041_v62 }
 0xb50   :  { %v1068_v48 = vpop.permute.xlu1 %1067 }
 0xb51   :  { %1080 = vmatpush.bf16.msrb.mxu1 %v1068_v48 }
 0xb53   :  { %1358 = vmatpush.bf16.msra.mxu0 %v3040_v34 }
 0xb54   :  { %2894 = vmatmul.msk.bf16.vlgmr.msrb.gmra.mxu1 %vm424_vm6, %v1066_v27 }
 0xb55   :  { %v913_v28 = vpop.f32.mrf.mxu3 }
 0xb56   :  { %v931_v31 = vadd.f32 %v3775_v13, %v913_v28  ;;  %v3850_v13 = vld [vmem:[%s4371_s14] ss:$0 sm:$0xff] }
 0xb60   :  { %v1013_v58 = vpop.f32.mrf.mxu3 }
 0xb61   :  { %v1018_v30 = vadd.f32 %v1013_v58, %v929_v29 }
 0xb68   :  { %v1015_v60 = vpop.f32.mrf.mxu3 }
 0xb69   :  { %v1019_v32 = vadd.f32 %v1015_v60, %v931_v31 }
 0xb93   :  { %v1260_v33 = vpop.f32.mrf.mxu3 }
 0xb94   :  { %v1261_v25 = vadd.f32 %v3850_v13, %v1260_v33 }
 0xb96   :  { %v1270_v35 = vmul.f32 %v1261_v25, %v1261_v25 }
 0xb98   :  { %v1274_v55 = vmul.f32 %v1270_v35, %v1261_v25 }
 0xb9a   :  { %v1278_v17 = vmul.f32 0.044715, %v1274_v55 }
 0xb9b   :  { %v1262_v37 = vpop.f32.mrf.mxu3 }
 0xb9c   :  { %v1282_v39 = vadd.f32 %v1278_v17, %v1261_v25  ;;  %v1263_v21 = vadd.f32 %v3850_v13, %v1262_v37 }
 0xb9e   :  { %v1286_v41 = vmul.f32 0.7978846, %v1282_v39  ;;  %v1271_v44 = vmul.f32 %v1263_v21, %v1263_v21 }
 0xba0   :  { %v1275_v42 = vmul.f32 %v1271_v44, %v1263_v21  ;;  %3182 = vtanh.f32 %v1286_v41  ;;  %v3045_v41 = vld [vmem:[%s4407_s7 + $0x18] sm:$0xff] }
 0xba1   :  { %1514 = vmatpush.bf16.msra.mxu1 %v3045_v41 }
 0xba2   :  { %v1279_v49 = vmul.f32 0.044715, %v1275_v42 }
 0xba4   :  { %v1283_v45 = vadd.f32 %v1279_v49, %v1263_v21 }
 0xba6   :  { %v1287_v46 = vmul.f32 0.7978846, %v1283_v45  ;;  %v3183_v47 = vpop.eup %3182 }
 0xba7   :  { %v1294_v50 = vadd.f32 1.0, %v3183_v47 }
 0xba8   :  { %3184 = vtanh.f32 %v1287_v46 }
 0xba9   :  { %v1298_v52 = vmul.f32 0.5, %v1294_v50 }
 0xbab   :  { %v1302_v57 = vmul.f32 %v1298_v52, %v1261_v25 }
 0xbae   :  { %v3185_v54 = vpop.eup %3184 }
 0xbaf   :  { %v1295_v56 = vadd.f32 1.0, %v3185_v54  ;;  %v3044_v54 = vld [vmem:[%s4407_s7 + $0x10] sm:$0xff] }
 0xbb0   :  { %1515 = vmatpush.bf16.msra.mxu1 %v3044_v54 }
 0xbb1   :  { %v1299_v24 = vmul.f32 0.5, %v1295_v56 }
 0xbb3   :  { %v1303_v59 = vmul.f32 %v1299_v24, %v1263_v21 }
 0xbb5   :  { %v1314_v61 = vpack.c.bf16 %v1303_v59, %v1302_v57 }
 0xbb7   :  { %2922 = vmatmul.msk.bf16.vlgmr.msra.gmra.mxu0 %vm1344_vm7, %v1314_v61 }
 0xbd1   :  { %v1082_v63 = vpop.f32.mrf.mxu1 }
 0xbd9   :  { %v1084_v53 = vpop.f32.mrf.mxu1 }
 0xbda   :  { %v1087_v0 = vpack.c.bf16 %v1084_v53, %v1082_v63 }
 0xbdc   :  { %2895 = vmatmul.msk.bf16.vlgmr.msra.gmra.mxu2 %vm403_vm5, %v1087_v0 }
 0xc34   :  { %v1360_v51 = vpop.f32.mrf.mxu0 }
 0xc35   :  { %v1361_v8 = vadd.f32 %v3862_v4, %v1360_v51 }
 0xc37   :  { %v1370_v18 = vadd.f32 %v1361_v8, %v3829_v12 }
 0xc39   :  { %v1376_v43 = vsel %vm84_vm0, %v1370_v18, 0.0 }
 0xc3c   :  { %v1362_v19 = vpop.f32.mrf.mxu0 }
 0xc3d   :  { %v1363_v23 = vadd.f32 %v3862_v4, %v1362_v19 }
 0xc3f   :  { %v1371_v48 = vadd.f32 %v1363_v23, %v3826_v10 }
 0xc41   :  { %v1379_v27 = vsel %vm84_vm0, %v1371_v48, 0.0 }
 0xc5f   :  { %v1100_v1 = vpop.f32.mrf.mxu2 }
 0xc60   :  { %v1105_v2 = vadd.f32 %v1100_v1, %v1018_v30 }
 0xc62   :  { %v1113_v5 = vadd.f32 %v3759_v36, %v1105_v2 }
 0xc64   :  { %v1117_v7 = vadd.f32 %v1113_v5, %v3637_v38 }
 0xc66   :  { %v1127_v9 = vsel %vm84_vm0, %v1117_v7, 0.0 }
 0xc67   :  { %1128 = vadd.xlane.f32.xlu2 %v1127_v9  ;;  %v1102_v14 = vpop.f32.mrf.mxu2 }
 0xc68   :  { %v1106_v15 = vadd.f32 %v1102_v14, %v1019_v32 }
 0xc6a   :  { %v1114_v16 = vadd.f32 %v3759_v36, %v1106_v15 }
 0xc6c   :  { %v1118_v22 = vadd.f32 %v1114_v16, %v3640_v40 }
 0xc6e   :  { %v1130_v38 = vsel %vm84_vm0, %v1118_v22, 0.0 }
 0xc6f   :  { %1377 = vadd.xlane.f32.xlu2 %v1376_v43  ;;  %1131 = vadd.xlane.f32.xlu0 %v1130_v38 }
 0xc77   :  { %1380 = vadd.xlane.f32.xlu0 %v1379_v27 }
 0xcda   :  { %v1129_v28 = vpop.xlane.xlu2 %1128 }
 0xcdb   :  { %v1135_v36 = vmul.f32 %v1129_v28, %v3481_v11 }
 0xcdd   :  { %v3877_v12 = vsub.f32 %v1117_v7, %v1135_v36 }
 0xcdf   :  { %v1143_v40 = vmul.f32 %v3877_v12, %v3877_v12 }
 0xce1   :  { %v1151_v29 = vsel %vm84_vm0, %v1143_v40, 0.0 }
 0xce2   :  { %1152 = vadd.xlane.f32.xlu2 %v1151_v29  ;;  %v1378_v58 = vpop.xlane.xlu2 %1377  ;;  %v1132_v30 = vpop.xlane.xlu0 %1131 }
 0xce3   :  { %v1388_v31 = vmul.f32 %v1378_v58, %v3481_v11  ;;  %v1136_v10 = vmul.f32 %v1132_v30, %v3481_v11  ;;  %v3917_v58 = vld [vmem:[%s4374_s17] ss:$0 sm:$0xff] }
 0xce5   :  { %v3884_v60 = vsub.f32 %v1370_v18, %v1388_v31  ;;  %v3886_v32 = vsub.f32 %v1118_v22, %v1136_v10 }
 0xce7   :  { %v1396_v26 = vmul.f32 %v3884_v60, %v3884_v60  ;;  %v1144_v20 = vmul.f32 %v3886_v32, %v3886_v32 }
 0xce9   :  { %v1400_v62 = vsel %vm84_vm0, %v1396_v26, 0.0  ;;  %v1154_v33 = vsel %vm84_vm0, %v1144_v20, 0.0  ;;  %v3931_v20 = vld [vmem:[%s4375_s18] ss:$0 sm:$0xff] }
 0xcea   :  { %1401 = vadd.xlane.f32.xlu2 %v1400_v62  ;;  %1155 = vadd.xlane.f32.xlu0 %v1154_v33  ;;  %v1381_v34 = vpop.xlane.xlu0 %1380 }
 0xceb   :  { %v1389_v25 = vmul.f32 %v1381_v34, %v3481_v11 }
 0xced   :  { %v3895_v35 = vsub.f32 %v1371_v48, %v1389_v25 }
 0xcef   :  { %v1397_v55 = vmul.f32 %v3895_v35, %v3895_v35 }
 0xcf1   :  { %v1403_v17 = vsel %vm84_vm0, %v1397_v55, 0.0 }
 0xcf2   :  { %1404 = vadd.xlane.f32.xlu1 %v1403_v17 }
 0xd55   :  { %v1153_v37 = vpop.xlane.xlu2 %1152 }
 0xd56   :  { %v1159_v39 = vmul.f32 %v1153_v37, %v3481_v11 }
 0xd58   :  { %v1163_v21 = vadd.f32 1e-05, %v1159_v39  ;;  %v3950_v39 = vld [vmem:[%s4365_s8 + $0x1] ss:$0 sm:$0xff]  ;;  %s4410_s8 = smov 48  }
 0xd5a   :  { %3186 = vrsqrt.f32 %v1163_v21  ;;  %vm1191_vm9 = vweird.f32 %v1163_v21 }
 0xd5d   :  { %v1402_v44 = vpop.xlane.xlu2 %1401  ;;  %v1156_v42 = vpop.xlane.xlu0 %1155 }
 0xd5e   :  { %v1412_v49 = vmul.f32 %v1402_v44, %v3481_v11  ;;  %v1160_v45 = vmul.f32 %v1156_v42, %v3481_v11 }
 0xd60   :  { %v3187_v46 = vpop.eup %3186  ;;  %v1416_v47 = vadd.f32 1e-05, %v1412_v49  ;;  %v1164_v50 = vadd.f32 1e-05, %v1160_v45 }
 0xd61   :  { %v1186_v52 = vmul.f32 %v3187_v46, %v1163_v21  ;;  %vm1192_vm8 = vweird.f32 %v3187_v46 }
 0xd62   :  { %3188 = vrsqrt.f32 %v1416_v47  ;;  %vm1193_vm10 = vmor %vm1191_vm9, %vm1192_vm8  ;;  %vm1201_vm14 = vweird.f32 %v1164_v50  ;;  %vm1426_vm15 = vweird.f32 %v1416_v47 }
 0xd63   :  { %v1187_v56 = vmul.f32 %v3187_v46, %v1186_v52  ;;  %3190 = vrsqrt.f32 %v1164_v50 }
 0xd65   :  { %v1188_v24 = vmul.f32 0.5, %v1187_v56  ;;  %v1405_v57 = vpop.xlane.xlu1 %1404 }
 0xd66   :  { %v1413_v59 = vmul.f32 %v1405_v57, %v3481_v11 }
 0xd67   :  { %v1189_v61 = vsub.f32 1.5, %v1188_v24 }
 0xd68   :  { %v3189_v63 = vpop.eup %3188  ;;  %v1417_v53 = vadd.f32 1e-05, %v1413_v59 }
 0xd69   :  { %v3191_v0 = vpop.eup %3190  ;;  %v1421_v1 = vmul.f32 %v3189_v63, %v1416_v47  ;;  %v1190_v2 = vmul.f32 %v3187_v46, %v1189_v61  ;;  %vm1427_vm12 = vweird.f32 %v3189_v63 }
 0xd6a   :  { %v1196_v51 = vmul.f32 %v3191_v0, %v1164_v50  ;;  %3192 = vrsqrt.f32 %v1417_v53  ;;  %vm1202_vm11 = vweird.f32 %v3191_v0  ;;  %vm1428_vm2 = vmor %vm1426_vm15, %vm1427_vm12  ;;  %vm1436_vm4 = vweird.f32 %v1417_v53 }
 0xd6b   :  { %v1422_v5 = vmul.f32 %v3189_v63, %v1421_v1  ;;  %v1194_v9 = vsel %vm1193_vm10, %v3187_v46, %v1190_v2  ;;  %vm1203_vm1 = vmor %vm1201_vm14, %vm1202_vm11 }
 0xd6c   :  { %v1197_v7 = vmul.f32 %v3191_v0, %v1196_v51  ;;  %v1207_v19 = vmul.f32 %v1194_v9, %v3877_v12 }
 0xd6d   :  { %v1423_v8 = vmul.f32 0.5, %v1422_v5 }
 0xd6e   :  { %v1198_v14 = vmul.f32 0.5, %v1197_v7  ;;  %v1214_v40 = vmul.f32 %v3814_v3, %v1207_v19 }
 0xd6f   :  { %v1424_v15 = vsub.f32 1.5, %v1423_v8 }
 0xd70   :  { %v3193_v16 = vpop.eup %3192  ;;  %v1199_v18 = vsub.f32 1.5, %v1198_v14  ;;  %v3921_v10 = vadd.f32 %v3820_v6, %v1214_v40 }
 0xd71   :  { %v1425_v22 = vmul.f32 %v3189_v63, %v1424_v15  ;;  %v1431_v23 = vmul.f32 %v3193_v16, %v1417_v53  ;;  %vm1437_vm3 = vweird.f32 %v3193_v16 }
 0xd72   :  { %v1200_v43 = vmul.f32 %v3191_v0, %v1199_v18  ;;  %vm1438_vm8 = vmor %vm1436_vm4, %vm1437_vm3 }
 0xd73   :  { %v1432_v38 = vmul.f32 %v3193_v16, %v1431_v23  ;;  %v1429_v27 = vsel %vm1428_vm2, %v3189_v63, %v1425_v22 }
 0xd74   :  { %v1204_v48 = vsel %vm1203_vm1, %v3191_v0, %v1200_v43  ;;  %v1460_v30 = vmul.f32 %v1429_v27, %v3884_v60 }
 0xd75   :  { %v1208_v28 = vmul.f32 %v1204_v48, %v3886_v32  ;;  %v1433_v36 = vmul.f32 0.5, %v1432_v38 }
 0xd76   :  { %v1467_v60 = vmul.f32 %v3917_v58, %v1460_v30 }
 0xd77   :  { %v1434_v29 = vsub.f32 1.5, %v1433_v36  ;;  %v1215_v12 = vmul.f32 %v3814_v3, %v1208_v28 }
 0xd79   :  { %v1435_v31 = vmul.f32 %v3193_v16, %v1434_v29  ;;  %v3924_v32 = vadd.f32 %v3820_v6, %v1215_v12  ;;  %v3938_v6 = vadd.f32 %v3931_v20, %v1467_v60 }
 0xd7b   :  { %v1439_v26 = vsel %vm1438_vm8, %v3193_v16, %v1435_v31  ;;  %v1228_v3 = vpack.c.bf16 %v3924_v32, %v3921_v10 }
 0xd7c   :  { %v1461_v62 = vmul.f32 %v1439_v26, %v3895_v35 }
 0xd7d   :  { %2905 = vmatmul.msk.bf16.gmra.mxu3 %vm84_vm0, %v1228_v3 }
 0xd7e   :  { %v1468_v33 = vmul.f32 %v3917_v58, %v1461_v62 }
 0xd80   :  { %v3941_v34 = vadd.f32 %v3931_v20, %v1468_v33 }
 0xd82   :  { %v1483_v25 = vpack.c.bf16 %v3941_v34, %v3938_v6 }
 0xd84   :  { %2937 = vmatmul.msk.bf16.vlgmr.msra.gmra.mxu1 %vm84_vm0, %v1483_v25 }
 0xe00   :  { %v1265_v55 = vpop.f32.mrf.mxu3 }
 0xe01   :  { %v1266_v17 = vadd.f32 %v3850_v13, %v1265_v55  ;;  %v1517_v37 = vpop.f32.mrf.mxu1 }
 0xe02   :  { %v1518_v44 = vadd.f32 %v3950_v39, %v1517_v37 }
 0xe03   :  { %v1272_v35 = vmul.f32 %v1266_v17, %v1266_v17 }
 0xe04   :  { %v1532_v52 = vmul.f32 0.35355338, %v1518_v44 }
 0xe05   :  { %v1276_v21 = vmul.f32 %v1272_v35, %v1266_v17 }
 0xe07   :  { %v1280_v41 = vmul.f32 0.044715, %v1276_v21 }
 0xe08   :  { %v1267_v42 = vpop.f32.mrf.mxu3 }
 0xe09   :  { %v1284_v49 = vadd.f32 %v1280_v41, %v1266_v17  ;;  %v1268_v45 = vadd.f32 %v3850_v13, %v1267_v42  ;;  %v1519_v46 = vpop.f32.mrf.mxu1 }
 0xe0a   :  { %v1520_v47 = vadd.f32 %v3950_v39, %v1519_v46 }
 0xe0b   :  { %v1288_v50 = vmul.f32 0.7978846, %v1284_v49  ;;  %v1273_v54 = vmul.f32 %v1268_v45, %v1268_v45 }
 0xe0c   :  { %v1533_v56 = vmul.f32 0.35355338, %v1520_v47  ;;  %v3955_v24 = vpack.c.bf16 %v1520_v47, %v1518_v44 }
 0xe0d   :  { %v1277_v57 = vmul.f32 %v1273_v54, %v1268_v45  ;;  %3194 = vtanh.f32 %v1288_v50 }
 0xe0e   :  { %v3957_v59 = vpack.c.bf16 %v1533_v56, %v1532_v52  ;;  %1606 = vrot.lane.b32.xlu0 %v3955_v24, %s3339_s6 }
 0xe0f   :  { %v1281_v61 = vmul.f32 0.044715, %v1277_v57 }
 0xe10   :  { %1604 = vrot.lane.b32.xlu2 %v3957_v59, %s3340_s5 }
 0xe11   :  { %v1285_v13 = vadd.f32 %v1281_v61, %v1268_v45 }
 0xe13   :  { %v1289_v63 = vmul.f32 0.7978846, %v1285_v13  ;;  %v3195_v53 = vpop.eup %3194 }
 0xe14   :  { %v1296_v0 = vadd.f32 1.0, %v3195_v53 }
 0xe15   :  { %3196 = vtanh.f32 %v1289_v63 }
 0xe16   :  { %1714 = vrot.lane.b32.xlu0 %v3955_v24, %s3342_s28  ;;  %v1300_v51 = vmul.f32 0.5, %v1296_v0 }
 0xe18   :  { %1537 = vrot.lane.b32.xlu2 %v3955_v24, %s3337_s22  ;;  %v1304_v7 = vmul.f32 %v1300_v51, %v1266_v17 }
 0xe1b   :  { %v3197_v1 = vpop.eup %3196 }
 0xe1c   :  { %v1297_v2 = vadd.f32 1.0, %v3197_v1 }
 0xe1e   :  { %1712 = vrot.lane.b32.xlu0 %v3957_v59, %s3341_s27  ;;  %v1301_v5 = vmul.f32 0.5, %v1297_v2 }
 0xe20   :  { %v1305_v8 = vmul.f32 %v1301_v5, %v1268_v45 }
 0xe22   :  { %v1315_v9 = vpack.c.bf16 %v1305_v8, %v1304_v7 }
 0xe24   :  { %2923 = vmatmul.msk.bf16.gmra.mxu0 %vm1344_vm7, %v1315_v9 }
 0xe6a   :  { %v1605_v14 = vpop.permute.xlu2 %1604 }
 0xe72   :  { %v1538_v15 = vpop.permute.xlu2 %1537 }
 0xe73   :  { %v1543_v16 = vsel %vm403_vm5, %v1538_v15, 0 }
 0xe74   :  { %1552 = vmatpush.bf16.xpose.msrb.mxu2 %v1543_v16 }
 0xe7b   :  { %2943 = vmatmul.msk.bf16.vlgmr.msrb.gmra.mxu2 %vm403_vm5, %v3957_v59 }
 0xe80   :  { %v1607_v18 = vpop.permute.xlu0 %1606 }
 0xe81   :  { %v1612_v19 = vsel %vm403_vm5, %v1607_v18, 0 }
 0xe82   :  { %1621 = vmatpush.bf16.xpose.msra.mxu3 %v1612_v19 }
 0xe88   :  { %v1715_v22 = vpop.permute.xlu0 %1714 }
 0xe89   :  { %v1720_v23 = vsel %vm403_vm5, %v1715_v22, 0  ;;  %2945 = vmatmul.msk.bf16.vlgmr.msra.gmra.mxu3 %vm403_vm5, %v1605_v14 }
 0xe8a   :  { %1729 = vmatpush.bf16.xpose.msrb.mxu3 %v1720_v23 }
 0xe90   :  { %v1713_v43 = vpop.permute.xlu0 %1712 }
 0xe99   :  { %2949 = vmatmul.msk.bf16.vlgmr.msrb.gmra.mxu3 %vm403_vm5, %v1713_v43 }
 0xea1   :  { %v1365_v38 = vpop.f32.mrf.mxu0 }
 0xea2   :  { %v1366_v48 = vadd.f32 %v3862_v4, %v1365_v38 }
 0xea4   :  { %v1372_v27 = vadd.f32 %v1366_v48, %v3921_v10 }
 0xea6   :  { %v1382_v28 = vsel %vm84_vm0, %v1372_v27, 0.0 }
 0xea7   :  { %1383 = vadd.xlane.f32.xlu0 %v1382_v28 }
 0xea9   :  { %v1367_v36 = vpop.f32.mrf.mxu0 }
 0xeaa   :  { %v1368_v40 = vadd.f32 %v3862_v4, %v1367_v36 }
 0xeac   :  { %v1373_v29 = vadd.f32 %v1368_v40, %v3924_v32 }
 0xeae   :  { %v1385_v12 = vsel %vm84_vm0, %v1373_v29, 0.0 }
 0xeaf   :  { %1386 = vadd.xlane.f32.xlu2 %v1385_v12 }
 0xefe   :  { %v1554_v38 = vpop.f32.mrf.mxu2 }
 0xeff   :  { %v1559_v12 = vsel %vm424_vm6, %v1554_v38, -inf }
 0xf0c   :  { %v1623_v30 = vpop.f32.mrf.mxu3 }
 0xf0d   :  { %v1628_v31 = vsel %vm424_vm6, %v1623_v30, -inf }
 0xf0e   :  { %1629 = vmax.xlane.f32.xlu1 %v1628_v31 }
 0xf14   :  { %v1625_v26 = vpop.f32.mrf.mxu3 }
 0xf15   :  { %v1631_v3 = vsel %vm424_vm6, %v1625_v26, -inf }
 0xf16   :  { %1632 = vmax.xlane.f32.xlu1 %v1631_v3 }
 0xf1a   :  { %v1384_v10 = vpop.xlane.xlu0 %1383 }
 0xf1b   :  { %v1390_v60 = vmul.f32 %v1384_v10, %v3481_v11 }
 0xf1c   :  { %v1731_v62 = vpop.f32.mrf.mxu3 }
 0xf1d   :  { %v3986_v33 = vsub.f32 %v1372_v27, %v1390_v60  ;;  %v1736_v44 = vsel %vm424_vm6, %v1731_v62, -inf  ;;  %v1556_v60 = vpop.f32.mrf.mxu2 }
 0xf1f   :  { %v1398_v4 = vmul.f32 %v3986_v33, %v3986_v33 }
 0xf21   :  { %v1406_v32 = vsel %vm84_vm0, %v1398_v4, 0.0 }
 0xf22   :  { %v1387_v25 = vpop.xlane.xlu2 %1386  ;;  %1407 = vadd.xlane.f32.xlu1 %v1406_v32 }
 0xf23   :  { %v1391_v55 = vmul.f32 %v1387_v25, %v3481_v11  ;;  %v1562_v25 = vsel %vm424_vm6, %v1556_v60, -inf }
 0xf24   :  { %v1733_v17 = vpop.f32.mrf.mxu3 }
 0xf25   :  { %v3992_v37 = vsub.f32 %v1373_v29, %v1391_v55  ;;  %v1739_v35 = vsel %vm424_vm6, %v1733_v17, -inf }
 0xf26   :  { %1740 = vmax.xlane.f32.xlu2 %v1739_v35 }
 0xf27   :  { %v1399_v21 = vmul.f32 %v3992_v37, %v3992_v37 }
 0xf29   :  { %v1409_v41 = vsel %vm84_vm0, %v1399_v21, 0.0 }
 0xf2a   :  { %1410 = vadd.xlane.f32.xlu1 %v1409_v41 }
 0xf32   :  { %1737 = vmax.xlane.f32.xlu1 %v1736_v44 }
 0xf3e   :  { %1651 = vrot.lane.b32.xlu2 %v3955_v24, %s3343_s0 }
 0xf81   :  { %v1630_v42 = vpop.xlane.xlu1 %1629 }
 0xf82   :  { %v1634_v49 = vsub.f32 %v1623_v30, %v1630_v42 }
 0xf84   :  { %v1636_v45 = vmul.f32 1.442695, %v1634_v49 }
 0xf86   :  { %3198 = vpow2.f32 %v1636_v45 }
 0xf89   :  { %v1633_v46 = vpop.xlane.xlu1 %1632 }
 0xf8a   :  { %v1635_v47 = vsub.f32 %v1625_v26, %v1633_v46 }
 0xf8c   :  { %v4001_v50 = vpop.eup %3198  ;;  %v1638_v54 = vmul.f32 1.442695, %v1635_v47 }
 0xf8d   :  { %v1640_v52 = vsel %vm424_vm6, %v4001_v50, 0.0 }
 0xf8e   :  { %3200 = vpow2.f32 %v1638_v54  ;;  %1641 = vadd.xlane.f32.xlu0 %v1640_v52 }
 0xf94   :  { %v4005_v56 = vpop.eup %3200 }
 0xf95   :  { %v1408_v57 = vpop.xlane.xlu1 %1407  ;;  %v1643_v61 = vsel %vm424_vm6, %v4005_v56, 0.0 }
 0xf96   :  { %v1414_v13 = vmul.f32 %v1408_v57, %v3481_v11  ;;  %1644 = vadd.xlane.f32.xlu1 %v1643_v61 }
 0xf98   :  { %v1418_v63 = vadd.f32 1e-05, %v1414_v13 }
 0xf99   :  { %v1741_v53 = vpop.xlane.xlu2 %1740 }
 0xf9a   :  { %3202 = vrsqrt.f32 %v1418_v63  ;;  %v1743_v0 = vsub.f32 %v1733_v17, %v1741_v53  ;;  %vm1446_vm10 = vweird.f32 %v1418_v63 }
 0xf9c   :  { %v1746_v1 = vmul.f32 1.442695, %v1743_v0 }
 0xf9d   :  { %v1411_v2 = vpop.xlane.xlu1 %1410 }
 0xf9e   :  { %3204 = vpow2.f32 %v1746_v1  ;;  %v1415_v51 = vmul.f32 %v1411_v2, %v3481_v11 }
 0xfa0   :  { %v3203_v5 = vpop.eup %3202  ;;  %v1419_v7 = vadd.f32 1e-05, %v1415_v51 }
 0xfa1   :  { %v1441_v8 = vmul.f32 %v3203_v5, %v1418_v63  ;;  %v1652_v9 = vpop.permute.xlu2 %1651  ;;  %vm1447_vm9 = vweird.f32 %v3203_v5 }
 0xfa2   :  { %3206 = vrsqrt.f32 %v1419_v7  ;;  %1664 = vmatpush.bf16.msrb.mxu0 %v1652_v9  ;;  %vm1448_vm11 = vmor %vm1446_vm10, %vm1447_vm9  ;;  %vm1456_vm14 = vweird.f32 %v1419_v7 }
 0xfa3   :  { %v1442_v14 = vmul.f32 %v3203_v5, %v1441_v8 }
 0xfa4   :  { %v4011_v15 = vpop.eup %3204 }
 0xfa5   :  { %v1443_v16 = vmul.f32 0.5, %v1442_v14  ;;  %v1738_v18 = vpop.xlane.xlu1 %1737  ;;  %v1751_v19 = vsel %vm424_vm6, %v4011_v15, 0.0 }
 0xfa6   :  { %v1742_v22 = vsub.f32 %v1731_v62, %v1738_v18  ;;  %1752 = vadd.xlane.f32.xlu1 %v1751_v19 }
 0xfa7   :  { %v1444_v23 = vsub.f32 1.5, %v1443_v16 }
 0xfa8   :  { %v3207_v43 = vpop.eup %3206  ;;  %v1744_v48 = vmul.f32 1.442695, %v1742_v22 }
 0xfa9   :  { %v1445_v27 = vmul.f32 %v3203_v5, %v1444_v23  ;;  %v1451_v28 = vmul.f32 %v3207_v43, %v1419_v7  ;;  %vm1457_vm12 = vweird.f32 %v3207_v43 }
 0xfaa   :  { %3208 = vpow2.f32 %v1744_v48  ;;  %vm1458_vm15 = vmor %vm1456_vm14, %vm1457_vm12 }
 0xfab   :  { %v1452_v36 = vmul.f32 %v3207_v43, %v1451_v28  ;;  %v1449_v40 = vsel %vm1448_vm11, %v3203_v5, %v1445_v27  ;;  %v2941_v28 = vld [vmem:[%s4366_s9 + $0x18] sm:$0xf] }
 0xfac   :  { %v1462_v26 = vmul.f32 %v1449_v40, %v3986_v33 }
 0xfad   :  { %v1453_v29 = vmul.f32 0.5, %v1452_v36  ;;  %v1784_v36 = vsel %vm541_vm13, %v2941_v28, 0 }
 0xfae   :  { %1560 = vmax.xlane.f32.xlu1 %v1559_v12  ;;  %v1469_v32 = vmul.f32 %v3917_v58, %v1462_v26 }
 0xfaf   :  { %v1454_v30 = vsub.f32 1.5, %v1453_v29 }
 0xfb0   :  { %v3209_v31 = vpop.eup %3208  ;;  %v4023_v17 = vadd.f32 %v3931_v20, %v1469_v32 }
 0xfb1   :  { %v1455_v3 = vmul.f32 %v3207_v43, %v1454_v30  ;;  %v1748_v10 = vsel %vm424_vm6, %v3209_v31, 0.0 }
 0xfb2   :  { %1749 = vadd.xlane.f32.xlu0 %v1748_v10 }
 0xfb3   :  { %v1459_v62 = vsel %vm1458_vm15, %v3207_v43, %v1455_v3 }
 0xfb4   :  { %v1463_v4 = vmul.f32 %v1459_v62, %v3992_v37 }
 0xfb6   :  { %1563 = vmax.xlane.f32.xlu1 %v1562_v25  ;;  %v1470_v55 = vmul.f32 %v3917_v58, %v1463_v4 }
 0xfb8   :  { %v4026_v33 = vadd.f32 %v3931_v20, %v1470_v55 }
 0xfba   :  { %v1484_v35 = vpack.c.bf16 %v4026_v33, %v4023_v17 }
 0xfbc   :  { %2938 = vmatmul.msk.bf16.gmra.mxu1 %vm84_vm0, %v1484_v35 }
 0xfc6   :  { %1759 = vrot.lane.b32.xlu0 %v3955_v24, %s4410_s8 }
 0xfce   :  { %1582 = vrot.lane.b32.xlu0 %v3955_v24, %s4411_s30 }
 0xfd6   :  { %1804 = vrot.lane.b32.xlu0 %v3955_v24, %s4412_s24 }
 0xfde   :  { %1802 = vrot.lane.b32.xlu0 %v3957_v59, %s4413_s25 }
0x1001   :  { %v1642_v58 = vpop.xlane.xlu0 %1641 }
0x1002   :  { %3210 = vrcp.f32 %v1642_v58 }
0x1008   :  { %v3211_v37 = vpop.eup %3210 }
0x1009   :  { %v1645_v20 = vpop.xlane.xlu1 %1644  ;;  %v1648_v41 = vmul.f32 %v3211_v37, %v4001_v50 }
0x100a   :  { %3212 = vrcp.f32 %v1645_v20 }
0x1010   :  { %v3213_v21 = vpop.eup %3212 }
0x1011   :  { %v1649_v44 = vmul.f32 %v3213_v21, %v4005_v56 }
0x1013   :  { %v1650_v42 = vpack.c.bf16 %v1649_v44, %v1648_v41 }
0x1015   :  { %2946 = vmatmul.msk.bf16.vlgmr.msrb.gmra.mxu0 %vm424_vm6, %v1650_v42 }
0x1019   :  { %v1753_v49 = vpop.xlane.xlu1 %1752 }
0x1021   :  { %v1561_v45 = vpop.xlane.xlu1 %1560 }
0x1022   :  { %v1565_v46 = vsub.f32 %v1554_v38, %v1561_v45 }
0x1024   :  { %v1567_v47 = vmul.f32 1.442695, %v1565_v46 }
0x1025   :  { %v1750_v59 = vpop.xlane.xlu0 %1749 }
0x1026   :  { %3214 = vpow2.f32 %v1567_v47 }
0x1027   :  { %3216 = vrcp.f32 %v1750_v59 }
0x1029   :  { %v1564_v54 = vpop.xlane.xlu1 %1563 }
0x102a   :  { %v1566_v52 = vsub.f32 %v1556_v60, %v1564_v54 }
0x102c   :  { %v3215_v57 = vpop.eup %3214  ;;  %v1569_v61 = vmul.f32 1.442695, %v1566_v52 }
0x102d   :  { %v1571_v13 = vsel %vm424_vm6, %v3215_v57, 0.0  ;;  %v3217_v50 = vpop.eup %3216 }
0x102e   :  { %3218 = vpow2.f32 %v1569_v61  ;;  %1572 = vadd.xlane.f32.xlu2 %v1571_v13  ;;  %v1756_v0 = vmul.f32 %v3217_v50, %v3209_v31 }
0x102f   :  { %3220 = vrcp.f32 %v1753_v49 }
0x1034   :  { %v3219_v56 = vpop.eup %3218 }
0x1035   :  { %v3221_v63 = vpop.eup %3220  ;;  %v1574_v53 = vsel %vm424_vm6, %v3219_v56, 0.0 }
0x1036   :  { %1575 = vadd.xlane.f32.xlu1 %v1574_v53  ;;  %v1757_v1 = vmul.f32 %v3221_v63, %v4011_v15  ;;  %v2940_v15 = vld [vmem:[%s4366_s9 + $0x14] sm:$0xf] }
0x1037   :  { %v1676_v23 = vsel %vm541_vm13, %v2940_v15, 0 }
0x1038   :  { %v1760_v2 = vpop.permute.xlu0 %1759  ;;  %v1758_v5 = vpack.c.bf16 %v1757_v1, %v1756_v0  ;;  %1685 = vmatpush.bf16.msrb.mxu1 %v1676_v23 }
0x1039   :  { %v1522_v51 = vpop.f32.mrf.mxu1  ;;  %1772 = vmatpush.bf16.msra.mxu0 %v1760_v2 }
0x103a   :  { %v1523_v7 = vadd.f32 %v3950_v39, %v1522_v51 }
0x103c   :  { %2950 = vmatmul.msk.bf16.vlgmr.msra.gmra.mxu0 %vm424_vm6, %v1758_v5  ;;  %v1892_v16 = vmul.f32 0.35355338, %v1523_v7  ;;  %1793 = vmatpush.bf16.msra.mxu1 %v1784_v36 }
0x1040   :  { %v1583_v8 = vpop.permute.xlu0 %1582 }
0x1041   :  { %v1524_v9 = vpop.f32.mrf.mxu1  ;;  %1595 = vmatpush.bf16.msra.mxu2 %v1583_v8 }
0x1042   :  { %v1525_v14 = vadd.f32 %v3950_v39, %v1524_v9  ;;  %v2939_v39 = vld [vmem:[%s4366_s9 + $0x10] sm:$0xf] }
0x1043   :  { %v4062_v38 = vsel %vm541_vm13, %v2939_v39, 0 }
0x1044   :  { %v1893_v18 = vmul.f32 0.35355338, %v1525_v14  ;;  %v4050_v22 = vpack.c.bf16 %v1525_v14, %v1523_v7 }
0x1045   :  { %1705 = vmatpush.bf16.msrb.mxu2 %v4062_v38 }
0x1046   :  { %v4048_v19 = vpack.c.bf16 %v1893_v18, %v1892_v16 }
0x1048   :  { %v1805_v3 = vpop.permute.xlu0 %1804 }
0x1049   :  { %v1810_v60 = vsel %vm403_vm5, %v1805_v3, 0 }
0x104f   :  { %1897 = vrot.lane.b32.xlu1 %v4050_v22, %s3337_s22 }
0x1050   :  { %v1803_v49 = vpop.permute.xlu0 %1802 }
0x1092   :  { %v1666_v43 = vpop.f32.mrf.mxu0 }
0x109a   :  { %v1668_v48 = vpop.f32.mrf.mxu0 }
0x109b   :  { %v1671_v27 = vpack.c.bf16 %v1668_v48, %v1666_v43 }
0x109d   :  { %2947 = vmatmul.msk.bf16.vlgmr.msrb.gmra.mxu1 %vm403_vm5, %v1671_v27 }
0x10a1   :  { %v1573_v40 = vpop.xlane.xlu2 %1572 }
0x10a2   :  { %3222 = vrcp.f32 %v1573_v40 }
0x10a8   :  { %v3223_v12 = vpop.eup %3222 }
0x10a9   :  { %v1576_v29 = vpop.xlane.xlu1 %1575  ;;  %v1579_v31 = vmul.f32 %v3223_v12, %v3215_v57 }
0x10aa   :  { %3224 = vrcp.f32 %v1576_v29 }
0x10b0   :  { %v3225_v30 = vpop.eup %3224 }
0x10b1   :  { %v1580_v26 = vmul.f32 %v3225_v30, %v3219_v56 }
0x10b3   :  { %v1581_v10 = vpack.c.bf16 %v1580_v26, %v1579_v31 }
0x10b5   :  { %2944 = vmatmul.msk.bf16.vlgmr.msra.gmra.mxu2 %vm424_vm6, %v1581_v10 }
0x10b6   :  { %1819 = vmatpush.bf16.xpose.msra.mxu2 %v1810_v60 }
0x10b9   :  { %v1774_v62 = vpop.f32.mrf.mxu0 }
0x10c1   :  { %v1776_v4 = vpop.f32.mrf.mxu0  ;;  %v1898_v32 = vpop.permute.xlu1 %1897 }
0x10c2   :  { %v1779_v25 = vpack.c.bf16 %v1776_v4, %v1774_v62  ;;  %v1903_v55 = vsel %vm403_vm5, %v1898_v32, 0 }
0x10c3   :  { %1912 = vmatpush.bf16.xpose.msrb.mxu1 %v1903_v55 }
0x10c4   :  { %2951 = vmatmul.msk.bf16.vlgmr.msra.gmra.mxu1 %vm403_vm5, %v1779_v25 }
0x10cb   :  { %2042 = vmatpush.bf16.msra.mxu1 %v1676_v23 }
0x10d4   :  { %2955 = vmatmul.msk.bf16.vlgmr.msrb.gmra.mxu1 %vm403_vm5, %v4048_v19 }
0x10d5   :  { %2144 = vmatpush.bf16.msrb.mxu1 %v1784_v36 }
0x111a   :  { %v4076_v35 = vpop.f32.mrf.mxu1 }
0x1122   :  { %v4078_v20 = vpop.f32.mrf.mxu1 }
0x1138   :  { %v1597_v58 = vpop.f32.mrf.mxu2 }
0x1140   :  { %v1599_v37 = vpop.f32.mrf.mxu2 }
0x1141   :  { %v1602_v21 = vpack.c.bf16 %v1599_v37, %v1597_v58  ;;  %v4080_v41 = vpop.f32.mrf.mxu1 }
0x1143   :  { %2948 = vmatmul.msk.bf16.vlgmr.msrb.gmra.mxu2 %vm403_vm5, %v1602_v21 }
0x1149   :  { %v4083_v44 = vpop.f32.mrf.mxu1 }
0x1151   :  { %v1914_v42 = vpop.f32.mrf.mxu1 }
0x1152   :  { %v1919_v45 = vsel %vm424_vm6, %v1914_v42, -inf }
0x1153   :  { %1920 = vmax.xlane.f32.xlu0 %v1919_v45  ;;  %2952 = vmatmul.msk.bf16.vlgmr.msra.gmra.mxu2 %vm403_vm5, %v1803_v49 }
0x1159   :  { %v1916_v46 = vpop.f32.mrf.mxu1 }
0x115a   :  { %v1922_v47 = vsel %vm424_vm6, %v1916_v46, -inf }
0x115b   :  { %1923 = vmax.xlane.f32.xlu1 %v1922_v47 }
0x11c6   :  { %v1921_v54 = vpop.xlane.xlu0 %1920  ;;  %v4088_v59 = vpop.f32.mrf.mxu2 }
0x11c7   :  { %v1925_v52 = vsub.f32 %v1914_v42, %v1921_v54  ;;  %v2942_v54 = vld [vmem:[%s4366_s9 + $0x1c] sm:$0xf] }
0x11c9   :  { %v1927_v57 = vmul.f32 1.442695, %v1925_v52  ;;  %v4128_v52 = vsel %vm541_vm13, %v2942_v54, 0 }
0x11ca   :  { %1883 = vmatpush.bf16.msrb.mxu0 %v4128_v52 }
0x11cb   :  { %3226 = vpow2.f32 %v1927_v57 }
0x11ce   :  { %v1924_v61 = vpop.xlane.xlu1 %1923  ;;  %v4090_v13 = vpop.f32.mrf.mxu2 }
0x11cf   :  { %v1926_v50 = vsub.f32 %v1916_v46, %v1924_v61 }
0x11d1   :  { %v3227_v56 = vpop.eup %3226  ;;  %v1929_v63 = vmul.f32 1.442695, %v1926_v50 }
0x11d2   :  { %v1931_v53 = vsel %vm424_vm6, %v3227_v56, 0.0 }
0x11d3   :  { %3228 = vpow2.f32 %v1929_v63  ;;  %1932 = vadd.xlane.f32.xlu2 %v1931_v53 }
0x11d6   :  { %v1821_v0 = vpop.f32.mrf.mxu2 }
0x11d7   :  { %v1826_v1 = vsel %vm424_vm6, %v1821_v0, -inf }
0x11d8   :  { %1827 = vmax.xlane.f32.xlu0 %v1826_v1 }
0x11d9   :  { %v3229_v2 = vpop.eup %3228 }
0x11da   :  { %v1934_v51 = vsel %vm424_vm6, %v3229_v2, 0.0 }
0x11db   :  { %1935 = vadd.xlane.f32.xlu2 %v1934_v51 }
0x11de   :  { %v1823_v5 = vpop.f32.mrf.mxu2 }
0x11df   :  { %v1829_v7 = vsel %vm424_vm6, %v1823_v5, -inf }
0x11e0   :  { %1830 = vmax.xlane.f32.xlu1 %v1829_v7 }
0x11f3   :  { %1942 = vrot.lane.b32.xlu2 %v4050_v22, %s4411_s30 }
0x11f9   :  { %1849 = vrot.lane.b32.xlu1 %v3955_v24, %s4414_s2 }
0x1201   :  { %2155 = vrot.lane.b32.xlu1 %v4050_v22, %s4412_s24 }
0x1209   :  { %2153 = vrot.lane.b32.xlu1 %v4048_v19, %s4413_s25 }
0x1246   :  { %v1933_v8 = vpop.xlane.xlu2 %1932 }
0x1247   :  { %3230 = vrcp.f32 %v1933_v8 }
0x124b   :  { %v1828_v9 = vpop.xlane.xlu0 %1827 }
0x124c   :  { %v1832_v14 = vsub.f32 %v1821_v0, %v1828_v9 }
0x124d   :  { %v3231_v15 = vpop.eup %3230 }
0x124e   :  { %v1834_v16 = vmul.f32 1.442695, %v1832_v14  ;;  %v1936_v18 = vpop.xlane.xlu2 %1935  ;;  %v1939_v24 = vmul.f32 %v3231_v15, %v3227_v56 }
0x124f   :  { %3232 = vrcp.f32 %v1936_v18 }
0x1250   :  { %3234 = vpow2.f32 %v1834_v16 }
0x1253   :  { %v1831_v23 = vpop.xlane.xlu1 %1830 }
0x1254   :  { %v1833_v43 = vsub.f32 %v1823_v5, %v1831_v23 }
0x1255   :  { %v3233_v39 = vpop.eup %3232 }
0x1256   :  { %v3235_v48 = vpop.eup %3234  ;;  %v1940_v27 = vmul.f32 %v3233_v39, %v3229_v2  ;;  %v1836_v28 = vmul.f32 1.442695, %v1833_v43  ;;  %v1943_v36 = vpop.permute.xlu2 %1942 }
0x1257   :  { %1955 = vmatpush.bf16.msrb.mxu2 %v1943_v36  ;;  %v1838_v40 = vsel %vm424_vm6, %v3235_v48, 0.0 }
0x1258   :  { %v1941_v29 = vpack.c.bf16 %v1940_v27, %v1939_v24  ;;  %3236 = vpow2.f32 %v1836_v28  ;;  %1839 = vadd.xlane.f32.xlu0 %v1838_v40 }
0x125a   :  { %2956 = vmatmul.msk.bf16.vlgmr.msrb.gmra.mxu2 %vm424_vm6, %v1941_v29 }
0x125b   :  { %2059 = vmatpush.bf16.msra.mxu2 %v4062_v38 }
0x125e   :  { %v3237_v12 = vpop.eup %3236 }
0x125f   :  { %v1841_v30 = vsel %vm424_vm6, %v3237_v12, 0.0 }
0x1260   :  { %1842 = vadd.xlane.f32.xlu2 %v1841_v30 }
0x126b   :  { %v1850_v31 = vpop.permute.xlu1 %1849 }
0x126c   :  { %1862 = vmatpush.bf16.msra.mxu3 %v1850_v31  ;;  %1966 = vrot.lane.b32.xlu0 %v4050_v22, %s3339_s6 }
0x1273   :  { %v2156_v26 = vpop.permute.xlu1 %2155 }
0x1274   :  { %v2161_v3 = vsel %vm403_vm5, %v2156_v26, 0  ;;  %1964 = vrot.lane.b32.xlu0 %v4048_v19, %s3340_s5 }
0x1275   :  { %2170 = vmatpush.bf16.xpose.msrb.mxu2 %v2161_v3 }
0x1278   :  { %2066 = vrot.lane.b32.xlu2 %v4048_v19, %s3341_s27 }
0x127b   :  { %v2154_v46 = vpop.permute.xlu1 %2153 }
0x127c   :  { %2068 = vrot.lane.b32.xlu0 %v4050_v22, %s3342_s28 }
0x12cb   :  { %v1840_v38 = vpop.xlane.xlu0 %1839 }
0x12cc   :  { %3238 = vrcp.f32 %v1840_v38 }
0x12d2   :  { %v3239_v60 = vpop.eup %3238 }
0x12d3   :  { %v1843_v10 = vpop.xlane.xlu2 %1842  ;;  %v1846_v4 = vmul.f32 %v3239_v60, %v3235_v48 }
0x12d4   :  { %3240 = vrcp.f32 %v1843_v10 }
0x12da   :  { %v3241_v62 = vpop.eup %3240 }
0x12db   :  { %v1847_v32 = vmul.f32 %v3241_v62, %v3237_v12  ;;  %v2067_v47 = vpop.permute.xlu2 %2066 }
0x12dd   :  { %v1848_v25 = vpack.c.bf16 %v1847_v32, %v1846_v4  ;;  %v1957_v55 = vpop.f32.mrf.mxu2 }
0x12de   :  { %v1967_v58 = vpop.permute.xlu0 %1966 }
0x12df   :  { %v1972_v37 = vsel %vm403_vm5, %v1967_v58, 0  ;;  %2953 = vmatmul.msk.bf16.vlgmr.msra.gmra.mxu3 %vm424_vm6, %v1848_v25 }
0x12e0   :  { %1981 = vmatpush.bf16.xpose.msrb.mxu3 %v1972_v37 }
0x12e5   :  { %v1959_v19 = vpop.f32.mrf.mxu2 }
0x12e6   :  { %v1962_v21 = vpack.c.bf16 %v1959_v19, %v1957_v55  ;;  %v1965_v42 = vpop.permute.xlu0 %1964 }
0x12e8   :  { %2960 = vmatmul.msk.bf16.vlgmr.msra.gmra.mxu2 %vm403_vm5, %v1962_v21 }
0x12ee   :  { %v2069_v49 = vpop.permute.xlu0 %2068 }
0x12ef   :  { %v2074_v45 = vsel %vm403_vm5, %v2069_v49, 0  ;;  %2957 = vmatmul.msk.bf16.vlgmr.msrb.gmra.mxu3 %vm403_vm5, %v1965_v42 }
0x12f0   :  { %2083 = vmatpush.bf16.xpose.msra.mxu3 %v2074_v45  ;;  %v1708_v45 = vadd.f32 %v4088_v59, %v4076_v35 }
0x12f8   :  { %2964 = vmatmul.msk.bf16.vlgmr.msrb.gmra.mxu2 %vm403_vm5, %v2154_v46 }
0x12ff   :  { %2961 = vmatmul.msk.bf16.vlgmr.msra.gmra.mxu3 %vm403_vm5, %v2067_v47  ;;  %v1800_v47 = vadd.f32 %v4080_v41, %v1708_v45  ;;  %v1710_v41 = vadd.f32 %v4090_v13, %v4078_v20 }
0x1362   :  { %v1864_v57 = vpop.f32.mrf.mxu3 }
0x136a   :  { %v1866_v61 = vpop.f32.mrf.mxu3 }
0x136b   :  { %v1869_v50 = vpack.c.bf16 %v1866_v61, %v1864_v57  ;;  %v4131_v56 = vpop.f32.mrf.mxu2  ;;  %v4166_v57 = vld [vmem:[%s4367_s10 + $0x1] ss:$0 sm:$0xff] }
0x136d   :  { %2954 = vmatmul.msk.bf16.vlgmr.msrb.gmra.mxu0 %vm403_vm5, %v1869_v50 }
0x1372   :  { %v1983_v63 = vpop.f32.mrf.mxu3 }
0x1373   :  { %v4134_v53 = vpop.f32.mrf.mxu2  ;;  %v1988_v0 = vsel %vm424_vm6, %v1983_v63, -inf }
0x1374   :  { %1989 = vmax.xlane.f32.xlu0 %v1988_v0 }
0x137a   :  { %v1985_v1 = vpop.f32.mrf.mxu3 }
0x137b   :  { %v2172_v2 = vpop.f32.mrf.mxu2  ;;  %v1991_v51 = vsel %vm424_vm6, %v1985_v1, -inf }
0x137c   :  { %v2177_v5 = vsel %vm424_vm6, %v2172_v2, -inf  ;;  %1992 = vmax.xlane.f32.xlu1 %v1991_v51 }
0x137d   :  { %2178 = vmax.xlane.f32.xlu2 %v2177_v5 }
0x1382   :  { %v2085_v7 = vpop.f32.mrf.mxu3 }
0x1383   :  { %v2090_v8 = vsel %vm424_vm6, %v2085_v7, -inf  ;;  %v2174_v16 = vpop.f32.mrf.mxu2 }
0x1384   :  { %2091 = vmax.xlane.f32.xlu1 %v2090_v8  ;;  %v2180_v18 = vsel %vm424_vm6, %v2174_v16, -inf }
0x138a   :  { %v2087_v9 = vpop.f32.mrf.mxu3 }
0x138b   :  { %v2093_v14 = vsel %vm424_vm6, %v2087_v9, -inf }
0x138c   :  { %2094 = vmax.xlane.f32.xlu0 %v2093_v14 }
0x1394   :  { %2181 = vmax.xlane.f32.xlu0 %v2180_v18 }
0x13e7   :  { %v1990_v15 = vpop.xlane.xlu0 %1989 }
0x13e8   :  { %v1994_v23 = vsub.f32 %v1983_v63, %v1990_v15 }
0x13ea   :  { %v1996_v43 = vmul.f32 1.442695, %v1994_v23  ;;  %v1885_v46 = vpop.f32.mrf.mxu0 }
0x13eb   :  { %v1890_v54 = vadd.f32 %v1885_v46, %v1800_v47 }
0x13ec   :  { %3242 = vpow2.f32 %v1996_v43 }
0x13ed   :  { %v2245_v61 = vadd.f32 %v4166_v57, %v1890_v54 }
0x13ef   :  { %v1993_v39 = vpop.xlane.xlu1 %1992  ;;  %v4170_v50 = vadd.f32 %v2245_v61, %v3938_v6 }
0x13f0   :  { %v1995_v48 = vsub.f32 %v1985_v1, %v1993_v39  ;;  %v2179_v36 = vpop.xlane.xlu2 %2178 }
0x13f1   :  { %v2183_v30 = vsub.f32 %v2172_v2, %v2179_v36  ;;  %v2257_v35 = vsel %vm84_vm0, %v4170_v50, 0.0 }
0x13f2   :  { %v4142_v24 = vpop.eup %3242  ;;  %v1998_v27 = vmul.f32 1.442695, %v1995_v48  ;;  %v1887_v59 = vpop.f32.mrf.mxu0 }
0x13f3   :  { %v2000_v28 = vsel %vm424_vm6, %v4142_v24, 0.0  ;;  %v2185_v3 = vmul.f32 1.442695, %v2183_v30 }
0x13f4   :  { %3244 = vpow2.f32 %v1998_v27  ;;  %2001 = vadd.xlane.f32.xlu1 %v2000_v28 }
0x13f7   :  { %v2092_v40 = vpop.xlane.xlu1 %2091 }
0x13f8   :  { %v2096_v29 = vsub.f32 %v2085_v7, %v2092_v40 }
0x13fa   :  { %v3245_v12 = vpop.eup %3244  ;;  %v2098_v31 = vmul.f32 1.442695, %v2096_v29 }
0x13fb   :  { %v2003_v26 = vsel %vm424_vm6, %v3245_v12, 0.0 }
0x13fc   :  { %3246 = vpow2.f32 %v2098_v31  ;;  %2004 = vadd.xlane.f32.xlu0 %v2003_v26 }
0x13fd   :  { %3248 = vpow2.f32 %v2185_v3 }
0x13ff   :  { %v2095_v38 = vpop.xlane.xlu0 %2094 }
0x1400   :  { %v2097_v10 = vsub.f32 %v2087_v9, %v2095_v38 }
0x1402   :  { %v4147_v60 = vpop.eup %3246  ;;  %v2100_v62 = vmul.f32 1.442695, %v2097_v10 }
0x1403   :  { %v2102_v4 = vsel %vm424_vm6, %v4147_v60, 0.0  ;;  %v3249_v25 = vpop.eup %3248 }
0x1404   :  { %3250 = vpow2.f32 %v2100_v62  ;;  %2103 = vadd.xlane.f32.xlu2 %v2102_v4  ;;  %v2189_v19 = vsel %vm424_vm6, %v3249_v25, 0.0 }
0x1407   :  { %v2182_v32 = vpop.xlane.xlu0 %2181 }
0x1408   :  { %v2184_v55 = vsub.f32 %v2174_v16, %v2182_v32 }
0x140a   :  { %v3251_v58 = vpop.eup %3250  ;;  %v2187_v37 = vmul.f32 1.442695, %v2184_v55 }
0x140b   :  { %v2105_v21 = vsel %vm424_vm6, %v3251_v58, 0.0 }
0x140c   :  { %3252 = vpow2.f32 %v2187_v37  ;;  %2190 = vadd.xlane.f32.xlu2 %v2189_v19  ;;  %2106 = vadd.xlane.f32.xlu0 %v2105_v21 }
0x140d   :  { %2011 = vrot.lane.b32.xlu1 %v4050_v22, %s3343_s0 }
0x1412   :  { %v3253_v42 = vpop.eup %3252 }
0x1413   :  { %v2192_v49 = vsel %vm424_vm6, %v3253_v42, 0.0 }
0x1414   :  { %2193 = vadd.xlane.f32.xlu0 %v2192_v49 }
0x1424   :  { %2200 = vrot.lane.b32.xlu2 %v4050_v22, %s4414_s2 }
0x1428   :  { %2113 = vrot.lane.b32.xlu0 %v4050_v22, %s4410_s8  ;;  %v1801_v22 = vadd.f32 %v4083_v44, %v1710_v41 }
0x142a   :  { %v1891_v63 = vadd.f32 %v1887_v59, %v1801_v22 }
0x142c   :  { %v2246_v0 = vadd.f32 %v4166_v57, %v1891_v63 }
0x142e   :  { %v2250_v1 = vadd.f32 %v2246_v0, %v3941_v34 }
0x1430   :  { %v2260_v2 = vsel %vm84_vm0, %v2250_v1, 0.0 }
0x1437   :  { %2258 = vadd.xlane.f32.xlu1 %v2257_v35 }
0x1452   :  { %2261 = vadd.xlane.f32.xlu0 %v2260_v2 }
0x1467   :  { %v2002_v51 = vpop.xlane.xlu1 %2001 }
0x146f   :  { %v2005_v6 = vpop.xlane.xlu0 %2004 }
0x1470   :  { %3254 = vrcp.f32 %v2005_v6 }
0x1471   :  { %3256 = vrcp.f32 %v2002_v51 }
0x1476   :  { %v3255_v7 = vpop.eup %3254 }
0x1477   :  { %v2104_v5 = vpop.xlane.xlu2 %2103  ;;  %v3257_v8 = vpop.eup %3256  ;;  %v2009_v9 = vmul.f32 %v3255_v7, %v3245_v12 }
0x1478   :  { %v2008_v20 = vmul.f32 %v3257_v8, %v4142_v24 }
0x147a   :  { %v2010_v16 = vpack.c.bf16 %v2009_v9, %v2008_v20 }
0x147f   :  { %v2191_v13 = vpop.xlane.xlu2 %2190  ;;  %v2012_v44 = vpop.permute.xlu1 %2011 }
0x1480   :  { %v2107_v14 = vpop.xlane.xlu0 %2106  ;;  %2024 = vmatpush.bf16.msra.mxu0 %v2012_v44  ;;  %3258 = vrcp.f32 %v2191_v13  ;;  %v3047_v13 = vld [vmem:[%s4370_s13 + $0x18] sm:$0xff] }
0x1483   :  { %2958 = vmatmul.msk.bf16.vlgmr.msra.gmra.mxu0 %vm424_vm6, %v2010_v16 }
0x1486   :  { %v3259_v15 = vpop.eup %3258 }
0x1487   :  { %v2201_v34 = vpop.permute.xlu2 %2200  ;;  %v2197_v43 = vmul.f32 %v3259_v15, %v3249_v25 }
0x1488   :  { %v2194_v18 = vpop.xlane.xlu0 %2193  ;;  %2213 = vmatpush.bf16.msrb.mxu3 %v2201_v34 }
0x1489   :  { %3260 = vrcp.f32 %v2194_v18  ;;  %v3046_v18 = vld [vmem:[%s4370_s13 + $0x10] sm:$0xff] }
0x148a   :  { %3262 = vrcp.f32 %v2107_v14 }
0x148b   :  { %3264 = vrcp.f32 %v2104_v5 }
0x148f   :  { %v3261_v23 = vpop.eup %3260 }
0x1490   :  { %v2198_v39 = vmul.f32 %v3261_v23, %v3253_v42  ;;  %v3263_v24 = vpop.eup %3262 }
0x1491   :  { %v3265_v27 = vpop.eup %3264  ;;  %v2111_v28 = vmul.f32 %v3263_v24, %v3251_v58 }
0x1492   :  { %v2199_v48 = vpack.c.bf16 %v2198_v39, %v2197_v43  ;;  %v2110_v36 = vmul.f32 %v3265_v27, %v4147_v60 }
0x1494   :  { %2965 = vmatmul.msk.bf16.vlgmr.msrb.gmra.mxu3 %vm424_vm6, %v2199_v48  ;;  %v2112_v29 = vpack.c.bf16 %v2111_v28, %v2110_v36 }
0x149a   :  { %v2114_v40 = vpop.permute.xlu0 %2113 }
0x149b   :  { %2126 = vmatpush.bf16.msrb.mxu0 %v2114_v40 }
0x149e   :  { %2962 = vmatmul.msk.bf16.vlgmr.msrb.gmra.mxu0 %vm424_vm6, %v2112_v29 }
0x149f   :  { %2231 = vmatpush.bf16.msra.mxu0 %v4128_v52 }
0x14aa   :  { %v2259_v59 = vpop.xlane.xlu1 %2258 }
0x14c5   :  { %v2262_v12 = vpop.xlane.xlu0 %2261 }
0x14c6   :  { %v2270_v30 = vmul.f32 %v2262_v12, %v3481_v11 }
0x14c8   :  { %v4187_v31 = vsub.f32 %v2250_v1, %v2270_v30 }
0x14ca   :  { %v2278_v26 = vmul.f32 %v4187_v31, %v4187_v31 }
0x14cc   :  { %v2284_v3 = vsel %vm84_vm0, %v2278_v26, 0.0 }
0x14cd   :  { %2285 = vadd.xlane.f32.xlu0 %v2284_v3 }
0x1500   :  { %v2026_v38 = vpop.f32.mrf.mxu0 }
0x1508   :  { %v2028_v10 = vpop.f32.mrf.mxu0 }
0x1509   :  { %v2031_v60 = vpack.c.bf16 %v2028_v10, %v2026_v38  ;;  %v3088_v38 = vld [vmem:[%s4368_s11 + $0x1] ss:$0 sm:$0xff]  ;;  %s2843_s11 = sshll.u32 %s4380_s23, 4  ;;  %s2844_s11 = int_to_ptr.hbm [resolvable:$true] %s2843_s11 }
0x150b   :  { %2959 = vmatmul.msk.bf16.vlgmr.msra.gmra.mxu1 %vm403_vm5, %v2031_v60 }
0x150c   :  { %2395 = vmatpush.bf16.msra.mxu1 %v3047_v13 }
0x1510   :  { %2396 = vmatpush.bf16.msra.mxu1 %v3046_v18 }
0x1517   :  { %v2215_v62 = vpop.f32.mrf.mxu3 }
0x151b   :  { %v2128_v52 = vpop.f32.mrf.mxu0 }
0x151f   :  { %v2217_v4 = vpop.f32.mrf.mxu3 }
0x1520   :  { %v2220_v32 = vpack.c.bf16 %v2217_v4, %v2215_v62 }
0x1522   :  { %2966 = vmatmul.msk.bf16.vlgmr.msra.gmra.mxu0 %vm403_vm5, %v2220_v32 }
0x1523   :  { %v2130_v25 = vpop.f32.mrf.mxu0 }
0x1524   :  { %v2133_v55 = vpack.c.bf16 %v2130_v25, %v2128_v52  ;;  %v3089_v52 = vld [vmem:[%s4369_s12 + $0x1] ss:$0 sm:$0xff] }
0x1526   :  { %2963 = vmatmul.msk.bf16.vlgmr.msrb.gmra.mxu1 %vm403_vm5, %v2133_v55 }
0x1540   :  { %v2286_v51 = vpop.xlane.xlu0 %2285 }
0x1541   :  { %v2294_v5 = vmul.f32 %v2286_v51, %v3481_v11 }
0x1543   :  { %v2298_v7 = vadd.f32 1e-05, %v2294_v5 }
0x1545   :  { %3266 = vrsqrt.f32 %v2298_v7  ;;  %vm2317_vm6 = vweird.f32 %v2298_v7 }
0x154b   :  { %v3267_v44 = vpop.eup %3266 }
0x154c   :  { %v2312_v34 = vmul.f32 %v3267_v44, %v2298_v7  ;;  %vm2318_vm5 = vweird.f32 %v3267_v44 }
0x154d   :  { %vm2319_vm13 = vmor %vm2317_vm6, %vm2318_vm5 }
0x154e   :  { %v2313_v43 = vmul.f32 %v3267_v44, %v2312_v34 }
0x1550   :  { %v2314_v27 = vmul.f32 0.5, %v2313_v43 }
0x1552   :  { %v2315_v28 = vsub.f32 1.5, %v2314_v27 }
0x1554   :  { %v2316_v40 = vmul.f32 %v3267_v44, %v2315_v28 }
0x1556   :  { %v2320_v30 = vsel %vm2319_vm13, %v3267_v44, %v2316_v40 }
0x1557   :  { %v2342_v10 = vmul.f32 %v2320_v30, %v4187_v31 }
0x1559   :  { %v2349_v4 = vmul.f32 %v3088_v38, %v2342_v10 }
0x155b   :  { %v4233_v55 = vadd.f32 %v3089_v52, %v2349_v4 }
0x1588   :  { %v2044_v58 = vpop.f32.mrf.mxu1 }
0x1589   :  { %v2062_v19 = vadd.f32 %v4131_v56, %v2044_v58  ;;  %v2269_v56 = vmul.f32 %v2259_v59, %v3481_v11 }
0x158b   :  { %v2273_v2 = vsub.f32 %v4170_v50, %v2269_v56 }
0x1590   :  { %v2046_v37 = vpop.f32.mrf.mxu1 }
0x1591   :  { %v2064_v47 = vadd.f32 %v4134_v53, %v2046_v37 }
0x159f   :  { %v2233_v21 = vpop.f32.mrf.mxu0 }
0x15a3   :  { %v2146_v42 = vpop.f32.mrf.mxu1 }
0x15a4   :  { %v2151_v49 = vadd.f32 %v2146_v42, %v2062_v19 }
0x15a6   :  { %v2238_v45 = vadd.f32 %v2233_v21, %v2151_v49 }
0x15a7   :  { %v2235_v22 = vpop.f32.mrf.mxu0 }
0x15a8   :  { %v2247_v46 = vadd.f32 %v4166_v57, %v2238_v45 }
0x15aa   :  { %v2251_v54 = vadd.f32 %v2247_v46, %v4023_v17  ;;  %v2277_v17 = vmul.f32 %v2273_v2, %v2273_v2 }
0x15ab   :  { %v2148_v61 = vpop.f32.mrf.mxu1 }
0x15ac   :  { %v2152_v35 = vadd.f32 %v2148_v61, %v2064_v47  ;;  %v2263_v41 = vsel %vm84_vm0, %v2251_v54, 0.0  ;;  %v2281_v6 = vsel %vm84_vm0, %v2277_v17, 0.0 }
0x15ad   :  { %2264 = vadd.xlane.f32.xlu2 %v2263_v41 }
0x15ae   :  { %v2239_v63 = vadd.f32 %v2235_v22, %v2152_v35 }
0x15b0   :  { %v2248_v0 = vadd.f32 %v4166_v57, %v2239_v63 }
0x15b2   :  { %v2252_v1 = vadd.f32 %v2248_v0, %v4026_v33 }
0x15b4   :  { %v2266_v53 = vsel %vm84_vm0, %v2252_v1, 0.0 }
0x15b5   :  { %2267 = vadd.xlane.f32.xlu1 %v2266_v53 }
0x15bd   :  { %2282 = vadd.xlane.f32.xlu1 %v2281_v6 }
0x1620   :  { %v2265_v8 = vpop.xlane.xlu2 %2264 }
0x1621   :  { %v2271_v9 = vmul.f32 %v2265_v8, %v3481_v11 }
0x1623   :  { %v4208_v57 = vsub.f32 %v2251_v54, %v2271_v9 }
0x1625   :  { %v2279_v33 = vmul.f32 %v4208_v57, %v4208_v57 }
0x1627   :  { %v2287_v50 = vsel %vm84_vm0, %v2279_v33, 0.0  ;;  %v3051_v33 = vld [vmem:[%s4372_s15 + $0x38] sm:$0xff] }
0x1628   :  { %2288 = vadd.xlane.f32.xlu1 %v2287_v50  ;;  %v2268_v20 = vpop.xlane.xlu1 %2267  ;;  %2494 = vmatpush.bf16.msra.mxu2 %v3051_v33  ;;  %v3090_v50 = vld [vmem:[%s4371_s14 + $0x1] ss:$0 sm:$0xff] }
0x1629   :  { %v2272_v14 = vmul.f32 %v2268_v20, %v3481_v11  ;;  %v3049_v20 = vld [vmem:[%s4372_s15 + $0x28] sm:$0xff] }
0x162b   :  { %v4217_v16 = vsub.f32 %v2252_v1, %v2272_v14  ;;  %v3048_v14 = vld [vmem:[%s4372_s15 + $0x20] sm:$0xff] }
0x162d   :  { %v2280_v15 = vmul.f32 %v4217_v16, %v4217_v16 }
0x162f   :  { %v2290_v23 = vsel %vm84_vm0, %v2280_v15, 0.0 }
0x1630   :  { %2291 = vadd.xlane.f32.xlu2 %v2290_v23  ;;  %v2283_v39 = vpop.xlane.xlu1 %2282 }
0x1631   :  { %v2293_v48 = vmul.f32 %v2283_v39, %v3481_v11 }
0x1633   :  { %v2297_v24 = vadd.f32 1e-05, %v2293_v48 }
0x1635   :  { %3268 = vrsqrt.f32 %v2297_v24  ;;  %vm2307_vm2 = vweird.f32 %v2297_v24 }
0x163b   :  { %v3269_v36 = vpop.eup %3268 }
0x163c   :  { %v2302_v29 = vmul.f32 %v3269_v36, %v2297_v24  ;;  %vm2308_vm1 = vweird.f32 %v3269_v36 }
0x163d   :  { %vm2309_vm3 = vmor %vm2307_vm2, %vm2308_vm1 }
0x163e   :  { %v2303_v12 = vmul.f32 %v3269_v36, %v2302_v29 }
0x1640   :  { %v2304_v26 = vmul.f32 0.5, %v2303_v12 }
0x1642   :  { %v2305_v3 = vsub.f32 1.5, %v2304_v26 }
0x1644   :  { %v2306_v60 = vmul.f32 %v3269_v36, %v2305_v3 }
0x1646   :  { %v2310_v62 = vsel %vm2309_vm3, %v3269_v36, %v2306_v60 }
0x1647   :  { %v2341_v32 = vmul.f32 %v2310_v62, %v2273_v2 }
0x1649   :  { %v2348_v25 = vmul.f32 %v3088_v38, %v2341_v32 }
0x164b   :  { %v4235_v58 = vadd.f32 %v3089_v52, %v2348_v25 }
0x164d   :  { %v2364_v37 = vpack.c.bf16 %v4233_v55, %v4235_v58 }
0x164f   :  { %2983 = vmatmul.msk.bf16.vlgmr.msra.gmra.mxu1 %vm84_vm0, %v2364_v37 }
0x169b   :  { %v2289_v31 = vpop.xlane.xlu1 %2288 }
0x169c   :  { %v2295_v19 = vmul.f32 %v2289_v31, %v3481_v11 }
0x169e   :  { %v2299_v21 = vadd.f32 1e-05, %v2295_v19 }
0x16a0   :  { %3270 = vrsqrt.f32 %v2299_v21  ;;  %vm2327_vm8 = vweird.f32 %v2299_v21 }
0x16a3   :  { %v2292_v42 = vpop.xlane.xlu2 %2291 }
0x16a4   :  { %v2296_v49 = vmul.f32 %v2292_v42, %v3481_v11 }
0x16a6   :  { %v3271_v45 = vpop.eup %3270  ;;  %v2300_v46 = vadd.f32 1e-05, %v2296_v49 }
0x16a7   :  { %v2322_v47 = vmul.f32 %v3271_v45, %v2299_v21  ;;  %vm2328_vm4 = vweird.f32 %v3271_v45 }
0x16a8   :  { %3272 = vrsqrt.f32 %v2300_v46  ;;  %vm2329_vm9 = vmor %vm2327_vm8, %vm2328_vm4  ;;  %vm2337_vm11 = vweird.f32 %v2300_v46 }
0x16a9   :  { %v2323_v54 = vmul.f32 %v3271_v45, %v2322_v47 }
0x16ab   :  { %v2324_v61 = vmul.f32 0.5, %v2323_v54 }
0x16ad   :  { %v2325_v35 = vsub.f32 1.5, %v2324_v61 }
0x16ae   :  { %v3273_v41 = vpop.eup %3272 }
0x16af   :  { %v2326_v59 = vmul.f32 %v3271_v45, %v2325_v35  ;;  %v2332_v22 = vmul.f32 %v3273_v41, %v2300_v46  ;;  %vm2338_vm10 = vweird.f32 %v3273_v41 }
0x16b0   :  { %vm2339_vm12 = vmor %vm2337_vm11, %vm2338_vm10  ;;  %vm2697_vm10 = vcmask 7168   ;;  %vm2832_vm11 = vcmask 1040384  }
0x16b1   :  { %v2333_v63 = vmul.f32 %v3273_v41, %v2332_v22  ;;  %v2330_v56 = vsel %vm2329_vm9, %v3271_v45, %v2326_v59 }
0x16b2   :  { %v2343_v2 = vmul.f32 %v2330_v56, %v4208_v57  ;;  %v3050_v57 = vld [vmem:[%s4372_s15 + $0x30] sm:$0xff] }
0x16b3   :  { %v2334_v0 = vmul.f32 0.5, %v2333_v63  ;;  %2495 = vmatpush.bf16.msra.mxu2 %v3050_v57 }
0x16b4   :  { %v2350_v51 = vmul.f32 %v3088_v38, %v2343_v2 }
0x16b5   :  { %v2335_v1 = vsub.f32 1.5, %v2334_v0 }
0x16b6   :  { %v4244_v7 = vadd.f32 %v3089_v52, %v2350_v51 }
0x16b7   :  { %v2336_v53 = vmul.f32 %v3273_v41, %v2335_v1  ;;  %2496 = vmatpush.bf16.msra.mxu2 %v3049_v20  ;;  %v3091_v1 = vld [vmem:[%s4373_s16 + $0x1] ss:$0 sm:$0xff] }
0x16b9   :  { %v2340_v17 = vsel %vm2339_vm12, %v3273_v41, %v2336_v53  ;;  %vm2834_vm12 = vcmask 254976  }
0x16ba   :  { %v2344_v6 = vmul.f32 %v2340_v17, %v4217_v16 }
0x16bb   :  { %2497 = vmatpush.bf16.msra.mxu2 %v3048_v14 }
0x16bc   :  { %v2351_v5 = vmul.f32 %v3088_v38, %v2344_v6 }
0x16be   :  { %v4246_v8 = vadd.f32 %v3089_v52, %v2351_v5 }
0x16c0   :  { %v2365_v9 = vpack.c.bf16 %v4246_v8, %v4244_v7 }
0x16c2   :  { %2984 = vmatmul.msk.bf16.gmra.mxu1 %vm84_vm0, %v2365_v9 }
0x16cc   :  { %v2398_v13 = vpop.f32.mrf.mxu1 }
0x16cd   :  { %v2399_v44 = vadd.f32 %v3090_v50, %v2398_v13 }
0x16cf   :  { %v2408_v16 = vmul.f32 %v2399_v44, %v2399_v44 }
0x16d1   :  { %v2412_v34 = vmul.f32 %v2408_v16, %v2399_v44 }
0x16d3   :  { %v2416_v18 = vmul.f32 0.044715, %v2412_v34 }
0x16d4   :  { %v2400_v15 = vpop.f32.mrf.mxu1 }
0x16d5   :  { %v2420_v23 = vadd.f32 %v2416_v18, %v2399_v44  ;;  %v2401_v43 = vadd.f32 %v3090_v50, %v2400_v15 }
0x16d7   :  { %v2424_v39 = vmul.f32 0.7978846, %v2420_v23  ;;  %v2409_v48 = vmul.f32 %v2401_v43, %v2401_v43 }
0x16d9   :  { %v2413_v24 = vmul.f32 %v2409_v48, %v2401_v43  ;;  %3274 = vtanh.f32 %v2424_v39 }
0x16db   :  { %v2417_v27 = vmul.f32 0.044715, %v2413_v24 }
0x16dd   :  { %v2421_v28 = vadd.f32 %v2417_v27, %v2401_v43 }
0x16df   :  { %v2425_v36 = vmul.f32 0.7978846, %v2421_v28  ;;  %v3275_v40 = vpop.eup %3274 }
0x16e0   :  { %v2432_v29 = vadd.f32 1.0, %v3275_v40 }
0x16e1   :  { %3276 = vtanh.f32 %v2425_v36 }
0x16e2   :  { %v2436_v30 = vmul.f32 0.5, %v2432_v29 }
0x16e4   :  { %v2440_v38 = vmul.f32 %v2436_v30, %v2399_v44  ;;  %v3053_v30 = vld [vmem:[%s4376_s19 + $0x8] sm:$0xff] }
0x16e5   :  { %2649 = vmatpush.bf16.msra.mxu3 %v3053_v30 }
0x16e7   :  { %v3277_v12 = vpop.eup %3276 }
0x16e8   :  { %v2433_v26 = vadd.f32 1.0, %v3277_v12 }
0x16ea   :  { %v2437_v3 = vmul.f32 0.5, %v2433_v26 }
0x16ec   :  { %v2441_v10 = vmul.f32 %v2437_v3, %v2401_v43 }
0x16ee   :  { %v2453_v60 = vpack.c.bf16 %v2441_v10, %v2440_v38 }
0x16f0   :  { %3010 = vmatmul.msk.bf16.vlgmr.msra.gmra.mxu2 %vm1344_vm7, %v2453_v60  ;;  %v3052_v60 = vld [vmem:[%s4376_s19] sm:$0xff] }
0x16f1   :  { %2650 = vmatpush.bf16.msra.mxu3 %v3052_v60 }
0x16f5   :  { %2756 = vmatpush.bf16.msrb.mxu3 %v3053_v30  ;;  %v3094_v30 = vld [vmem:[%s4377_s20] ss:$0 sm:$0xff]  ;;  %s3349_s20 = smov [#allocation3]  }
0x16f9   :  { %2757 = vmatpush.bf16.msrb.mxu3 %v3052_v60 }
0x173f   :  { %v2403_v62 = vpop.f32.mrf.mxu1 }
0x1740   :  { %v2404_v52 = vadd.f32 %v3090_v50, %v2403_v62 }
0x1742   :  { %v2410_v4 = vmul.f32 %v2404_v52, %v2404_v52 }
0x1744   :  { %v2414_v32 = vmul.f32 %v2410_v4, %v2404_v52 }
0x1746   :  { %v2418_v25 = vmul.f32 0.044715, %v2414_v32 }
0x1747   :  { %v2405_v37 = vpop.f32.mrf.mxu1 }
0x1748   :  { %v2422_v31 = vadd.f32 %v2418_v25, %v2404_v52  ;;  %v2406_v19 = vadd.f32 %v3090_v50, %v2405_v37 }
0x174a   :  { %v2426_v21 = vmul.f32 0.7978846, %v2422_v31  ;;  %v2411_v42 = vmul.f32 %v2406_v19, %v2406_v19 }
0x174c   :  { %v2415_v49 = vmul.f32 %v2411_v42, %v2406_v19  ;;  %3278 = vtanh.f32 %v2426_v21 }
0x174e   :  { %v2419_v45 = vmul.f32 0.044715, %v2415_v49 }
0x1750   :  { %v2423_v46 = vadd.f32 %v2419_v45, %v2406_v19 }
0x1752   :  { %v2427_v47 = vmul.f32 0.7978846, %v2423_v46  ;;  %v3279_v54 = vpop.eup %3278 }
0x1753   :  { %v2434_v61 = vadd.f32 1.0, %v3279_v54 }
0x1754   :  { %3280 = vtanh.f32 %v2427_v47 }
0x1755   :  { %v2438_v41 = vmul.f32 0.5, %v2434_v61 }
0x1757   :  { %v2442_v63 = vmul.f32 %v2438_v41, %v2404_v52  ;;  %v3092_v41 = vld [vmem:[%s4374_s17 + $0x1] ss:$0 sm:$0xff] }
0x175a   :  { %v3281_v35 = vpop.eup %3280 }
0x175b   :  { %v2435_v59 = vadd.f32 1.0, %v3281_v35 }
0x175d   :  { %v2439_v22 = vmul.f32 0.5, %v2435_v59 }
0x175f   :  { %v2443_v56 = vmul.f32 %v2439_v22, %v2406_v19 }
0x1761   :  { %v2454_v0 = vpack.c.bf16 %v2443_v56, %v2442_v63  ;;  %v3093_v56 = vld [vmem:[%s4375_s18 + $0x1] ss:$0 sm:$0xff] }
0x1763   :  { %3011 = vmatmul.msk.bf16.gmra.mxu2 %vm1344_vm7, %v2454_v0 }
0x1773   :  { %v2499_v2 = vpop.f32.mrf.mxu2 }
0x1774   :  { %v2500_v53 = vadd.f32 %v3091_v1, %v2499_v2 }
0x1776   :  { %v2509_v17 = vadd.f32 %v2500_v53, %v4235_v58 }
0x1778   :  { %v2517_v6 = vsel %vm84_vm0, %v2509_v17, 0.0 }
0x1779   :  { %2518 = vadd.xlane.f32.xlu0 %v2517_v6 }
0x177b   :  { %v2501_v51 = vpop.f32.mrf.mxu2 }
0x177c   :  { %v2502_v5 = vadd.f32 %v3091_v1, %v2501_v51 }
0x177e   :  { %v2510_v9 = vadd.f32 %v2502_v5, %v4233_v55 }
0x1780   :  { %v2520_v33 = vsel %vm84_vm0, %v2510_v9, 0.0 }
0x1781   :  { %2521 = vadd.xlane.f32.xlu1 %v2520_v33 }
0x17e6   :  { %v2504_v57 = vpop.f32.mrf.mxu2 }
0x17e7   :  { %v2505_v50 = vadd.f32 %v3091_v1, %v2504_v57 }
0x17e9   :  { %v2511_v20 = vadd.f32 %v2505_v50, %v4244_v7 }
0x17eb   :  { %v2523_v13 = vsel %vm84_vm0, %v2511_v20, 0.0 }
0x17ec   :  { %2524 = vadd.xlane.f32.xlu2 %v2523_v13  ;;  %v2519_v44 = vpop.xlane.xlu0 %2518 }
0x17ed   :  { %v2529_v58 = vmul.f32 %v2519_v44, %v3481_v11 }
0x17ee   :  { %v2506_v14 = vpop.f32.mrf.mxu2 }
0x17ef   :  { %v2533_v16 = vsub.f32 %v2509_v17, %v2529_v58  ;;  %v2507_v34 = vadd.f32 %v3091_v1, %v2506_v14 }
0x17f1   :  { %v2512_v18 = vadd.f32 %v2507_v34, %v4246_v8  ;;  %v2537_v15 = vmul.f32 %v2533_v16, %v2533_v16 }
0x17f3   :  { %v2526_v55 = vsel %vm84_vm0, %v2512_v18, 0.0  ;;  %v2541_v23 = vsel %vm84_vm0, %v2537_v15, 0.0 }
0x17f4   :  { %v2522_v43 = vpop.xlane.xlu1 %2521  ;;  %2527 = vadd.xlane.f32.xlu0 %v2526_v55  ;;  %2542 = vadd.xlane.f32.xlu1 %v2541_v23 }
0x17f5   :  { %v2530_v7 = vmul.f32 %v2522_v43, %v3481_v11 }
0x17f7   :  { %v2534_v39 = vsub.f32 %v2510_v9, %v2530_v7 }
0x17f9   :  { %v2538_v48 = vmul.f32 %v2534_v39, %v2534_v39 }
0x17fb   :  { %v2544_v24 = vsel %vm84_vm0, %v2538_v48, 0.0 }
0x17fc   :  { %2545 = vadd.xlane.f32.xlu2 %v2544_v24 }
0x185f   :  { %v2525_v27 = vpop.xlane.xlu2 %2524 }
0x1860   :  { %v2531_v28 = vmul.f32 %v2525_v27, %v3481_v11 }
0x1862   :  { %v4284_v36 = vsub.f32 %v2511_v20, %v2531_v28 }
0x1864   :  { %v2539_v8 = vmul.f32 %v4284_v36, %v4284_v36 }
0x1866   :  { %v2547_v40 = vsel %vm84_vm0, %v2539_v8, 0.0 }
0x1867   :  { %2548 = vadd.xlane.f32.xlu0 %v2547_v40  ;;  %v2543_v29 = vpop.xlane.xlu1 %2542  ;;  %v2528_v12 = vpop.xlane.xlu0 %2527  ;;  %v3055_v40 = vld [vmem:[%s4378_s21 + $0x8] sm:$0xff] }
0x1868   :  { %v2553_v26 = vmul.f32 %v2543_v29, %v3481_v11  ;;  %v2532_v3 = vmul.f32 %v2528_v12, %v3481_v11  ;;  %2689 = vmatpush.bf16.msrb.mxu0 %v3055_v40 }
0x186a   :  { %v2557_v38 = vadd.f32 1e-05, %v2553_v26  ;;  %v4294_v10 = vsub.f32 %v2512_v18, %v2532_v3 }
0x186c   :  { %3282 = vrsqrt.f32 %v2557_v38  ;;  %v2540_v62 = vmul.f32 %v4294_v10, %v4294_v10  ;;  %vm2567_vm14 = vweird.f32 %v2557_v38 }
0x186e   :  { %v2550_v52 = vsel %vm84_vm0, %v2540_v62, 0.0 }
0x186f   :  { %v2546_v4 = vpop.xlane.xlu2 %2545  ;;  %2551 = vadd.xlane.f32.xlu1 %v2550_v52 }
0x1870   :  { %v2554_v32 = vmul.f32 %v2546_v4, %v3481_v11 }
0x1872   :  { %v3283_v25 = vpop.eup %3282  ;;  %v2558_v37 = vadd.f32 1e-05, %v2554_v32 }
0x1873   :  { %v2562_v31 = vmul.f32 %v3283_v25, %v2557_v38  ;;  %vm2568_vm7 = vweird.f32 %v3283_v25 }
0x1874   :  { %3284 = vrsqrt.f32 %v2558_v37  ;;  %vm2569_vm15 = vmor %vm2567_vm14, %vm2568_vm7  ;;  %vm2577_vm6 = vweird.f32 %v2558_v37 }
0x1875   :  { %v2563_v19 = vmul.f32 %v3283_v25, %v2562_v31 }
0x1877   :  { %v2564_v21 = vmul.f32 0.5, %v2563_v19 }
0x1879   :  { %v2565_v42 = vsub.f32 1.5, %v2564_v21 }
0x187a   :  { %v3285_v49 = vpop.eup %3284 }
0x187b   :  { %v2566_v45 = vmul.f32 %v3283_v25, %v2565_v42  ;;  %v2572_v46 = vmul.f32 %v3285_v49, %v2558_v37  ;;  %vm2578_vm5 = vweird.f32 %v3285_v49  ;;  %v3095_v42 = vld [vmem:[#allocation2] ss:$0 sm:$0xff] }
0x187c   :  { %vm2579_vm13 = vmor %vm2577_vm6, %vm2578_vm5 }
0x187d   :  { %v2573_v47 = vmul.f32 %v3285_v49, %v2572_v46  ;;  %v2570_v54 = vsel %vm2569_vm15, %v3283_v25, %v2566_v45 }
0x187e   :  { %v2601_v59 = vmul.f32 %v2570_v54, %v2533_v16 }
0x187f   :  { %v2574_v61 = vmul.f32 0.5, %v2573_v47 }
0x1880   :  { %v2608_v0 = vmul.f32 %v3092_v41, %v2601_v59  ;;  %v3348_v59 = vmov 0  }
0x1881   :  { %v2575_v35 = vsub.f32 1.5, %v2574_v61  ;;  %3071 = vset.pattern.permute.xlu0 %v3348_v59  ;;  %3070 = vset.pattern.permute.xlu2 %v3348_v59 }
0x1882   :  { %v4309_v53 = vadd.f32 %v3093_v56, %v2608_v0  ;;  %3072 = vset.pattern.permute.xlu1 %v3348_v59 }
0x1883   :  { %v2576_v22 = vmul.f32 %v3285_v49, %v2575_v35 }
0x1885   :  { %v2580_v63 = vsel %vm2579_vm13, %v3285_v49, %v2576_v22 }
0x1886   :  { %v2602_v1 = vmul.f32 %v2580_v63, %v2534_v39 }
0x1888   :  { %v2609_v2 = vmul.f32 %v3092_v41, %v2602_v1 }
0x188a   :  { %v4311_v17 = vadd.f32 %v3093_v56, %v2609_v2 }
0x188c   :  { %v2623_v6 = vpack.c.bf16 %v4311_v17, %v4309_v53 }
0x188e   :  { %3022 = vmatmul.msk.bf16.vlgmr.msra.gmra.mxu3 %vm84_vm0, %v2623_v6 }
0x18da   :  { %v2549_v51 = vpop.xlane.xlu0 %2548 }
0x18db   :  { %v2555_v5 = vmul.f32 %v2549_v51, %v3481_v11 }
0x18dd   :  { %v2559_v9 = vadd.f32 1e-05, %v2555_v5 }
0x18df   :  { %3286 = vrsqrt.f32 %v2559_v9  ;;  %vm2587_vm2 = vweird.f32 %v2559_v9 }
0x18e2   :  { %v2552_v33 = vpop.xlane.xlu1 %2551 }
0x18e3   :  { %v2556_v57 = vmul.f32 %v2552_v33, %v3481_v11 }
0x18e5   :  { %v3287_v50 = vpop.eup %3286  ;;  %v2560_v20 = vadd.f32 1e-05, %v2556_v57 }
0x18e6   :  { %v2582_v13 = vmul.f32 %v3287_v50, %v2559_v9  ;;  %vm2588_vm1 = vweird.f32 %v3287_v50 }
0x18e7   :  { %3288 = vrsqrt.f32 %v2560_v20  ;;  %vm2589_vm3 = vmor %vm2587_vm2, %vm2588_vm1  ;;  %vm2597_vm8 = vweird.f32 %v2560_v20 }
0x18e8   :  { %v2583_v44 = vmul.f32 %v3287_v50, %v2582_v13 }
0x18ea   :  { %v2584_v58 = vmul.f32 0.5, %v2583_v44 }
0x18ec   :  { %v2585_v14 = vsub.f32 1.5, %v2584_v58 }
0x18ed   :  { %v3289_v16 = vpop.eup %3288 }
0x18ee   :  { %v2586_v34 = vmul.f32 %v3287_v50, %v2585_v14  ;;  %v2592_v18 = vmul.f32 %v3289_v16, %v2560_v20  ;;  %vm2598_vm4 = vweird.f32 %v3289_v16 }
0x18ef   :  { %vm2599_vm9 = vmor %vm2597_vm8, %vm2598_vm4 }
0x18f0   :  { %v2593_v15 = vmul.f32 %v3289_v16, %v2592_v18  ;;  %v2590_v55 = vsel %vm2589_vm3, %v3287_v50, %v2586_v34 }
0x18f1   :  { %v2603_v11 = vmul.f32 %v2590_v55, %v4284_v36  ;;  %v3054_v36 = vld [vmem:[%s4378_s21] sm:$0xff]  ;;  %s2841_s21 = sshll.u32 %s3349_s20, 4  ;;  %s2842_s21 = int_to_ptr.vmem [resolvable:$true] %s2841_s21 }
0x18f2   :  { %v2594_v23 = vmul.f32 0.5, %v2593_v15  ;;  %2690 = vmatpush.bf16.msrb.mxu0 %v3054_v36 }
0x18f3   :  { %v2610_v48 = vmul.f32 %v3092_v41, %v2603_v11 }
0x18f4   :  { %v2595_v43 = vsub.f32 1.5, %v2594_v23 }
0x18f5   :  { %v4320_v28 = vadd.f32 %v3093_v56, %v2610_v48 }
0x18f6   :  { %v2596_v7 = vmul.f32 %v3289_v16, %v2595_v43  ;;  %2776 = vmatpush.bf16.msra.mxu0 %v3055_v40 }
0x18f8   :  { %v2600_v39 = vsel %vm2599_vm9, %v3289_v16, %v2596_v7 }
0x18f9   :  { %v2604_v24 = vmul.f32 %v2600_v39, %v4294_v10 }
0x18fa   :  { %2777 = vmatpush.bf16.msra.mxu0 %v3054_v36 }
0x18fb   :  { %v2611_v27 = vmul.f32 %v3092_v41, %v2604_v24 }
0x18fd   :  { %v4322_v8 = vadd.f32 %v3093_v56, %v2611_v27 }
0x18ff   :  { %v2746_v29 = vpack.c.bf16 %v4322_v8, %v4320_v28 }
0x1901   :  { %3032 = vmatmul.msk.bf16.vlgmr.msrb.gmra.mxu3 %vm84_vm0, %v2746_v29 }
0x1911   :  { %v2652_v12 = vpop.f32.mrf.mxu3 }
0x1912   :  { %v2653_v26 = vadd.f32 %v3094_v30, %v2652_v12 }
0x1914   :  { %3290 = vtanh.f32 %v2653_v26 }
0x1919   :  { %v2654_v3 = vpop.f32.mrf.mxu3 }
0x191a   :  { %v2655_v38 = vadd.f32 %v3094_v30, %v2654_v3  ;;  %v3291_v10 = vpop.eup %3290 }
0x191c   :  { %3292 = vtanh.f32 %v2655_v38 }
0x1922   :  { %v3293_v60 = vpop.eup %3292 }
0x1923   :  { %v2663_v62 = vpack.c.bf16 %v3293_v60, %v3291_v10 }
0x1925   :  { %3031 = vmatmul.msk.bf16.vlgmr.msrb.gmra.mxu0 %vm84_vm0, %v2663_v62 }
0x1984   :  { %v2759_v52 = vpop.f32.mrf.mxu3 }
0x1985   :  { %v2760_v4 = vadd.f32 %v3094_v30, %v2759_v52 }
0x1987   :  { %3294 = vtanh.f32 %v2760_v4 }
0x198c   :  { %v2761_v32 = vpop.f32.mrf.mxu3 }
0x198d   :  { %v2762_v25 = vadd.f32 %v3094_v30, %v2761_v32  ;;  %v3295_v37 = vpop.eup %3294 }
0x198f   :  { %3296 = vtanh.f32 %v2762_v25 }
0x1995   :  { %v3297_v31 = vpop.eup %3296 }
0x1996   :  { %v2766_v19 = vpack.c.bf16 %v3297_v31, %v3295_v37 }
0x1998   :  { %3033 = vmatmul.msk.bf16.vlgmr.msra.gmra.mxu0 %vm84_vm0, %v2766_v19 }
0x19a2   :  { %v2692_v21 = vpop.f32.mrf.mxu0 }
0x19a3   :  { %v2693_v49 = vadd.f32 %v3095_v42, %v2692_v21 }
0x19a5   :  { %v2698_v47 = vsel %vm2697_vm10, %v2693_v49, -inf }
0x19aa   :  { %v2694_v45 = vpop.f32.mrf.mxu0 }
0x19ab   :  { %v2695_v46 = vadd.f32 %v3095_v42, %v2694_v45 }
0x19ad   :  { %v2699_v54 = vsel %vm2697_vm10, %v2695_v46, -inf }
0x19ae   :  { %v2700_v61 = vmax.f32 %v2698_v47, %v2699_v54 }
0x19b0   :  { %v2701_v35 = vrot.slane %v2700_v61, 4 }
0x19b2   :  { %v2702_v41 = vmax.f32 %v2700_v61, %v2701_v35 }
0x19b4   :  { %v2703_v22 = vrot.slane %v2702_v41, 2 }
0x19b6   :  { %v2704_v63 = vmax.f32 %v2702_v41, %v2703_v22 }
0x19b8   :  { %v2705_v56 = vrot.slane %v2704_v63, 1 }
0x19ba   :  { %v2706_v0 = vmax.f32 %v2704_v63, %v2705_v56 }
0x19bc   :  { %v2707_v1 = vsub.f32 %v2693_v49, %v2706_v0  ;;  %v2708_v2 = vsub.f32 %v2695_v46, %v2706_v0 }
0x19be   :  { %v2709_v6 = vmul.f32 1.442695, %v2707_v1  ;;  %v2711_v51 = vmul.f32 1.442695, %v2708_v2 }
0x19c0   :  { %3298 = vpow2.f32 %v2709_v6 }
0x19c1   :  { %3300 = vpow2.f32 %v2711_v51 }
0x19c6   :  { %v3299_v5 = vpop.eup %3298 }
0x19c7   :  { %v3301_v9 = vpop.eup %3300  ;;  %v2713_v33 = vsel %vm2697_vm10, %v3299_v5, 0.0 }
0x19c8   :  { %v2714_v57 = vsel %vm2697_vm10, %v3301_v9, 0.0 }
0x19c9   :  { %v2715_v50 = vadd.f32 %v2714_v57, %v2713_v33 }
0x19cb   :  { %v2716_v20 = vrot.slane %v2715_v50, 4 }
0x19cd   :  { %v2717_v13 = vadd.f32 %v2716_v20, %v2715_v50 }
0x19cf   :  { %v2718_v44 = vrot.slane %v2717_v13, 2 }
0x19d1   :  { %v2719_v58 = vadd.f32 %v2718_v44, %v2717_v13 }
0x19d3   :  { %v2720_v14 = vrot.slane %v2719_v58, 1 }
0x19d5   :  { %v2721_v16 = vadd.f32 %v2720_v14, %v2719_v58 }
0x19d7   :  { %3302 = vrcp.f32 %v2721_v16 }
0x19dd   :  { %v3303_v34 = vpop.eup %3302 }
0x19de   :  { %v2724_v18 = vmul.f32 %v3303_v34, %v3301_v9  ;;  %v2723_v15 = vmul.f32 %v3303_v34, %v3299_v5 }
0x19e0   :  { %2732 = vperm.xlu0 %3071, %v2724_v18   ;;  %2727 = vperm.xlu2 %3070, %v2723_v15  }
0x1a15   :  { %v2779_v55 = vpop.f32.mrf.mxu0 }
0x1a16   :  { %v2780_v23 = vadd.f32 %v3095_v42, %v2779_v55 }
0x1a18   :  { %v2784_v7 = vsel %vm2697_vm10, %v2780_v23, -inf }
0x1a1d   :  { %v2781_v43 = vpop.f32.mrf.mxu0 }
0x1a1e   :  { %v2782_v11 = vadd.f32 %v3095_v42, %v2781_v43 }
0x1a20   :  { %v2785_v39 = vsel %vm2697_vm10, %v2782_v11, -inf }
0x1a21   :  { %v2786_v48 = vmax.f32 %v2784_v7, %v2785_v39 }
0x1a23   :  { %v2787_v24 = vrot.slane %v2786_v48, 4 }
0x1a25   :  { %v2788_v27 = vmax.f32 %v2786_v48, %v2787_v24 }
0x1a27   :  { %v2789_v40 = vrot.slane %v2788_v27, 2 }
0x1a29   :  { %v2790_v29 = vmax.f32 %v2788_v27, %v2789_v40 }
0x1a2b   :  { %v2791_v36 = vrot.slane %v2790_v29, 1 }
0x1a2d   :  { %v2792_v12 = vmax.f32 %v2790_v29, %v2791_v36 }
0x1a2f   :  { %v2793_v30 = vsub.f32 %v2780_v23, %v2792_v12  ;;  %v2794_v26 = vsub.f32 %v2782_v11, %v2792_v12 }
0x1a31   :  { %v2795_v3 = vmul.f32 1.442695, %v2793_v30  ;;  %v2797_v38 = vmul.f32 1.442695, %v2794_v26 }
0x1a33   :  { %3304 = vpow2.f32 %v2795_v3 }
0x1a34   :  { %3306 = vpow2.f32 %v2797_v38 }
0x1a39   :  { %v3305_v10 = vpop.eup %3304 }
0x1a3a   :  { %v3307_v60 = vpop.eup %3306  ;;  %v2799_v62 = vsel %vm2697_vm10, %v3305_v10, 0.0  ;;  %v2728_v47 = vpop.permute.xlu2 %2727 }
0x1a3b   :  { %v2800_v52 = vsel %vm2697_vm10, %v3307_v60, 0.0  ;;  %v2735_v61 = vmul.f32 %v2728_v47, %v4309_v53 }
0x1a3c   :  { %v2801_v4 = vadd.f32 %v2800_v52, %v2799_v62 }
0x1a3d   :  { %v2737_v41 = vsel %vm84_vm0, %v2735_v61, 0.0 }
0x1a3e   :  { %v2802_v32 = vrot.slane %v2801_v4, 4 }
0x1a40   :  { %v2803_v25 = vadd.f32 %v2802_v32, %v2801_v4 }
0x1a42   :  { %v2804_v37 = vrot.slane %v2803_v25, 2 }
0x1a44   :  { %v2805_v31 = vadd.f32 %v2804_v37, %v2803_v25 }
0x1a46   :  { %v2806_v19 = vrot.slane %v2805_v31, 1 }
0x1a48   :  { %v2807_v21 = vadd.f32 %v2806_v19, %v2805_v31 }
0x1a4a   :  { %3308 = vrcp.f32 %v2807_v21 }
0x1a50   :  { %v3309_v42 = vpop.eup %3308 }
0x1a51   :  { %v2810_v49 = vmul.f32 %v3309_v42, %v3307_v60  ;;  %v2809_v45 = vmul.f32 %v3309_v42, %v3305_v10 }
0x1a52   :  { %v2733_v46 = vpop.permute.xlu0 %2732 }
0x1a53   :  { %2818 = vperm.xlu2 %3070, %v2810_v49   ;;  %2813 = vperm.xlu1 %3072, %v2809_v45   ;;  %v2736_v54 = vmul.f32 %v2733_v46, %v4311_v17 }
0x1a55   :  { %v2738_v35 = vsel %vm84_vm0, %v2736_v54, 0.0 }
0x1a56   :  { %v2739_v59 = vadd.f32 %v2738_v35, %v2737_v41 }
0x1a58   :  { %v2740_v22 = vrot.slane %v2739_v59, 4 }
0x1a5a   :  { %v2741_v0 = vadd.f32 %v2740_v22, %v2739_v59 }
0x1a5c   :  { %v2742_v17 = vrot.slane %v2741_v0, 2 }
0x1a5e   :  { %v2743_v9 = vadd.f32 %v2742_v17, %v2741_v0 }
0x1a60   :  { %v2744_v50 = vrot.slane %v2743_v9, 1 }
0x1aad   :  { %v2819_v63 = vpop.permute.xlu2 %2818 }
0x1aae   :  { %v2822_v56 = vmul.f32 %v2819_v63, %v4322_v8 }
0x1ab0   :  { %v2824_v6 = vsel %vm84_vm0, %v2822_v56, 0.0 }
0x1ac5   :  { %v2814_v1 = vpop.permute.xlu1 %2813 }
0x1ac6   :  { %v2821_v2 = vmul.f32 %v2814_v1, %v4320_v28  ;;  %v2745_v28 = vadd.f32 %v2744_v50, %v2743_v9 }
0x1ac8   :  { %v2823_v51 = vsel %vm84_vm0, %v2821_v2, 0.0 }
0x1ac9   :  { %v2825_v5 = vadd.f32 %v2824_v6, %v2823_v51 }
0x1acb   :  { %v2826_v53 = vrot.slane %v2825_v5, 4 }
0x1acd   :  { %v2827_v33 = vadd.f32 %v2826_v53, %v2825_v5 }
0x1acf   :  { %v2828_v57 = vrot.slane %v2827_v33, 2 }
0x1ad1   :  { %v2829_v20 = vadd.f32 %v2828_v57, %v2827_v33 }
0x1ad3   :  { %v2830_v13 = vrot.slane %v2829_v20, 1 }
0x1ad5   :  { %v2831_v8 = vadd.f32 %v2830_v13, %v2829_v20 }
0x1ad7   :  { %v2833_v44 = vsel %vm2832_vm11, %v2745_v28, %v2831_v8 }
0x1ad8   :  { %2835 = vst.msk [vmem:[#allocation3] sm:$0x3] %vm2834_vm12, %v2833_v44 }
0x1ad9   :  { %2846 = dma.vmem_to_hbm [thread:$0]  %s2842_s21, 32, %s2844_s11, [#allocation4]  }
0x1ada   :  { %3334 = dma.done.wait [#allocation4], 32  }
0x1adb   :  { %3335 = vsyncadd [#allocation4], 4294967264 }
0x1adc   :  { %2851 = vsyncpa [#allocation4], 1 }

</bundles_post_ra>
